<compile_context>
chip_gen: v7x
topology: tpu7x:2x2x1
jax: 0.10.0
libtpu: 0.0.40
codegen_flags: <defaults>
</compile_context>

<pallas_src>
import jax
import jax.numpy as jnp
from jax.experimental import pallas as pl
from jax.experimental.pallas import tpu as pltpu


# ------------------------------ fused kernel -------------------------------


def _lenet_fused_kernel(x_ref, m1_ref, s1_ref, b1_ref, r1_ref, c1_ref,
                        m2_ref, s2_ref, b2_ref, r2_ref, c2_ref,
                        w1x_ref, ex_ref, bf1_ref, wf2_ref, bf2_ref,
                        wf3_ref, bf3_ref, o_ref):
    f32 = jnp.float32
    bf16 = jnp.bfloat16

    def mm(a, b):
        return jnp.dot(a, b, preferred_element_type=f32)

    x = x_ref[0]                                            # [96, 32] bf16

    # conv1 + bias + ReLU: 5 banded matmuls over kernel-column shifts.
    acc = jnp.zeros((168, 28), f32)
    for dx in range(5):
        xs = mm(x, s1_ref[dx]).astype(bf16)                 # [96, 28]
        acc = acc + mm(m1_ref[dx], xs)                      # [168, 28]
    a1 = jnp.maximum(acc + b1_ref[...], 0.0).astype(bf16)   # [6*28, 28]

    # pool1 (2x2): even/odd row selectors (left) then column selectors (right).
    rp1 = jnp.maximum(mm(r1_ref[0], a1), mm(r1_ref[1], a1)).astype(bf16)   # [84, 28]
    p1 = jnp.maximum(mm(rp1, c1_ref[0]), mm(rp1, c1_ref[1])).astype(bf16)  # [6*14, 14]

    # conv2 + bias + ReLU.
    acc2 = jnp.zeros((160, 10), f32)
    for dx in range(5):
        ps = mm(p1, s2_ref[dx]).astype(bf16)                # [84, 10]
        acc2 = acc2 + mm(m2_ref[dx], ps)                    # [160, 10]
    a2 = jnp.maximum(acc2 + b2_ref[...], 0.0).astype(bf16)  # [16*10, 10]

    # pool2 (2x2).
    rp2 = jnp.maximum(mm(r2_ref[0], a2), mm(r2_ref[1], a2)).astype(bf16)   # [80, 10]
    p2 = jnp.maximum(mm(rp2, c2_ref[0]), mm(rp2, c2_ref[1])).astype(bf16)  # [16*5, 5]

    # fc1: flatten (c*25 + y*5 + x) expressed as 5 accumulated column picks.
    h = jnp.zeros((120, 1), f32)
    for xc in range(5):
        col = mm(p2, ex_ref[xc]).astype(bf16)               # [80, 1] = p2[:, xc]
        h = h + mm(w1x_ref[xc], col)                        # [120, 1]
    h1 = jnp.maximum(h + bf1_ref[...], 0.0).astype(bf16)    # [120, 1]

    # fc2 + ReLU, fc3 (column-vector formulation, no transposes needed).
    h2 = jnp.maximum(mm(wf2_ref[...], h1) + bf2_ref[...], 0.0).astype(bf16)  # [84, 1]
    out = mm(wf3_ref[...], h2) + bf3_ref[...]               # [num_classes, 1] f32

    o_ref[0] = out.astype(o_ref.dtype)


# --------------------------- weight repacking -------------------------------


def _conv_band_matrices(w, h_in):
    """w: [OC, C, KH, KW] -> m: [KW, OC*OH, C*h_in] with
    m[dx, oc*OH+yo, c*h_in+yi] = w[oc, c, yi-yo, dx] if 0 <= yi-yo < KH else 0."""
    OC, C, KH, KW = w.shape
    OH = h_in - KH + 1
    yo = jnp.arange(OH)[:, None]
    yi = jnp.arange(h_in)[None, :]
    dy = yi - yo                                   # [OH, h_in]
    valid = (dy >= 0) & (dy < KH)
    dyc = jnp.clip(dy, 0, KH - 1)
    wg = w[:, :, dyc, :]                           # [OC, C, OH, h_in, KW]
    wg = jnp.where(valid[None, None, :, :, None], wg, 0.0)
    m = jnp.transpose(wg, (4, 0, 2, 1, 3)).reshape(KW, OC * OH, C * h_in)
    return m


def _shift_selectors(w_in, kw):
    """[kw, w_in, w_out]: (x @ s[dx])[:, xo] == x[:, xo + dx]."""
    w_out = w_in - kw + 1
    xi = jnp.arange(w_in)[:, None]
    xo = jnp.arange(w_out)[None, :]
    return jnp.stack([(xi == xo + dx).astype(jnp.float32) for dx in range(kw)])


def _pool_selectors(n_rows_in, n_cols_in):
    """Even/odd selectors for 2x2 max-pool.
    rows: left-multiply [2, n/2, n]; cols: right-multiply [2, n, n/2]."""
    ro = jnp.arange(n_rows_in // 2)[:, None]
    ri = jnp.arange(n_rows_in)[None, :]
    r_sel = jnp.stack([(ri == 2 * ro).astype(jnp.float32),
                       (ri == 2 * ro + 1).astype(jnp.float32)])
    ci = jnp.arange(n_cols_in)[:, None]
    co = jnp.arange(n_cols_in // 2)[None, :]
    c_sel = jnp.stack([(ci == 2 * co).astype(jnp.float32),
                       (ci == 2 * co + 1).astype(jnp.float32)])
    return r_sel, c_sel


# ------------------------------ forward pass --------------------------------


def lenet_forward(params, x):
    """x: [B, 3, 32, 32] (NCHW) -> logits [B, num_classes]."""
    B = x.shape[0]
    num_classes = params["fc3_b"].shape[0]
    f32, bf16 = jnp.float32, jnp.bfloat16

    # --- repack weights into MXU-friendly matrices (tiny; weights only) ---
    m1 = _conv_band_matrices(params["conv1_w"], 32).astype(bf16)   # [5, 168, 96]
    m2 = _conv_band_matrices(params["conv2_w"], 14).astype(bf16)   # [5, 160, 84]
    s1 = _shift_selectors(32, 5).astype(bf16)                      # [5, 32, 28]
    s2 = _shift_selectors(14, 5).astype(bf16)                      # [5, 14, 10]
    r1, c1 = _pool_selectors(6 * 28, 28)                           # [2,84,168], [2,28,14]
    r2, c2 = _pool_selectors(16 * 10, 10)                          # [2,80,160], [2,10,5]
    r1, c1, r2, c2 = (a.astype(bf16) for a in (r1, c1, r2, c2))
    b1r = jnp.repeat(params["conv1_b"], 28).reshape(168, 1).astype(f32)
    b2r = jnp.repeat(params["conv2_b"], 10).reshape(160, 1).astype(f32)
    # fc1 weight [400, 120] with flat index c*25 + y*5 + x -> [x, out, c*5+y]
    w1x = jnp.transpose(params["fc1_w"].reshape(16, 5, 5, 120),
                        (2, 3, 0, 1)).reshape(5, 120, 80).astype(bf16)
    ex = jnp.eye(5, dtype=bf16)[:, :, None]                        # [5, 5, 1]
    bf1 = params["fc1_b"].reshape(120, 1).astype(f32)
    wf2 = params["fc2_w"].T.astype(bf16)                           # [84, 120]
    bf2 = params["fc2_b"].reshape(84, 1).astype(f32)
    wf3 = params["fc3_w"].T.astype(bf16)                           # [NC, 84]
    bf3 = params["fc3_b"].reshape(num_classes, 1).astype(f32)

    # Input image i as a 2-D slab: rows = c*32 + y, lanes = x.
    xr = x.reshape(B, 3 * 32, 32).astype(bf16)                     # [B, 96, 32]

    weights = [m1, s1, b1r, r1, c1, m2, s2, b2r, r2, c2,
               w1x, ex, bf1, wf2, bf2, wf3, bf3]

    in_specs = [pl.BlockSpec((1, 96, 32), lambda i: (i, 0, 0))]
    for wgt in weights:
        # Full-array blocks with constant index maps -> resident in VMEM.
        in_specs.append(pl.BlockSpec(wgt.shape, lambda i, nd=wgt.ndim: (0,) * nd))

    out = pl.pallas_call(
        _lenet_fused_kernel,
        out_shape=jax.ShapeDtypeStruct((B, num_classes, 1), f32),
        grid=(B,),
        in_specs=in_specs,
        out_specs=pl.BlockSpec((1, num_classes, 1), lambda i: (i, 0, 0)),
        compiler_params=pltpu.CompilerParams(
            dimension_semantics=("parallel",),
            vmem_limit_bytes=32 * 1024 * 1024),
    )(xr, *weights)
    return out.reshape(B, num_classes)


# ------------------------------ parameters ----------------------------------


def init_lenet_params(key, num_classes=10):
    ks = jax.random.split(key, 8)

    def kaiming_normal(k, shape, fan_in):
        return jax.random.normal(k, shape, jnp.float32) * jnp.sqrt(2.0 / fan_in)

    def uniform_init(k, shape, fan_in):
        bound = 1.0 / jnp.sqrt(fan_in)
        return jax.random.uniform(k, shape, jnp.float32, -bound, bound)

    return {
        "conv1_w": kaiming_normal(ks[0], (6, 3, 5, 5), 3 * 5 * 5),
        "conv1_b": uniform_init(ks[1], (6,), 3 * 5 * 5),
        "conv2_w": kaiming_normal(ks[2], (16, 6, 5, 5), 6 * 5 * 5),
        "conv2_b": uniform_init(ks[3], (16,), 6 * 5 * 5),
        # Linear biases are zeroed in the PyTorch module's __init__.
        "fc1_w": uniform_init(ks[4], (400, 120), 400.0),
        "fc1_b": jnp.zeros((120,), jnp.float32),
        "fc2_w": uniform_init(ks[5], (120, 84), 120.0),
        "fc2_b": jnp.zeros((84,), jnp.float32),
        "fc3_w": uniform_init(ks[6], (84, num_classes), 84.0),
        "fc3_b": jnp.zeros((num_classes,), jnp.float32),
    }


if __name__ == "__main__":
    key = jax.random.PRNGKey(0)
    k_param, k_x = jax.random.split(key)
    params = init_lenet_params(k_param, num_classes=10)
    x = jax.random.normal(k_x, (2, 3, 32, 32), jnp.float32)

    forward = jax.jit(lenet_forward)
    out = jax.block_until_ready(forward(params, x))
    assert out.shape == (2, 10), out.shape
    assert bool(jnp.all(jnp.isfinite(out)))
    print("KERNEL_OK")
</pallas_src>

<mosaic_0001>
module attributes {stable_mosaic.version = 11 : i64} {
  func.func @_lenet_fused_kernel(%arg0: i32, %arg1: memref<1x96x32xbf16, #tpu.memory_space<vmem>>, %arg2: memref<5x168x96xbf16, #tpu.memory_space<vmem>>, %arg3: memref<5x32x28xbf16, #tpu.memory_space<vmem>>, %arg4: memref<168x1xf32, #tpu.memory_space<vmem>>, %arg5: memref<2x84x168xbf16, #tpu.memory_space<vmem>>, %arg6: memref<2x28x14xbf16, #tpu.memory_space<vmem>>, %arg7: memref<5x160x84xbf16, #tpu.memory_space<vmem>>, %arg8: memref<5x14x10xbf16, #tpu.memory_space<vmem>>, %arg9: memref<160x1xf32, #tpu.memory_space<vmem>>, %arg10: memref<2x80x160xbf16, #tpu.memory_space<vmem>>, %arg11: memref<2x10x5xbf16, #tpu.memory_space<vmem>>, %arg12: memref<5x120x80xbf16, #tpu.memory_space<vmem>>, %arg13: memref<5x5x1xbf16, #tpu.memory_space<vmem>>, %arg14: memref<120x1xf32, #tpu.memory_space<vmem>>, %arg15: memref<84x120xbf16, #tpu.memory_space<vmem>>, %arg16: memref<84x1xf32, #tpu.memory_space<vmem>>, %arg17: memref<10x84xbf16, #tpu.memory_space<vmem>>, %arg18: memref<10x1xf32, #tpu.memory_space<vmem>>, %arg19: memref<1x10x1xf32, #tpu.memory_space<vmem>>) attributes {dimension_semantics = [#tpu.dimension_semantics<parallel>], iteration_bounds = array<i64: 2>, scalar_prefetch = 0 : i64, scratch_operands = 0 : i64, tpu.core_type = #tpu.core_type<tc>, window_params = [{transform_indices = @transform_0, window_bounds = array<i64: 1, 96, 32>}, {pipeline_mode = #tpu.pipeline_mode<synchronous>, transform_indices = @transform_1, window_bounds = array<i64: 5, 168, 96>}, {pipeline_mode = #tpu.pipeline_mode<synchronous>, transform_indices = @transform_2, window_bounds = array<i64: 5, 32, 28>}, {pipeline_mode = #tpu.pipeline_mode<synchronous>, transform_indices = @transform_3, window_bounds = array<i64: 168, 1>}, {pipeline_mode = #tpu.pipeline_mode<synchronous>, transform_indices = @transform_4, window_bounds = array<i64: 2, 84, 168>}, {pipeline_mode = #tpu.pipeline_mode<synchronous>, transform_indices = @transform_5, window_bounds = array<i64: 2, 28, 14>}, {pipeline_mode = #tpu.pipeline_mode<synchronous>, transform_indices = @transform_6, window_bounds = array<i64: 5, 160, 84>}, {pipeline_mode = #tpu.pipeline_mode<synchronous>, transform_indices = @transform_7, window_bounds = array<i64: 5, 14, 10>}, {pipeline_mode = #tpu.pipeline_mode<synchronous>, transform_indices = @transform_8, window_bounds = array<i64: 160, 1>}, {pipeline_mode = #tpu.pipeline_mode<synchronous>, transform_indices = @transform_9, window_bounds = array<i64: 2, 80, 160>}, {pipeline_mode = #tpu.pipeline_mode<synchronous>, transform_indices = @transform_10, window_bounds = array<i64: 2, 10, 5>}, {pipeline_mode = #tpu.pipeline_mode<synchronous>, transform_indices = @transform_11, window_bounds = array<i64: 5, 120, 80>}, {pipeline_mode = #tpu.pipeline_mode<synchronous>, transform_indices = @transform_12, window_bounds = array<i64: 5, 5, 1>}, {pipeline_mode = #tpu.pipeline_mode<synchronous>, transform_indices = @transform_13, window_bounds = array<i64: 120, 1>}, {pipeline_mode = #tpu.pipeline_mode<synchronous>, transform_indices = @transform_14, window_bounds = array<i64: 84, 120>}, {pipeline_mode = #tpu.pipeline_mode<synchronous>, transform_indices = @transform_15, window_bounds = array<i64: 84, 1>}, {pipeline_mode = #tpu.pipeline_mode<synchronous>, transform_indices = @transform_16, window_bounds = array<i64: 10, 84>}, {pipeline_mode = #tpu.pipeline_mode<synchronous>, transform_indices = @transform_17, window_bounds = array<i64: 10, 1>}, {transform_indices = @transform_18, window_bounds = array<i64: 1, 10, 1>}]} {
    %c0 = arith.constant 0 : index
    %c0_0 = arith.constant 0 : index
    %c0_1 = arith.constant 0 : index
    %0 = vector.load %arg1[%c0, %c0_0, %c0_1] : memref<1x96x32xbf16, #tpu.memory_space<vmem>>, vector<1x96x32xbf16>
    %1 = vector.shape_cast %0 : vector<1x96x32xbf16> to vector<96x32xbf16>
    %cst = arith.constant 0.000000e+00 : f32
    %2 = vector.broadcast %cst : f32 to vector<168x28xf32>
    %c0_2 = arith.constant 0 : index
    %c0_3 = arith.constant 0 : index
    %c0_4 = arith.constant 0 : index
    %3 = vector.load %arg3[%c0_2, %c0_3, %c0_4] : memref<5x32x28xbf16, #tpu.memory_space<vmem>>, vector<1x32x28xbf16>
    %4 = vector.shape_cast %3 : vector<1x32x28xbf16> to vector<32x28xbf16>
    %cst_5 = arith.constant dense<0.000000e+00> : vector<96x28xf32>
    %5 = tpu.matmul %1, %4, %cst_5 {dimension_numbers = #tpu.dot_dimension_numbers<[1], [0], [0], [1], [0, 0, 1, 1], [], []>} : vector<96x32xbf16>, vector<32x28xbf16>, vector<96x28xf32> -> vector<96x28xf32>
    %6 = arith.truncf %5 : vector<96x28xf32> to vector<96x28xbf16>
    %c0_6 = arith.constant 0 : index
    %c0_7 = arith.constant 0 : index
    %c0_8 = arith.constant 0 : index
    %7 = vector.load %arg2[%c0_6, %c0_7, %c0_8] : memref<5x168x96xbf16, #tpu.memory_space<vmem>>, vector<1x168x96xbf16>
    %8 = vector.shape_cast %7 : vector<1x168x96xbf16> to vector<168x96xbf16>
    %cst_9 = arith.constant dense<0.000000e+00> : vector<168x28xf32>
    %9 = tpu.matmul %8, %6, %cst_9 {dimension_numbers = #tpu.dot_dimension_numbers<[1], [0], [0], [1], [0, 0, 1, 1], [], []>} : vector<168x96xbf16>, vector<96x28xbf16>, vector<168x28xf32> -> vector<168x28xf32>
    %10 = arith.addf %2, %9 : vector<168x28xf32>
    %c1 = arith.constant 1 : index
    %c0_10 = arith.constant 0 : index
    %c0_11 = arith.constant 0 : index
    %11 = vector.load %arg3[%c1, %c0_10, %c0_11] : memref<5x32x28xbf16, #tpu.memory_space<vmem>>, vector<1x32x28xbf16>
    %12 = vector.shape_cast %11 : vector<1x32x28xbf16> to vector<32x28xbf16>
    %cst_12 = arith.constant dense<0.000000e+00> : vector<96x28xf32>
    %13 = tpu.matmul %1, %12, %cst_12 {dimension_numbers = #tpu.dot_dimension_numbers<[1], [0], [0], [1], [0, 0, 1, 1], [], []>} : vector<96x32xbf16>, vector<32x28xbf16>, vector<96x28xf32> -> vector<96x28xf32>
    %14 = arith.truncf %13 : vector<96x28xf32> to vector<96x28xbf16>
    %c1_13 = arith.constant 1 : index
    %c0_14 = arith.constant 0 : index
    %c0_15 = arith.constant 0 : index
    %15 = vector.load %arg2[%c1_13, %c0_14, %c0_15] : memref<5x168x96xbf16, #tpu.memory_space<vmem>>, vector<1x168x96xbf16>
    %16 = vector.shape_cast %15 : vector<1x168x96xbf16> to vector<168x96xbf16>
    %cst_16 = arith.constant dense<0.000000e+00> : vector<168x28xf32>
    %17 = tpu.matmul %16, %14, %cst_16 {dimension_numbers = #tpu.dot_dimension_numbers<[1], [0], [0], [1], [0, 0, 1, 1], [], []>} : vector<168x96xbf16>, vector<96x28xbf16>, vector<168x28xf32> -> vector<168x28xf32>
    %18 = arith.addf %10, %17 : vector<168x28xf32>
    %c2 = arith.constant 2 : index
    %c0_17 = arith.constant 0 : index
    %c0_18 = arith.constant 0 : index
    %19 = vector.load %arg3[%c2, %c0_17, %c0_18] : memref<5x32x28xbf16, #tpu.memory_space<vmem>>, vector<1x32x28xbf16>
    %20 = vector.shape_cast %19 : vector<1x32x28xbf16> to vector<32x28xbf16>
    %cst_19 = arith.constant dense<0.000000e+00> : vector<96x28xf32>
    %21 = tpu.matmul %1, %20, %cst_19 {dimension_numbers = #tpu.dot_dimension_numbers<[1], [0], [0], [1], [0, 0, 1, 1], [], []>} : vector<96x32xbf16>, vector<32x28xbf16>, vector<96x28xf32> -> vector<96x28xf32>
    %22 = arith.truncf %21 : vector<96x28xf32> to vector<96x28xbf16>
    %c2_20 = arith.constant 2 : index
    %c0_21 = arith.constant 0 : index
    %c0_22 = arith.constant 0 : index
    %23 = vector.load %arg2[%c2_20, %c0_21, %c0_22] : memref<5x168x96xbf16, #tpu.memory_space<vmem>>, vector<1x168x96xbf16>
    %24 = vector.shape_cast %23 : vector<1x168x96xbf16> to vector<168x96xbf16>
    %cst_23 = arith.constant dense<0.000000e+00> : vector<168x28xf32>
    %25 = tpu.matmul %24, %22, %cst_23 {dimension_numbers = #tpu.dot_dimension_numbers<[1], [0], [0], [1], [0, 0, 1, 1], [], []>} : vector<168x96xbf16>, vector<96x28xbf16>, vector<168x28xf32> -> vector<168x28xf32>
    %26 = arith.addf %18, %25 : vector<168x28xf32>
    %c3 = arith.constant 3 : index
    %c0_24 = arith.constant 0 : index
    %c0_25 = arith.constant 0 : index
    %27 = vector.load %arg3[%c3, %c0_24, %c0_25] : memref<5x32x28xbf16, #tpu.memory_space<vmem>>, vector<1x32x28xbf16>
    %28 = vector.shape_cast %27 : vector<1x32x28xbf16> to vector<32x28xbf16>
    %cst_26 = arith.constant dense<0.000000e+00> : vector<96x28xf32>
    %29 = tpu.matmul %1, %28, %cst_26 {dimension_numbers = #tpu.dot_dimension_numbers<[1], [0], [0], [1], [0, 0, 1, 1], [], []>} : vector<96x32xbf16>, vector<32x28xbf16>, vector<96x28xf32> -> vector<96x28xf32>
    %30 = arith.truncf %29 : vector<96x28xf32> to vector<96x28xbf16>
    %c3_27 = arith.constant 3 : index
    %c0_28 = arith.constant 0 : index
    %c0_29 = arith.constant 0 : index
    %31 = vector.load %arg2[%c3_27, %c0_28, %c0_29] : memref<5x168x96xbf16, #tpu.memory_space<vmem>>, vector<1x168x96xbf16>
    %32 = vector.shape_cast %31 : vector<1x168x96xbf16> to vector<168x96xbf16>
    %cst_30 = arith.constant dense<0.000000e+00> : vector<168x28xf32>
    %33 = tpu.matmul %32, %30, %cst_30 {dimension_numbers = #tpu.dot_dimension_numbers<[1], [0], [0], [1], [0, 0, 1, 1], [], []>} : vector<168x96xbf16>, vector<96x28xbf16>, vector<168x28xf32> -> vector<168x28xf32>
    %34 = arith.addf %26, %33 : vector<168x28xf32>
    %c4 = arith.constant 4 : index
    %c0_31 = arith.constant 0 : index
    %c0_32 = arith.constant 0 : index
    %35 = vector.load %arg3[%c4, %c0_31, %c0_32] : memref<5x32x28xbf16, #tpu.memory_space<vmem>>, vector<1x32x28xbf16>
    %36 = vector.shape_cast %35 : vector<1x32x28xbf16> to vector<32x28xbf16>
    %cst_33 = arith.constant dense<0.000000e+00> : vector<96x28xf32>
    %37 = tpu.matmul %1, %36, %cst_33 {dimension_numbers = #tpu.dot_dimension_numbers<[1], [0], [0], [1], [0, 0, 1, 1], [], []>} : vector<96x32xbf16>, vector<32x28xbf16>, vector<96x28xf32> -> vector<96x28xf32>
    %38 = arith.truncf %37 : vector<96x28xf32> to vector<96x28xbf16>
    %c4_34 = arith.constant 4 : index
    %c0_35 = arith.constant 0 : index
    %c0_36 = arith.constant 0 : index
    %39 = vector.load %arg2[%c4_34, %c0_35, %c0_36] : memref<5x168x96xbf16, #tpu.memory_space<vmem>>, vector<1x168x96xbf16>
    %40 = vector.shape_cast %39 : vector<1x168x96xbf16> to vector<168x96xbf16>
    %cst_37 = arith.constant dense<0.000000e+00> : vector<168x28xf32>
    %41 = tpu.matmul %40, %38, %cst_37 {dimension_numbers = #tpu.dot_dimension_numbers<[1], [0], [0], [1], [0, 0, 1, 1], [], []>} : vector<168x96xbf16>, vector<96x28xbf16>, vector<168x28xf32> -> vector<168x28xf32>
    %42 = arith.addf %34, %41 : vector<168x28xf32>
    %c0_38 = arith.constant 0 : index
    %c0_39 = arith.constant 0 : index
    %43 = vector.load %arg4[%c0_38, %c0_39] : memref<168x1xf32, #tpu.memory_space<vmem>>, vector<168x1xf32>
    %44 = vector.broadcast %43 : vector<168x1xf32> to vector<168x28xf32>
    %45 = arith.addf %42, %44 : vector<168x28xf32>
    %cst_40 = arith.constant 0.000000e+00 : f32
    %46 = vector.broadcast %cst_40 : f32 to vector<168x28xf32>
    %47 = arith.maximumf %45, %46 : vector<168x28xf32>
    %48 = arith.truncf %47 : vector<168x28xf32> to vector<168x28xbf16>
    %c0_41 = arith.constant 0 : index
    %c0_42 = arith.constant 0 : index
    %c0_43 = arith.constant 0 : index
    %49 = vector.load %arg5[%c0_41, %c0_42, %c0_43] : memref<2x84x168xbf16, #tpu.memory_space<vmem>>, vector<1x84x168xbf16>
    %50 = vector.shape_cast %49 : vector<1x84x168xbf16> to vector<84x168xbf16>
    %cst_44 = arith.constant dense<0.000000e+00> : vector<84x28xf32>
    %51 = tpu.matmul %50, %48, %cst_44 {dimension_numbers = #tpu.dot_dimension_numbers<[1], [0], [0], [1], [0, 0, 1, 1], [], []>} : vector<84x168xbf16>, vector<168x28xbf16>, vector<84x28xf32> -> vector<84x28xf32>
    %c1_45 = arith.constant 1 : index
    %c0_46 = arith.constant 0 : index
    %c0_47 = arith.constant 0 : index
    %52 = vector.load %arg5[%c1_45, %c0_46, %c0_47] : memref<2x84x168xbf16, #tpu.memory_space<vmem>>, vector<1x84x168xbf16>
    %53 = vector.shape_cast %52 : vector<1x84x168xbf16> to vector<84x168xbf16>
    %cst_48 = arith.constant dense<0.000000e+00> : vector<84x28xf32>
    %54 = tpu.matmul %53, %48, %cst_48 {dimension_numbers = #tpu.dot_dimension_numbers<[1], [0], [0], [1], [0, 0, 1, 1], [], []>} : vector<84x168xbf16>, vector<168x28xbf16>, vector<84x28xf32> -> vector<84x28xf32>
    %55 = arith.maximumf %51, %54 : vector<84x28xf32>
    %56 = arith.truncf %55 : vector<84x28xf32> to vector<84x28xbf16>
    %c0_49 = arith.constant 0 : index
    %c0_50 = arith.constant 0 : index
    %c0_51 = arith.constant 0 : index
    %57 = vector.load %arg6[%c0_49, %c0_50, %c0_51] : memref<2x28x14xbf16, #tpu.memory_space<vmem>>, vector<1x28x14xbf16>
    %58 = vector.shape_cast %57 : vector<1x28x14xbf16> to vector<28x14xbf16>
    %cst_52 = arith.constant dense<0.000000e+00> : vector<84x14xf32>
    %59 = tpu.matmul %56, %58, %cst_52 {dimension_numbers = #tpu.dot_dimension_numbers<[1], [0], [0], [1], [0, 0, 1, 1], [], []>} : vector<84x28xbf16>, vector<28x14xbf16>, vector<84x14xf32> -> vector<84x14xf32>
    %c1_53 = arith.constant 1 : index
    %c0_54 = arith.constant 0 : index
    %c0_55 = arith.constant 0 : index
    %60 = vector.load %arg6[%c1_53, %c0_54, %c0_55] : memref<2x28x14xbf16, #tpu.memory_space<vmem>>, vector<1x28x14xbf16>
    %61 = vector.shape_cast %60 : vector<1x28x14xbf16> to vector<28x14xbf16>
    %cst_56 = arith.constant dense<0.000000e+00> : vector<84x14xf32>
    %62 = tpu.matmul %56, %61, %cst_56 {dimension_numbers = #tpu.dot_dimension_numbers<[1], [0], [0], [1], [0, 0, 1, 1], [], []>} : vector<84x28xbf16>, vector<28x14xbf16>, vector<84x14xf32> -> vector<84x14xf32>
    %63 = arith.maximumf %59, %62 : vector<84x14xf32>
    %64 = arith.truncf %63 : vector<84x14xf32> to vector<84x14xbf16>
    %cst_57 = arith.constant 0.000000e+00 : f32
    %65 = vector.broadcast %cst_57 : f32 to vector<160x10xf32>
    %c0_58 = arith.constant 0 : index
    %c0_59 = arith.constant 0 : index
    %c0_60 = arith.constant 0 : index
    %66 = vector.load %arg8[%c0_58, %c0_59, %c0_60] : memref<5x14x10xbf16, #tpu.memory_space<vmem>>, vector<1x14x10xbf16>
    %67 = vector.shape_cast %66 : vector<1x14x10xbf16> to vector<14x10xbf16>
    %cst_61 = arith.constant dense<0.000000e+00> : vector<84x10xf32>
    %68 = tpu.matmul %64, %67, %cst_61 {dimension_numbers = #tpu.dot_dimension_numbers<[1], [0], [0], [1], [0, 0, 1, 1], [], []>} : vector<84x14xbf16>, vector<14x10xbf16>, vector<84x10xf32> -> vector<84x10xf32>
    %69 = arith.truncf %68 : vector<84x10xf32> to vector<84x10xbf16>
    %c0_62 = arith.constant 0 : index
    %c0_63 = arith.constant 0 : index
    %c0_64 = arith.constant 0 : index
    %70 = vector.load %arg7[%c0_62, %c0_63, %c0_64] : memref<5x160x84xbf16, #tpu.memory_space<vmem>>, vector<1x160x84xbf16>
    %71 = vector.shape_cast %70 : vector<1x160x84xbf16> to vector<160x84xbf16>
    %cst_65 = arith.constant dense<0.000000e+00> : vector<160x10xf32>
    %72 = tpu.matmul %71, %69, %cst_65 {dimension_numbers = #tpu.dot_dimension_numbers<[1], [0], [0], [1], [0, 0, 1, 1], [], []>} : vector<160x84xbf16>, vector<84x10xbf16>, vector<160x10xf32> -> vector<160x10xf32>
    %73 = arith.addf %65, %72 : vector<160x10xf32>
    %c1_66 = arith.constant 1 : index
    %c0_67 = arith.constant 0 : index
    %c0_68 = arith.constant 0 : index
    %74 = vector.load %arg8[%c1_66, %c0_67, %c0_68] : memref<5x14x10xbf16, #tpu.memory_space<vmem>>, vector<1x14x10xbf16>
    %75 = vector.shape_cast %74 : vector<1x14x10xbf16> to vector<14x10xbf16>
    %cst_69 = arith.constant dense<0.000000e+00> : vector<84x10xf32>
    %76 = tpu.matmul %64, %75, %cst_69 {dimension_numbers = #tpu.dot_dimension_numbers<[1], [0], [0], [1], [0, 0, 1, 1], [], []>} : vector<84x14xbf16>, vector<14x10xbf16>, vector<84x10xf32> -> vector<84x10xf32>
    %77 = arith.truncf %76 : vector<84x10xf32> to vector<84x10xbf16>
    %c1_70 = arith.constant 1 : index
    %c0_71 = arith.constant 0 : index
    %c0_72 = arith.constant 0 : index
    %78 = vector.load %arg7[%c1_70, %c0_71, %c0_72] : memref<5x160x84xbf16, #tpu.memory_space<vmem>>, vector<1x160x84xbf16>
    %79 = vector.shape_cast %78 : vector<1x160x84xbf16> to vector<160x84xbf16>
    %cst_73 = arith.constant dense<0.000000e+00> : vector<160x10xf32>
    %80 = tpu.matmul %79, %77, %cst_73 {dimension_numbers = #tpu.dot_dimension_numbers<[1], [0], [0], [1], [0, 0, 1, 1], [], []>} : vector<160x84xbf16>, vector<84x10xbf16>, vector<160x10xf32> -> vector<160x10xf32>
    %81 = arith.addf %73, %80 : vector<160x10xf32>
    %c2_74 = arith.constant 2 : index
    %c0_75 = arith.constant 0 : index
    %c0_76 = arith.constant 0 : index
    %82 = vector.load %arg8[%c2_74, %c0_75, %c0_76] : memref<5x14x10xbf16, #tpu.memory_space<vmem>>, vector<1x14x10xbf16>
    %83 = vector.shape_cast %82 : vector<1x14x10xbf16> to vector<14x10xbf16>
    %cst_77 = arith.constant dense<0.000000e+00> : vector<84x10xf32>
    %84 = tpu.matmul %64, %83, %cst_77 {dimension_numbers = #tpu.dot_dimension_numbers<[1], [0], [0], [1], [0, 0, 1, 1], [], []>} : vector<84x14xbf16>, vector<14x10xbf16>, vector<84x10xf32> -> vector<84x10xf32>
    %85 = arith.truncf %84 : vector<84x10xf32> to vector<84x10xbf16>
    %c2_78 = arith.constant 2 : index
    %c0_79 = arith.constant 0 : index
    %c0_80 = arith.constant 0 : index
    %86 = vector.load %arg7[%c2_78, %c0_79, %c0_80] : memref<5x160x84xbf16, #tpu.memory_space<vmem>>, vector<1x160x84xbf16>
    %87 = vector.shape_cast %86 : vector<1x160x84xbf16> to vector<160x84xbf16>
    %cst_81 = arith.constant dense<0.000000e+00> : vector<160x10xf32>
    %88 = tpu.matmul %87, %85, %cst_81 {dimension_numbers = #tpu.dot_dimension_numbers<[1], [0], [0], [1], [0, 0, 1, 1], [], []>} : vector<160x84xbf16>, vector<84x10xbf16>, vector<160x10xf32> -> vector<160x10xf32>
    %89 = arith.addf %81, %88 : vector<160x10xf32>
    %c3_82 = arith.constant 3 : index
    %c0_83 = arith.constant 0 : index
    %c0_84 = arith.constant 0 : index
    %90 = vector.load %arg8[%c3_82, %c0_83, %c0_84] : memref<5x14x10xbf16, #tpu.memory_space<vmem>>, vector<1x14x10xbf16>
    %91 = vector.shape_cast %90 : vector<1x14x10xbf16> to vector<14x10xbf16>
    %cst_85 = arith.constant dense<0.000000e+00> : vector<84x10xf32>
    %92 = tpu.matmul %64, %91, %cst_85 {dimension_numbers = #tpu.dot_dimension_numbers<[1], [0], [0], [1], [0, 0, 1, 1], [], []>} : vector<84x14xbf16>, vector<14x10xbf16>, vector<84x10xf32> -> vector<84x10xf32>
    %93 = arith.truncf %92 : vector<84x10xf32> to vector<84x10xbf16>
    %c3_86 = arith.constant 3 : index
    %c0_87 = arith.constant 0 : index
    %c0_88 = arith.constant 0 : index
    %94 = vector.load %arg7[%c3_86, %c0_87, %c0_88] : memref<5x160x84xbf16, #tpu.memory_space<vmem>>, vector<1x160x84xbf16>
    %95 = vector.shape_cast %94 : vector<1x160x84xbf16> to vector<160x84xbf16>
    %cst_89 = arith.constant dense<0.000000e+00> : vector<160x10xf32>
    %96 = tpu.matmul %95, %93, %cst_89 {dimension_numbers = #tpu.dot_dimension_numbers<[1], [0], [0], [1], [0, 0, 1, 1], [], []>} : vector<160x84xbf16>, vector<84x10xbf16>, vector<160x10xf32> -> vector<160x10xf32>
    %97 = arith.addf %89, %96 : vector<160x10xf32>
    %c4_90 = arith.constant 4 : index
    %c0_91 = arith.constant 0 : index
    %c0_92 = arith.constant 0 : index
    %98 = vector.load %arg8[%c4_90, %c0_91, %c0_92] : memref<5x14x10xbf16, #tpu.memory_space<vmem>>, vector<1x14x10xbf16>
    %99 = vector.shape_cast %98 : vector<1x14x10xbf16> to vector<14x10xbf16>
    %cst_93 = arith.constant dense<0.000000e+00> : vector<84x10xf32>
    %100 = tpu.matmul %64, %99, %cst_93 {dimension_numbers = #tpu.dot_dimension_numbers<[1], [0], [0], [1], [0, 0, 1, 1], [], []>} : vector<84x14xbf16>, vector<14x10xbf16>, vector<84x10xf32> -> vector<84x10xf32>
    %101 = arith.truncf %100 : vector<84x10xf32> to vector<84x10xbf16>
    %c4_94 = arith.constant 4 : index
    %c0_95 = arith.constant 0 : index
    %c0_96 = arith.constant 0 : index
    %102 = vector.load %arg7[%c4_94, %c0_95, %c0_96] : memref<5x160x84xbf16, #tpu.memory_space<vmem>>, vector<1x160x84xbf16>
    %103 = vector.shape_cast %102 : vector<1x160x84xbf16> to vector<160x84xbf16>
    %cst_97 = arith.constant dense<0.000000e+00> : vector<160x10xf32>
    %104 = tpu.matmul %103, %101, %cst_97 {dimension_numbers = #tpu.dot_dimension_numbers<[1], [0], [0], [1], [0, 0, 1, 1], [], []>} : vector<160x84xbf16>, vector<84x10xbf16>, vector<160x10xf32> -> vector<160x10xf32>
    %105 = arith.addf %97, %104 : vector<160x10xf32>
    %c0_98 = arith.constant 0 : index
    %c0_99 = arith.constant 0 : index
    %106 = vector.load %arg9[%c0_98, %c0_99] : memref<160x1xf32, #tpu.memory_space<vmem>>, vector<160x1xf32>
    %107 = vector.broadcast %106 : vector<160x1xf32> to vector<160x10xf32>
    %108 = arith.addf %105, %107 : vector<160x10xf32>
    %cst_100 = arith.constant 0.000000e+00 : f32
    %109 = vector.broadcast %cst_100 : f32 to vector<160x10xf32>
    %110 = arith.maximumf %108, %109 : vector<160x10xf32>
    %111 = arith.truncf %110 : vector<160x10xf32> to vector<160x10xbf16>
    %c0_101 = arith.constant 0 : index
    %c0_102 = arith.constant 0 : index
    %c0_103 = arith.constant 0 : index
    %112 = vector.load %arg10[%c0_101, %c0_102, %c0_103] : memref<2x80x160xbf16, #tpu.memory_space<vmem>>, vector<1x80x160xbf16>
    %113 = vector.shape_cast %112 : vector<1x80x160xbf16> to vector<80x160xbf16>
    %cst_104 = arith.constant dense<0.000000e+00> : vector<80x10xf32>
    %114 = tpu.matmul %113, %111, %cst_104 {dimension_numbers = #tpu.dot_dimension_numbers<[1], [0], [0], [1], [0, 0, 1, 1], [], []>} : vector<80x160xbf16>, vector<160x10xbf16>, vector<80x10xf32> -> vector<80x10xf32>
    %c1_105 = arith.constant 1 : index
    %c0_106 = arith.constant 0 : index
    %c0_107 = arith.constant 0 : index
    %115 = vector.load %arg10[%c1_105, %c0_106, %c0_107] : memref<2x80x160xbf16, #tpu.memory_space<vmem>>, vector<1x80x160xbf16>
    %116 = vector.shape_cast %115 : vector<1x80x160xbf16> to vector<80x160xbf16>
    %cst_108 = arith.constant dense<0.000000e+00> : vector<80x10xf32>
    %117 = tpu.matmul %116, %111, %cst_108 {dimension_numbers = #tpu.dot_dimension_numbers<[1], [0], [0], [1], [0, 0, 1, 1], [], []>} : vector<80x160xbf16>, vector<160x10xbf16>, vector<80x10xf32> -> vector<80x10xf32>
    %118 = arith.maximumf %114, %117 : vector<80x10xf32>
    %119 = arith.truncf %118 : vector<80x10xf32> to vector<80x10xbf16>
    %c0_109 = arith.constant 0 : index
    %c0_110 = arith.constant 0 : index
    %c0_111 = arith.constant 0 : index
    %120 = vector.load %arg11[%c0_109, %c0_110, %c0_111] : memref<2x10x5xbf16, #tpu.memory_space<vmem>>, vector<1x10x5xbf16>
    %121 = vector.shape_cast %120 : vector<1x10x5xbf16> to vector<10x5xbf16>
    %cst_112 = arith.constant dense<0.000000e+00> : vector<80x5xf32>
    %122 = tpu.matmul %119, %121, %cst_112 {dimension_numbers = #tpu.dot_dimension_numbers<[1], [0], [0], [1], [0, 0, 1, 1], [], []>} : vector<80x10xbf16>, vector<10x5xbf16>, vector<80x5xf32> -> vector<80x5xf32>
    %c1_113 = arith.constant 1 : index
    %c0_114 = arith.constant 0 : index
    %c0_115 = arith.constant 0 : index
    %123 = vector.load %arg11[%c1_113, %c0_114, %c0_115] : memref<2x10x5xbf16, #tpu.memory_space<vmem>>, vector<1x10x5xbf16>
    %124 = vector.shape_cast %123 : vector<1x10x5xbf16> to vector<10x5xbf16>
    %cst_116 = arith.constant dense<0.000000e+00> : vector<80x5xf32>
    %125 = tpu.matmul %119, %124, %cst_116 {dimension_numbers = #tpu.dot_dimension_numbers<[1], [0], [0], [1], [0, 0, 1, 1], [], []>} : vector<80x10xbf16>, vector<10x5xbf16>, vector<80x5xf32> -> vector<80x5xf32>
    %126 = arith.maximumf %122, %125 : vector<80x5xf32>
    %127 = arith.truncf %126 : vector<80x5xf32> to vector<80x5xbf16>
    %cst_117 = arith.constant 0.000000e+00 : f32
    %128 = vector.broadcast %cst_117 : f32 to vector<120x1xf32>
    %c0_118 = arith.constant 0 : index
    %c0_119 = arith.constant 0 : index
    %c0_120 = arith.constant 0 : index
    %129 = vector.load %arg13[%c0_118, %c0_119, %c0_120] : memref<5x5x1xbf16, #tpu.memory_space<vmem>>, vector<1x5x1xbf16>
    %130 = vector.shape_cast %129 : vector<1x5x1xbf16> to vector<5x1xbf16>
    %cst_121 = arith.constant dense<0.000000e+00> : vector<80x1xf32>
    %131 = tpu.matmul %127, %130, %cst_121 {dimension_numbers = #tpu.dot_dimension_numbers<[1], [0], [0], [1], [0, 0, 1, 1], [], []>} : vector<80x5xbf16>, vector<5x1xbf16>, vector<80x1xf32> -> vector<80x1xf32>
    %132 = arith.truncf %131 : vector<80x1xf32> to vector<80x1xbf16>
    %c0_122 = arith.constant 0 : index
    %c0_123 = arith.constant 0 : index
    %c0_124 = arith.constant 0 : index
    %133 = vector.load %arg12[%c0_122, %c0_123, %c0_124] : memref<5x120x80xbf16, #tpu.memory_space<vmem>>, vector<1x120x80xbf16>
    %134 = vector.shape_cast %133 : vector<1x120x80xbf16> to vector<120x80xbf16>
    %cst_125 = arith.constant dense<0.000000e+00> : vector<120x1xf32>
    %135 = tpu.matmul %134, %132, %cst_125 {dimension_numbers = #tpu.dot_dimension_numbers<[1], [0], [0], [1], [0, 0, 1, 1], [], []>} : vector<120x80xbf16>, vector<80x1xbf16>, vector<120x1xf32> -> vector<120x1xf32>
    %136 = arith.addf %128, %135 : vector<120x1xf32>
    %c1_126 = arith.constant 1 : index
    %c0_127 = arith.constant 0 : index
    %c0_128 = arith.constant 0 : index
    %137 = vector.load %arg13[%c1_126, %c0_127, %c0_128] : memref<5x5x1xbf16, #tpu.memory_space<vmem>>, vector<1x5x1xbf16>
    %138 = vector.shape_cast %137 : vector<1x5x1xbf16> to vector<5x1xbf16>
    %cst_129 = arith.constant dense<0.000000e+00> : vector<80x1xf32>
    %139 = tpu.matmul %127, %138, %cst_129 {dimension_numbers = #tpu.dot_dimension_numbers<[1], [0], [0], [1], [0, 0, 1, 1], [], []>} : vector<80x5xbf16>, vector<5x1xbf16>, vector<80x1xf32> -> vector<80x1xf32>
    %140 = arith.truncf %139 : vector<80x1xf32> to vector<80x1xbf16>
    %c1_130 = arith.constant 1 : index
    %c0_131 = arith.constant 0 : index
    %c0_132 = arith.constant 0 : index
    %141 = vector.load %arg12[%c1_130, %c0_131, %c0_132] : memref<5x120x80xbf16, #tpu.memory_space<vmem>>, vector<1x120x80xbf16>
    %142 = vector.shape_cast %141 : vector<1x120x80xbf16> to vector<120x80xbf16>
    %cst_133 = arith.constant dense<0.000000e+00> : vector<120x1xf32>
    %143 = tpu.matmul %142, %140, %cst_133 {dimension_numbers = #tpu.dot_dimension_numbers<[1], [0], [0], [1], [0, 0, 1, 1], [], []>} : vector<120x80xbf16>, vector<80x1xbf16>, vector<120x1xf32> -> vector<120x1xf32>
    %144 = arith.addf %136, %143 : vector<120x1xf32>
    %c2_134 = arith.constant 2 : index
    %c0_135 = arith.constant 0 : index
    %c0_136 = arith.constant 0 : index
    %145 = vector.load %arg13[%c2_134, %c0_135, %c0_136] : memref<5x5x1xbf16, #tpu.memory_space<vmem>>, vector<1x5x1xbf16>
    %146 = vector.shape_cast %145 : vector<1x5x1xbf16> to vector<5x1xbf16>
    %cst_137 = arith.constant dense<0.000000e+00> : vector<80x1xf32>
    %147 = tpu.matmul %127, %146, %cst_137 {dimension_numbers = #tpu.dot_dimension_numbers<[1], [0], [0], [1], [0, 0, 1, 1], [], []>} : vector<80x5xbf16>, vector<5x1xbf16>, vector<80x1xf32> -> vector<80x1xf32>
    %148 = arith.truncf %147 : vector<80x1xf32> to vector<80x1xbf16>
    %c2_138 = arith.constant 2 : index
    %c0_139 = arith.constant 0 : index
    %c0_140 = arith.constant 0 : index
    %149 = vector.load %arg12[%c2_138, %c0_139, %c0_140] : memref<5x120x80xbf16, #tpu.memory_space<vmem>>, vector<1x120x80xbf16>
    %150 = vector.shape_cast %149 : vector<1x120x80xbf16> to vector<120x80xbf16>
    %cst_141 = arith.constant dense<0.000000e+00> : vector<120x1xf32>
    %151 = tpu.matmul %150, %148, %cst_141 {dimension_numbers = #tpu.dot_dimension_numbers<[1], [0], [0], [1], [0, 0, 1, 1], [], []>} : vector<120x80xbf16>, vector<80x1xbf16>, vector<120x1xf32> -> vector<120x1xf32>
    %152 = arith.addf %144, %151 : vector<120x1xf32>
    %c3_142 = arith.constant 3 : index
    %c0_143 = arith.constant 0 : index
    %c0_144 = arith.constant 0 : index
    %153 = vector.load %arg13[%c3_142, %c0_143, %c0_144] : memref<5x5x1xbf16, #tpu.memory_space<vmem>>, vector<1x5x1xbf16>
    %154 = vector.shape_cast %153 : vector<1x5x1xbf16> to vector<5x1xbf16>
    %cst_145 = arith.constant dense<0.000000e+00> : vector<80x1xf32>
    %155 = tpu.matmul %127, %154, %cst_145 {dimension_numbers = #tpu.dot_dimension_numbers<[1], [0], [0], [1], [0, 0, 1, 1], [], []>} : vector<80x5xbf16>, vector<5x1xbf16>, vector<80x1xf32> -> vector<80x1xf32>
    %156 = arith.truncf %155 : vector<80x1xf32> to vector<80x1xbf16>
    %c3_146 = arith.constant 3 : index
    %c0_147 = arith.constant 0 : index
    %c0_148 = arith.constant 0 : index
    %157 = vector.load %arg12[%c3_146, %c0_147, %c0_148] : memref<5x120x80xbf16, #tpu.memory_space<vmem>>, vector<1x120x80xbf16>
    %158 = vector.shape_cast %157 : vector<1x120x80xbf16> to vector<120x80xbf16>
    %cst_149 = arith.constant dense<0.000000e+00> : vector<120x1xf32>
    %159 = tpu.matmul %158, %156, %cst_149 {dimension_numbers = #tpu.dot_dimension_numbers<[1], [0], [0], [1], [0, 0, 1, 1], [], []>} : vector<120x80xbf16>, vector<80x1xbf16>, vector<120x1xf32> -> vector<120x1xf32>
    %160 = arith.addf %152, %159 : vector<120x1xf32>
    %c4_150 = arith.constant 4 : index
    %c0_151 = arith.constant 0 : index
    %c0_152 = arith.constant 0 : index
    %161 = vector.load %arg13[%c4_150, %c0_151, %c0_152] : memref<5x5x1xbf16, #tpu.memory_space<vmem>>, vector<1x5x1xbf16>
    %162 = vector.shape_cast %161 : vector<1x5x1xbf16> to vector<5x1xbf16>
    %cst_153 = arith.constant dense<0.000000e+00> : vector<80x1xf32>
    %163 = tpu.matmul %127, %162, %cst_153 {dimension_numbers = #tpu.dot_dimension_numbers<[1], [0], [0], [1], [0, 0, 1, 1], [], []>} : vector<80x5xbf16>, vector<5x1xbf16>, vector<80x1xf32> -> vector<80x1xf32>
    %164 = arith.truncf %163 : vector<80x1xf32> to vector<80x1xbf16>
    %c4_154 = arith.constant 4 : index
    %c0_155 = arith.constant 0 : index
    %c0_156 = arith.constant 0 : index
    %165 = vector.load %arg12[%c4_154, %c0_155, %c0_156] : memref<5x120x80xbf16, #tpu.memory_space<vmem>>, vector<1x120x80xbf16>
    %166 = vector.shape_cast %165 : vector<1x120x80xbf16> to vector<120x80xbf16>
    %cst_157 = arith.constant dense<0.000000e+00> : vector<120x1xf32>
    %167 = tpu.matmul %166, %164, %cst_157 {dimension_numbers = #tpu.dot_dimension_numbers<[1], [0], [0], [1], [0, 0, 1, 1], [], []>} : vector<120x80xbf16>, vector<80x1xbf16>, vector<120x1xf32> -> vector<120x1xf32>
    %168 = arith.addf %160, %167 : vector<120x1xf32>
    %c0_158 = arith.constant 0 : index
    %c0_159 = arith.constant 0 : index
    %169 = vector.load %arg14[%c0_158, %c0_159] : memref<120x1xf32, #tpu.memory_space<vmem>>, vector<120x1xf32>
    %170 = arith.addf %168, %169 : vector<120x1xf32>
    %cst_160 = arith.constant 0.000000e+00 : f32
    %171 = vector.broadcast %cst_160 : f32 to vector<120x1xf32>
    %172 = arith.maximumf %170, %171 : vector<120x1xf32>
    %173 = arith.truncf %172 : vector<120x1xf32> to vector<120x1xbf16>
    %c0_161 = arith.constant 0 : index
    %c0_162 = arith.constant 0 : index
    %174 = vector.load %arg15[%c0_161, %c0_162] : memref<84x120xbf16, #tpu.memory_space<vmem>>, vector<84x120xbf16>
    %cst_163 = arith.constant dense<0.000000e+00> : vector<84x1xf32>
    %175 = tpu.matmul %174, %173, %cst_163 {dimension_numbers = #tpu.dot_dimension_numbers<[1], [0], [0], [1], [0, 0, 1, 1], [], []>} : vector<84x120xbf16>, vector<120x1xbf16>, vector<84x1xf32> -> vector<84x1xf32>
    %c0_164 = arith.constant 0 : index
    %c0_165 = arith.constant 0 : index
    %176 = vector.load %arg16[%c0_164, %c0_165] : memref<84x1xf32, #tpu.memory_space<vmem>>, vector<84x1xf32>
    %177 = arith.addf %175, %176 : vector<84x1xf32>
    %cst_166 = arith.constant 0.000000e+00 : f32
    %178 = vector.broadcast %cst_166 : f32 to vector<84x1xf32>
    %179 = arith.maximumf %177, %178 : vector<84x1xf32>
    %180 = arith.truncf %179 : vector<84x1xf32> to vector<84x1xbf16>
    %c0_167 = arith.constant 0 : index
    %c0_168 = arith.constant 0 : index
    %181 = vector.load %arg17[%c0_167, %c0_168] : memref<10x84xbf16, #tpu.memory_space<vmem>>, vector<10x84xbf16>
    %cst_169 = arith.constant dense<0.000000e+00> : vector<10x1xf32>
    %182 = tpu.matmul %181, %180, %cst_169 {dimension_numbers = #tpu.dot_dimension_numbers<[1], [0], [0], [1], [0, 0, 1, 1], [], []>} : vector<10x84xbf16>, vector<84x1xbf16>, vector<10x1xf32> -> vector<10x1xf32>
    %c0_170 = arith.constant 0 : index
    %c0_171 = arith.constant 0 : index
    %183 = vector.load %arg18[%c0_170, %c0_171] : memref<10x1xf32, #tpu.memory_space<vmem>>, vector<10x1xf32>
    %184 = arith.addf %182, %183 : vector<10x1xf32>
    %c0_172 = arith.constant 0 : index
    %c0_173 = arith.constant 0 : index
    %c0_174 = arith.constant 0 : index
    %185 = vector.load %arg19[%c0_172, %c0_173, %c0_174] : memref<1x10x1xf32, #tpu.memory_space<vmem>>, vector<1x10x1xf32>
    %186 = vector.shape_cast %185 : vector<1x10x1xf32> to vector<10x1xf32>
    %187 = vector.shape_cast %184 : vector<10x1xf32> to vector<1x10x1xf32>
    tpu.vector_store %arg19[%c0_172, %c0_173, %c0_174], %187 {strides = array<i32>} : memref<1x10x1xf32, #tpu.memory_space<vmem>>, vector<1x10x1xf32>,
    return
  }
  func.func @transform_0(%arg0: i32) -> (i32, i32, i32) {
    %c0_i32 = arith.constant 0 : i32
    %c0_i32_0 = arith.constant 0 : i32
    %c0_i32_1 = arith.constant 0 : i32
    return %arg0, %c0_i32, %c0_i32_0 : i32, i32, i32
  }
  func.func @transform_1(%arg0: i32) -> (i32, i32, i32) {
    %c0_i32 = arith.constant 0 : i32
    %c0_i32_0 = arith.constant 0 : i32
    %c0_i32_1 = arith.constant 0 : i32
    %c0_i32_2 = arith.constant 0 : i32
    return %c0_i32, %c0_i32_0, %c0_i32_1 : i32, i32, i32
  }
  func.func @transform_2(%arg0: i32) -> (i32, i32, i32) {
    %c0_i32 = arith.constant 0 : i32
    %c0_i32_0 = arith.constant 0 : i32
    %c0_i32_1 = arith.constant 0 : i32
    %c0_i32_2 = arith.constant 0 : i32
    return %c0_i32, %c0_i32_0, %c0_i32_1 : i32, i32, i32
  }
  func.func @transform_3(%arg0: i32) -> (i32, i32) {
    %c0_i32 = arith.constant 0 : i32
    %c0_i32_0 = arith.constant 0 : i32
    %c0_i32_1 = arith.constant 0 : i32
    return %c0_i32, %c0_i32_0 : i32, i32
  }
  func.func @transform_4(%arg0: i32) -> (i32, i32, i32) {
    %c0_i32 = arith.constant 0 : i32
    %c0_i32_0 = arith.constant 0 : i32
    %c0_i32_1 = arith.constant 0 : i32
    %c0_i32_2 = arith.constant 0 : i32
    return %c0_i32, %c0_i32_0, %c0_i32_1 : i32, i32, i32
  }
  func.func @transform_5(%arg0: i32) -> (i32, i32, i32) {
    %c0_i32 = arith.constant 0 : i32
    %c0_i32_0 = arith.constant 0 : i32
    %c0_i32_1 = arith.constant 0 : i32
    %c0_i32_2 = arith.constant 0 : i32
    return %c0_i32, %c0_i32_0, %c0_i32_1 : i32, i32, i32
  }
  func.func @transform_6(%arg0: i32) -> (i32, i32, i32) {
    %c0_i32 = arith.constant 0 : i32
    %c0_i32_0 = arith.constant 0 : i32
    %c0_i32_1 = arith.constant 0 : i32
    %c0_i32_2 = arith.constant 0 : i32
    return %c0_i32, %c0_i32_0, %c0_i32_1 : i32, i32, i32
  }
  func.func @transform_7(%arg0: i32) -> (i32, i32, i32) {
    %c0_i32 = arith.constant 0 : i32
    %c0_i32_0 = arith.constant 0 : i32
    %c0_i32_1 = arith.constant 0 : i32
    %c0_i32_2 = arith.constant 0 : i32
    return %c0_i32, %c0_i32_0, %c0_i32_1 : i32, i32, i32
  }
  func.func @transform_8(%arg0: i32) -> (i32, i32) {
    %c0_i32 = arith.constant 0 : i32
    %c0_i32_0 = arith.constant 0 : i32
    %c0_i32_1 = arith.constant 0 : i32
    return %c0_i32, %c0_i32_0 : i32, i32
  }
  func.func @transform_9(%arg0: i32) -> (i32, i32, i32) {
    %c0_i32 = arith.constant 0 : i32
    %c0_i32_0 = arith.constant 0 : i32
    %c0_i32_1 = arith.constant 0 : i32
    %c0_i32_2 = arith.constant 0 : i32
    return %c0_i32, %c0_i32_0, %c0_i32_1 : i32, i32, i32
  }
  func.func @transform_10(%arg0: i32) -> (i32, i32, i32) {
    %c0_i32 = arith.constant 0 : i32
    %c0_i32_0 = arith.constant 0 : i32
    %c0_i32_1 = arith.constant 0 : i32
    %c0_i32_2 = arith.constant 0 : i32
    return %c0_i32, %c0_i32_0, %c0_i32_1 : i32, i32, i32
  }
  func.func @transform_11(%arg0: i32) -> (i32, i32, i32) {
    %c0_i32 = arith.constant 0 : i32
    %c0_i32_0 = arith.constant 0 : i32
    %c0_i32_1 = arith.constant 0 : i32
    %c0_i32_2 = arith.constant 0 : i32
    return %c0_i32, %c0_i32_0, %c0_i32_1 : i32, i32, i32
  }
  func.func @transform_12(%arg0: i32) -> (i32, i32, i32) {
    %c0_i32 = arith.constant 0 : i32
    %c0_i32_0 = arith.constant 0 : i32
    %c0_i32_1 = arith.constant 0 : i32
    %c0_i32_2 = arith.constant 0 : i32
    return %c0_i32, %c0_i32_0, %c0_i32_1 : i32, i32, i32
  }
  func.func @transform_13(%arg0: i32) -> (i32, i32) {
    %c0_i32 = arith.constant 0 : i32
    %c0_i32_0 = arith.constant 0 : i32
    %c0_i32_1 = arith.constant 0 : i32
    return %c0_i32, %c0_i32_0 : i32, i32
  }
  func.func @transform_14(%arg0: i32) -> (i32, i32) {
    %c0_i32 = arith.constant 0 : i32
    %c0_i32_0 = arith.constant 0 : i32
    %c0_i32_1 = arith.constant 0 : i32
    return %c0_i32, %c0_i32_0 : i32, i32
  }
  func.func @transform_15(%arg0: i32) -> (i32, i32) {
    %c0_i32 = arith.constant 0 : i32
    %c0_i32_0 = arith.constant 0 : i32
    %c0_i32_1 = arith.constant 0 : i32
    return %c0_i32, %c0_i32_0 : i32, i32
  }
  func.func @transform_16(%arg0: i32) -> (i32, i32) {
    %c0_i32 = arith.constant 0 : i32
    %c0_i32_0 = arith.constant 0 : i32
    %c0_i32_1 = arith.constant 0 : i32
    return %c0_i32, %c0_i32_0 : i32, i32
  }
  func.func @transform_17(%arg0: i32) -> (i32, i32) {
    %c0_i32 = arith.constant 0 : i32
    %c0_i32_0 = arith.constant 0 : i32
    %c0_i32_1 = arith.constant 0 : i32
    return %c0_i32, %c0_i32_0 : i32, i32
  }
  func.func @transform_18(%arg0: i32) -> (i32, i32, i32) {
    %c0_i32 = arith.constant 0 : i32
    %c0_i32_0 = arith.constant 0 : i32
    %c0_i32_1 = arith.constant 0 : i32
    return %arg0, %c0_i32, %c0_i32_0 : i32, i32, i32
  }
}

</mosaic_0001>

<bundles_post_ra>
// kernel: lenet_forward.1
= control target key start
LH: loop header
LB: loop body
LE: loop exit
PB: predicated region body
PF: predicated region fallthrough
CT: control target
= control target key end

     0   :  { %s9762_s27 = smov 0   ;;  %s11572_s0 = inlined_call_operand.vmem [shape: bf16[2,96,32], index: 0, kind: input, shape index: {}]   ;;  %s11573_s1 = inlined_call_operand.vmem [shape: bf16[5,168,96], index: 1, kind: input, shape index: {}]   ;;  %s11574_s2 = inlined_call_operand.vmem [shape: bf16[5,32,28], index: 2, kind: input, shape index: {}]   ;;  %s11575_s3 = inlined_call_operand.vmem [shape: f32[168,1], index: 3, kind: input, shape index: {}]   ;;  %s11576_s4 = inlined_call_operand.vmem [shape: bf16[2,84,168], index: 4, kind: input, shape index: {}]   ;;  %s11577_s5 = inlined_call_operand.vmem [shape: bf16[2,28,14], index: 5, kind: input, shape index: {}]   ;;  %s11578_s6 = inlined_call_operand.vmem [shape: bf16[5,160,84], index: 6, kind: input, shape index: {}]   ;;  %s11579_s7 = inlined_call_operand.vmem [shape: bf16[5,14,10], index: 7, kind: input, shape index: {}]   ;;  %s11580_s8 = inlined_call_operand.vmem [shape: f32[160,1], index: 8, kind: input, shape index: {}]   ;;  %s11581_s9 = inlined_call_operand.vmem [shape: bf16[2,80,160], index: 9, kind: input, shape index: {}]   ;;  %s11582_s10 = inlined_call_operand.vmem [shape: bf16[2,10,5], index: 10, kind: input, shape index: {}]   ;;  %s11583_s11 = inlined_call_operand.vmem [shape: bf16[5,120,80], index: 11, kind: input, shape index: {}]   ;;  %s11584_s12 = inlined_call_operand.vmem [shape: bf16[5,5,1], index: 12, kind: input, shape index: {}]   ;;  %s11585_s13 = inlined_call_operand.vmem [shape: f32[120,1], index: 13, kind: input, shape index: {}]   ;;  %s11586_s14 = inlined_call_operand.vmem [shape: bf16[84,120], index: 14, kind: input, shape index: {}]   ;;  %s11587_s15 = inlined_call_operand.vmem [shape: f32[84,1], index: 15, kind: input, shape index: {}]   ;;  %s11588_s16 = inlined_call_operand.vmem [shape: bf16[10,84], index: 16, kind: input, shape index: {}]   ;;  %s11589_s17 = inlined_call_operand.vmem [shape: f32[10,1], index: 17, kind: input, shape index: {}]   ;;  %s11590_s18 = inlined_call_operand.vmem [shape: f32[2,10,1], index: 18, kind: output, shape index: {}]  }
   0x1   :  { %11593 = sst [smem:[#allocation2_spill]] %s11572_s0 }
   0x2   :  { %11594 = sst [smem:[#allocation3_spill]] %s11573_s1 }
   0x3   :  { %11595 = sst [smem:[#allocation4_spill]] %s11574_s2 }
   0x4 LB: > { %s7122_s28 = sadd.s32 4294967295, %s9661_s27   ;;  %p7126_p0 = scmp.ge.s32.totalorder %s9661_s27, 1  ;;  %s9661_s27 = sphi %s9762_s27, %s28_s27  }
   0x5   : > { %p512_p1 = scmp.lt.s32.totalorder %s9661_s27, 3 }
   0x7   : > { %p513_p2 = pnand %p7126_p0, %p512_p1 }
   0x8   : > { %s11596_s0 = sld [smem:[#allocation4_spill]] (!%p513_p2)  ;;  %p566_p3 = scmp.lt.s32.totalorder (!%p513_p2), %s7122_s28, 1  ;;  %vm635_vm0 = vcmask (!%p513_p2), 261120   ;;  %v9663_v10 = vmov (!%p513_p2), 0.0   ;;  %vm9664_vm1 = vmmov (!%p513_p2), 0   ;;  %vm941_vm2 = vcmask (!%p513_p2), 785408  }
   0x9   : > { %516 = sbr.rel (%p513_p2) target bundleno = 3988 (0xf94), region = 92  ;;  %s11597_s26 = sld [smem:[#allocation2_spill]] (!%p513_p2)  ;;  %vm2601_vm3 = vcmask (!%p513_p2), 326656   ;;  %vm2620_vm4 = vcmask (!%p513_p2), 1043456   ;;  %vm2916_vm5 = vcmask (!%p513_p2), 1045504   ;;  %vm2897_vm6 = vcmask (!%p513_p2), 228352  }
   0xa   : > { %s11598_s21 = sld [smem:[#allocation3_spill]] (!%p513_p2)  ;;  %vm3142_vm7 = vcmask (!%p513_p2), 1046528   ;;  %vm3123_vm8 = vcmask (!%p513_p2), 113664   ;;  %vm3420_vm9 = vcmask (!%p513_p2), 687104   ;;  %vm3451_vm10 = vcmask (!%p513_p2), 1041408  }
   0xb   : > { %vm5261_vm11 = vcmask (!%p513_p2), 1044480   ;;  %vm5245_vm12 = vcmask (!%p513_p2), 80896   ;;  %vm5454_vm13 = vcmask (!%p513_p2), 1042432   ;;  %vm5438_vm14 = vcmask (!%p513_p2), 39936  }
   0xc   : > { %vm5690_vm15 = vcmask (!%p513_p2), 654336  }
   0xe   : > { %v9406_v0 = vld [vmem:[%s11596_s0] sm:$0xff] (!%p513_p2)   ;;  %v9407_v1 = vld [vmem:[%s11596_s0 + $0x10] sm:$0xff] (!%p513_p2)   ;;  %v9408_v2 = vld [vmem:[%s11596_s0 + $0x8] sm:$0xff] (!%p513_p2)  }
   0xf   : > { %8300 = vmatprep.subr.bf16.mxu0 (!%p513_p2), %v9406_v0  ;;  %8316 = vmatprep.subr.bf16.mxu1 (!%p513_p2), %v9407_v1  ;;  %v9409_v3 = vld [vmem:[%s11596_s0 + $0x18] sm:$0xff] (!%p513_p2)   ;;  %v9434_v47 = vld [vmem:[%s11596_s0 + $0x20] sm:$0xff] (!%p513_p2)   ;;  %v9439_v50 = vld [vmem:[%s11596_s0 + $0x28] sm:$0xff] (!%p513_p2)  }
  0x10   : > { %s11600_s28 = smov (!%p566_p3, %s7122_s28), 1  ;;  %8301 = vmatpush3.bf16.msra.mxu0 %v9406_v0  ;;  %8317 = vmatpush3.bf16.msra.mxu1 %v9407_v1  ;;  %v9417_v48 = vld [vmem:[%s11598_s21] sm:$0xff]   ;;  %v9416_v49 = vld [vmem:[%s11598_s21 + $0x54] sm:$0xff]   ;;  %v9419_v52 = vld [vmem:[%s11598_s21 + $0x8] sm:$0xff]  }
  0x11   : > { %8302 = vmatprep.subr.bf16.mxu0 %v9408_v2  ;;  %s9391_s23 = smul.u32 48, %s11600_s28  ;;  %8318 = vmatprep.subr.bf16.mxu1 %v9409_v3  ;;  %v9850_v51 = vld [vmem:[%s11596_s0 + $0x30] sm:$0xff]   ;;  %v9418_v53 = vld [vmem:[%s11598_s21 + $0x5c] sm:$0xff]   ;;  %v9420_v55 = vld [vmem:[%s11598_s21 + $0x64] sm:$0xff]   ;;  %s7915_s20 = sshll.u32 %s11600_s28, 4 }
  0x12   : > { %v9421_v54 = vld [vmem:[%s11598_s21 + $0x10] sm:$0xff]   ;;  %v9423_v56 = vld [vmem:[%s11598_s21 + $0x18] sm:$0xff]   ;;  %v9425_v58 = vld [vmem:[%s11598_s21 + $0x20] sm:$0xff]   ;;  %s575_s25 = scalar_lea.vmem %s11590_s18, %s7915_s20 }
  0x13   : > { %s9788_s29 = scalar_lea.vmem %s11597_s26, %s9391_s23  ;;  %v9422_v57 = vld [vmem:[%s11598_s21 + $0x6c] sm:$0xff]   ;;  %v9424_v59 = vld [vmem:[%s11598_s21 + $0x74] sm:$0xff]   ;;  %v9426_v61 = vld [vmem:[%s11598_s21 + $0x7c] sm:$0xff]  }
  0x14   : > { %8303 = vmatpush3.bf16.msra.mxu0 %v9408_v2  ;;  %v9410_v4 = vld [vmem:[%s9788_s29] sm:$0xff]   ;;  %8319 = vmatpush3.bf16.msra.mxu1 %v9409_v3  ;;  %v9411_v5 = vld [vmem:[%s9788_s29 + $0x8] sm:$0xff]   ;;  %v9412_v6 = vld [vmem:[%s9788_s29 + $0x10] sm:$0xff]  }
  0x15   : > { %8304 = vmatprep.mubr.msk.bf16.mxu0 %vm635_vm0, %v9410_v4  ;;  %8320 = vmatprep.mubr.msk.bf16.mxu1 %vm635_vm0, %v9410_v4  ;;  %v9413_v7 = vld [vmem:[%s9788_s29 + $0x18] sm:$0xff]   ;;  %v9414_v8 = vld [vmem:[%s9788_s29 + $0x20] sm:$0xff]   ;;  %v9806_v9 = vld [vmem:[%s9788_s29 + $0x28] sm:$0xff]  }
  0x16   : > { %8332 = vmatprep.subr.bf16.mxu0 %v9663_v10  ;;  %8388 = vmatprep.subr.bf16.mxu1 %v9663_v10  ;;  %v9427_v60 = vld [vmem:[%s11598_s21 + $0x28] sm:$0xff]   ;;  %v9429_v62 = vld [vmem:[%s11598_s21 + $0x30] sm:$0xff]   ;;  %v9431_v0 = vld [vmem:[%s11598_s21 + $0x38] sm:$0xff]  }
  0x17   : > { %8305 = vmatmul.mubr.msk.bf16.vlgmr.msra.gmra.mrb[0].mxu0 %vm635_vm0, %v9411_v5  ;;  %8321 = vmatmul.mubr.msk.bf16.vlgmr.msra.gmra.mrb[0].mxu1 %vm635_vm0, %v9411_v5  ;;  %v9428_v63 = vld [vmem:[%s11598_s21 + $0x84] sm:$0xff]   ;;  %v9430_v1 = vld [vmem:[%s11598_s21 + $0x8c] sm:$0xff]   ;;  %v9432_v3 = vld [vmem:[%s11598_s21 + $0x94] sm:$0xff]  }
  0x18   : > { %8308 = vmatprep.mubr.msk.bf16.mxu0 %vm635_vm0, %v9412_v6  ;;  %8324 = vmatprep.mubr.msk.bf16.mxu1 %vm635_vm0, %v9412_v6  ;;  %v9433_v2 = vld [vmem:[%s11598_s21 + $0x40] sm:$0xff]   ;;  %v9436_v4 = vld [vmem:[%s11598_s21 + $0x48] sm:$0xff]   ;;  %v9438_v6 = vld [vmem:[%s11598_s21 + $0x50] ss:$0 sps:$4 sm:$0xff]  }
  0x19   : > { %v9435_v5 = vld [vmem:[%s11598_s21 + $0x9c] sm:$0xff]  }
  0x1f   : > { %8309 = vmatmul.mubr.msk.bf16.gmra.mrb[4].mxu0 %vm635_vm0, %v9413_v7  ;;  %8325 = vmatmul.mubr.msk.bf16.gmra.mrb[4].mxu1 %vm635_vm0, %v9413_v7  ;;  %v9437_v7 = vld [vmem:[%s11598_s21 + $0xa4] ss:$0 sps:$4 sm:$0xff]  }
  0x20   : > { %8312 = vmatprep.mubr.msk.bf16.mxu0 %vm635_vm0, %v9414_v8  ;;  %8328 = vmatprep.mubr.msk.bf16.mxu1 %vm635_vm0, %v9414_v8  ;;  %v9972_v8 = vld [vmem:[%s9788_s29] sm:$0xff]  }
  0x27   : > { %8313 = vmatmul.mubr.msk.bf16.gmra.mrb[8].mxu0 %vm635_vm0, %v9806_v9  ;;  %8329 = vmatmul.mubr.msk.bf16.gmra.mrb[8].mxu1 %vm635_vm0, %v9806_v9 }
  0x28   : > { %8344 = vmatprep.mubr.msk.bf16.mxu0 %vm9664_vm1, %v9663_v10  ;;  %8400 = vmatprep.mubr.msk.bf16.mxu1 %vm9664_vm1, %v9663_v10 }
  0xea   : > { %v8306_v11 = vpop.f32.mrb[0].mxu0  ;;  %v8322_v12 = vpop.f32.mrb[0].mxu1 }
  0xeb   : > { %v688_v13 = vpop.f32.mrb[1].mxu0  ;;  %v813_v14 = vpop.f32.mrb[1].mxu1 }
  0xec   : > { %v8307_v15 = vpop.f32.mrb[2].mxu0  ;;  %v8323_v17 = vpop.f32.mrb[2].mxu1 }
  0xed   : > { %v736_v16 = vpack.c.bf16 %v8307_v15, %v8306_v11  ;;  %v691_v18 = vpop.f32.mrb[3].mxu0  ;;  %v861_v19 = vpack.c.bf16 %v8323_v17, %v8322_v12  ;;  %v816_v21 = vpop.f32.mrb[3].mxu1  ;;  %v9441_v11 = vld [vmem:[%s11596_s0 + $0x38] sm:$0xff]   ;;  %v9980_v12 = vld [vmem:[%s9788_s29 + $0x8] sm:$0xff]   ;;  %v9997_v15 = vld [vmem:[%s9788_s29 + $0x20] sm:$0xff]  }
  0xee   : > { %v735_v20 = vpack.c.bf16 %v691_v18, %v688_v13  ;;  %v860_v22 = vpack.c.bf16 %v816_v21, %v813_v14  ;;  %v9985_v13 = vld [vmem:[%s9788_s29 + $0x10] sm:$0xff]   ;;  %v9992_v14 = vld [vmem:[%s9788_s29 + $0x18] sm:$0xff]  }
  0xf0   : > { %8389 = vmatpush3.bf16.msra.mxu1 %v735_v20  ;;  %8333 = vmatpush3.bf16.msra.mxu0 %v860_v22 }
  0xf1   : > { %8390 = vmatprep.subr.bf16.mxu1 %v9663_v10  ;;  %8334 = vmatprep.subr.bf16.mxu0 %v9663_v10 }
  0xf2   : > { %v8310_v23 = vpop.f32.mrb[4].mxu0  ;;  %v8326_v24 = vpop.f32.mrb[4].mxu1 }
  0xf3   : > { %v704_v25 = vpop.f32.mrb[5].mxu0  ;;  %v829_v26 = vpop.f32.mrb[5].mxu1 }
  0xf4   : > { %v8311_v27 = vpop.f32.mrb[6].mxu0  ;;  %8391 = vmatpush3.bf16.msra.mxu1 %v736_v16  ;;  %v8327_v29 = vpop.f32.mrb[6].mxu1  ;;  %8335 = vmatpush3.bf16.msra.mxu0 %v861_v19 }
  0xf5   : > { %v738_v28 = vpack.c.bf16 %v8311_v27, %v8310_v23  ;;  %v707_v30 = vpop.f32.mrb[7].mxu0  ;;  %8392 = vmatprep.subr.bf16.mxu1 %v9663_v10  ;;  %v863_v31 = vpack.c.bf16 %v8327_v29, %v8326_v24  ;;  %v832_v33 = vpop.f32.mrb[7].mxu1  ;;  %8336 = vmatprep.subr.bf16.mxu0 %v9663_v10 }
  0xf6   : > { %v737_v32 = vpack.c.bf16 %v707_v30, %v704_v25  ;;  %v862_v34 = vpack.c.bf16 %v832_v33, %v829_v26 }
  0xf8   : > { %8393 = vmatpush3.bf16.msra.mxu1 %v737_v32  ;;  %8337 = vmatpush3.bf16.msra.mxu0 %v862_v34 }
  0xf9   : > { %8394 = vmatprep.subr.bf16.mxu1 %v9663_v10  ;;  %8338 = vmatprep.subr.bf16.mxu0 %v9663_v10 }
  0xfa   : > { %v8314_v35 = vpop.f32.mrb[8].mxu0  ;;  %v8330_v36 = vpop.f32.mrb[8].mxu1 }
  0xfb   : > { %v720_v37 = vpop.f32.mrb[9].mxu0  ;;  %v845_v38 = vpop.f32.mrb[9].mxu1 }
  0xfc   : > { %v8315_v39 = vpop.f32.mrb[10].mxu0  ;;  %8395 = vmatpush3.bf16.msra.mxu1 %v738_v28  ;;  %v8331_v41 = vpop.f32.mrb[10].mxu1  ;;  %8339 = vmatpush3.bf16.msra.mxu0 %v863_v31 }
  0xfd   : > { %v740_v40 = vpack.c.bf16 %v8315_v39, %v8314_v35  ;;  %v723_v42 = vpop.f32.mrb[11].mxu0  ;;  %8396 = vmatprep.subr.bf16.mxu1 %v9663_v10  ;;  %v865_v43 = vpack.c.bf16 %v8331_v41, %v8330_v36  ;;  %v848_v45 = vpop.f32.mrb[11].mxu1  ;;  %8340 = vmatprep.subr.bf16.mxu0 %v9663_v10 }
  0xfe   : > { %v739_v44 = vpack.c.bf16 %v723_v42, %v720_v37  ;;  %v864_v46 = vpack.c.bf16 %v848_v45, %v845_v38 }
 0x100   : > { %8397 = vmatpush3.bf16.msra.mxu1 %v739_v44  ;;  %8341 = vmatpush3.bf16.msra.mxu0 %v864_v46 }
 0x101   : > { %8398 = vmatprep.subr.bf16.mxu1 %v9663_v10  ;;  %8342 = vmatprep.subr.bf16.mxu0 %v9663_v10 }
 0x104   : > { %8399 = vmatpush3.bf16.msra.mxu1 %v740_v40  ;;  %8343 = vmatpush3.bf16.msra.mxu0 %v865_v43 }
 0x105   : > { %8460 = vmatprep.subr.bf16.mxu1 %v9663_v10  ;;  %8444 = vmatprep.subr.bf16.mxu0 %v9434_v47 }
 0x107   : > { %8401 = vmatmul.mubr.msk.bf16.vlgmr.msra.gmra.mrb[12].mxu1 %vm941_vm2, %v9417_v48  ;;  %8345 = vmatmul.mubr.msk.bf16.vlgmr.msra.gmra.mrb[12].mxu0 %vm941_vm2, %v9416_v49 }
 0x108   : > { %8404 = vmatprep.mubr.msk.bf16.mxu1 %vm9664_vm1, %v9663_v10  ;;  %8348 = vmatprep.mubr.msk.bf16.mxu0 %vm9664_vm1, %v9663_v10 }
 0x109   : > { %8445 = vmatpush3.bf16.msra.mxu0 %v9434_v47 }
 0x10a   : > { %8446 = vmatprep.subr.bf16.mxu0 %v9439_v50 }
 0x10d   : > { %8447 = vmatpush3.bf16.msra.mxu0 %v9439_v50 }
 0x10e   : > { %8516 = vmatprep.subr.bf16.mxu0 %v9850_v51 }
 0x10f   : > { %8405 = vmatmul.mubr.msk.bf16.gmra.mrb[16].mxu1 %vm941_vm2, %v9419_v52  ;;  %8349 = vmatmul.mubr.msk.bf16.gmra.mrb[16].mxu0 %vm941_vm2, %v9418_v53 }
 0x110   : > { %8408 = vmatprep.mubr.msk.bf16.mxu1 %vm9664_vm1, %v9663_v10  ;;  %8352 = vmatprep.mubr.msk.bf16.mxu0 %vm9664_vm1, %v9663_v10 }
 0x117   : > { %8409 = vmatmul.mubr.msk.bf16.gmra.mrb[20].mxu1 %vm941_vm2, %v9421_v54  ;;  %8353 = vmatmul.mubr.msk.bf16.gmra.mrb[20].mxu0 %vm941_vm2, %v9420_v55 }
 0x118   : > { %8412 = vmatprep.mubr.msk.bf16.mxu1 %vm9664_vm1, %v9663_v10  ;;  %8356 = vmatprep.mubr.msk.bf16.mxu0 %vm9664_vm1, %v9663_v10 }
 0x11f   : > { %8413 = vmatmul.mubr.msk.bf16.gmra.mrb[24].mxu1 %vm941_vm2, %v9423_v56  ;;  %8357 = vmatmul.mubr.msk.bf16.gmra.mrb[24].mxu0 %vm941_vm2, %v9422_v57 }
 0x120   : > { %8416 = vmatprep.mubr.msk.bf16.mxu1 %vm9664_vm1, %v9663_v10  ;;  %8360 = vmatprep.mubr.msk.bf16.mxu0 %vm9664_vm1, %v9663_v10 }
 0x127   : > { %8417 = vmatmul.mubr.msk.bf16.gmra.mrb[28].mxu1 %vm941_vm2, %v9425_v58  ;;  %8361 = vmatmul.mubr.msk.bf16.gmra.mrb[28].mxu0 %vm941_vm2, %v9424_v59 }
 0x128   : > { %8420 = vmatprep.mubr.msk.bf16.mxu1 %vm9664_vm1, %v9663_v10  ;;  %8364 = vmatprep.mubr.msk.bf16.mxu0 %vm9664_vm1, %v9663_v10 }
 0x12f   : > { %8421 = vmatmul.mubr.msk.bf16.gmra.mrb[32].mxu1 %vm941_vm2, %v9427_v60  ;;  %8365 = vmatmul.mubr.msk.bf16.gmra.mrb[32].mxu0 %vm941_vm2, %v9426_v61 }
 0x130   : > { %8424 = vmatprep.mubr.msk.bf16.mxu1 %vm9664_vm1, %v9663_v10  ;;  %8368 = vmatprep.mubr.msk.bf16.mxu0 %vm9664_vm1, %v9663_v10 }
 0x137   : > { %8425 = vmatmul.mubr.msk.bf16.gmra.mrb[36].mxu1 %vm941_vm2, %v9429_v62  ;;  %8369 = vmatmul.mubr.msk.bf16.gmra.mrb[36].mxu0 %vm941_vm2, %v9428_v63 }
 0x138   : > { %8428 = vmatprep.mubr.msk.bf16.mxu1 %vm9664_vm1, %v9663_v10  ;;  %8372 = vmatprep.mubr.msk.bf16.mxu0 %vm9664_vm1, %v9663_v10 }
 0x13f   : > { %8429 = vmatmul.mubr.msk.bf16.gmra.mrb[40].mxu1 %vm941_vm2, %v9431_v0  ;;  %8373 = vmatmul.mubr.msk.bf16.gmra.mrb[40].mxu0 %vm941_vm2, %v9430_v1 }
 0x140   : > { %8432 = vmatprep.mubr.msk.bf16.mxu1 %vm9664_vm1, %v9663_v10  ;;  %8376 = vmatprep.mubr.msk.bf16.mxu0 %vm9664_vm1, %v9663_v10 }
 0x147   : > { %8433 = vmatmul.mubr.msk.bf16.gmra.mrb[44].mxu1 %vm941_vm2, %v9433_v2  ;;  %8377 = vmatmul.mubr.msk.bf16.gmra.mrb[44].mxu0 %vm941_vm2, %v9432_v3 }
 0x148   : > { %8436 = vmatprep.mubr.msk.bf16.mxu1 %vm9664_vm1, %v9663_v10  ;;  %8380 = vmatprep.mubr.msk.bf16.mxu0 %vm9664_vm1, %v9663_v10 }
 0x14f   : > { %8437 = vmatmul.mubr.msk.bf16.gmra.mrb[48].mxu1 %vm941_vm2, %v9436_v4  ;;  %8381 = vmatmul.mubr.msk.bf16.gmra.mrb[48].mxu0 %vm941_vm2, %v9435_v5 }
 0x150   : > { %8440 = vmatprep.mubr.msk.bf16.mxu1 %vm9664_vm1, %v9663_v10  ;;  %8384 = vmatprep.mubr.msk.bf16.mxu0 %vm9664_vm1, %v9663_v10 }
 0x157   : > { %8441 = vmatmul.mubr.msk.bf16.gmra.mrb[52].mxu1 %vm941_vm2, %v9438_v6  ;;  %8385 = vmatmul.mubr.msk.bf16.gmra.mrb[52].mxu0 %vm941_vm2, %v9437_v7 }
 0x158   : > { %8472 = vmatprep.mubr.msk.bf16.mxu1 %vm9664_vm1, %v9663_v10  ;;  %8448 = vmatprep.mubr.msk.bf16.mxu0 %vm635_vm0, %v9972_v8 }
 0x15f   : > { %8449 = vmatmul.mubr.msk.bf16.vlgmr.msra.gmra.mrb[56].mxu0 %vm635_vm0, %v9980_v12 }
 0x160   : > { %8452 = vmatprep.mubr.msk.bf16.mxu0 %vm635_vm0, %v9985_v13  ;;  %8517 = vmatpush3.bf16.msra.mxu0 %v9850_v51 }
 0x161   : > { %8518 = vmatprep.subr.bf16.mxu0 %v9441_v11 }
 0x164   : > { %8519 = vmatpush3.bf16.msra.mxu0 %v9441_v11 }
 0x165   : > { %8532 = vmatprep.subr.bf16.mxu0 %v9663_v10 }
 0x167   : > { %8453 = vmatmul.mubr.msk.bf16.gmra.mrb[60].mxu0 %vm635_vm0, %v9992_v14 }
 0x168   : > { %8456 = vmatprep.mubr.msk.bf16.mxu0 %vm635_vm0, %v9997_v15 }
 0x16f   : > { %8457 = vmatmul.mubr.msk.bf16.gmra.mrb[64].mxu0 %vm635_vm0, %v9806_v9 }
 0x170   : > { %8520 = vmatprep.mubr.msk.bf16.mxu0 %vm635_vm0, %v9972_v8 }
 0x177   : > { %8521 = vmatmul.mubr.msk.bf16.vlgmr.msra.gmra.mrb[68].mxu0 %vm635_vm0, %v9980_v12 }
 0x178   : > { %8524 = vmatprep.mubr.msk.bf16.mxu0 %vm635_vm0, %v9985_v13 }
 0x17f   : > { %8525 = vmatmul.mubr.msk.bf16.gmra.mrb[72].mxu0 %vm635_vm0, %v9992_v14 }
 0x180   : > { %8528 = vmatprep.mubr.msk.bf16.mxu0 %vm635_vm0, %v9997_v15 }
 0x187   : > { %8529 = vmatmul.mubr.msk.bf16.gmra.mrb[76].mxu0 %vm635_vm0, %v9806_v9 }
 0x188   : > { %8544 = vmatprep.mubr.msk.bf16.mxu0 %vm9664_vm1, %v9663_v10 }
 0x1da   : > { %v1215_v16 = vpop.f32.mrb[12].mxu1  ;;  %v1009_v17 = vpop.f32.mrb[12].mxu0 }
 0x1db   : > { %v8402_v18 = vpop.f32.mrb[13].mxu1  ;;  %v10017_v19 = vadd.f32 %v1215_v16, %v1009_v17  ;;  %v8346_v20 = vpop.f32.mrb[13].mxu0 }
 0x1dc   : > { %v1218_v21 = vpop.f32.mrb[14].mxu1  ;;  %v1012_v22 = vpop.f32.mrb[14].mxu0 }
 0x1dd   : > { %v8403_v23 = vpop.f32.mrb[15].mxu1  ;;  %v10019_v24 = vadd.f32 %v1218_v21, %v1012_v22  ;;  %v8347_v25 = vpop.f32.mrb[15].mxu0 }
 0x1e2   : > { %v1223_v26 = vpop.f32.mrb[16].mxu1  ;;  %v1017_v27 = vpop.f32.mrb[16].mxu0 }
 0x1e3   : > { %v8406_v28 = vpop.f32.mrb[17].mxu1  ;;  %v10021_v29 = vadd.f32 %v1223_v26, %v1017_v27  ;;  %v8350_v9 = vpop.f32.mrb[17].mxu0 }
 0x1e4   : > { %v1226_v30 = vpop.f32.mrb[18].mxu1  ;;  %v1020_v31 = vpop.f32.mrb[18].mxu0 }
 0x1e5   : > { %v8407_v32 = vpop.f32.mrb[19].mxu1  ;;  %v10023_v33 = vadd.f32 %v1226_v30, %v1020_v31  ;;  %v8351_v34 = vpop.f32.mrb[19].mxu0 }
 0x1ea   : > { %v1231_v35 = vpop.f32.mrb[20].mxu1  ;;  %v1025_v36 = vpop.f32.mrb[20].mxu0 }
 0x1eb   : > { %v8410_v37 = vpop.f32.mrb[21].mxu1  ;;  %v10025_v38 = vadd.f32 %v1231_v35, %v1025_v36  ;;  %v8354_v39 = vpop.f32.mrb[21].mxu0 }
 0x1ec   : > { %v1234_v40 = vpop.f32.mrb[22].mxu1  ;;  %v1028_v41 = vpop.f32.mrb[22].mxu0 }
 0x1ed   : > { %v8411_v42 = vpop.f32.mrb[23].mxu1  ;;  %v10027_v43 = vadd.f32 %v1234_v40, %v1028_v41  ;;  %v8355_v44 = vpop.f32.mrb[23].mxu0 }
 0x1f2   : > { %v1239_v45 = vpop.f32.mrb[24].mxu1  ;;  %v1033_v46 = vpop.f32.mrb[24].mxu0 }
 0x1f3   : > { %v8414_v47 = vpop.f32.mrb[25].mxu1  ;;  %v10029_v48 = vadd.f32 %v1239_v45, %v1033_v46  ;;  %v8358_v49 = vpop.f32.mrb[25].mxu0 }
 0x1f4   : > { %v1242_v50 = vpop.f32.mrb[26].mxu1  ;;  %v1036_v51 = vpop.f32.mrb[26].mxu0 }
 0x1f5   : > { %v8415_v52 = vpop.f32.mrb[27].mxu1  ;;  %v10031_v53 = vadd.f32 %v1242_v50, %v1036_v51  ;;  %v8359_v54 = vpop.f32.mrb[27].mxu0 }
 0x1fa   : > { %v1247_v55 = vpop.f32.mrb[28].mxu1  ;;  %v1041_v56 = vpop.f32.mrb[28].mxu0 }
 0x1fb   : > { %v8418_v57 = vpop.f32.mrb[29].mxu1  ;;  %v10033_v58 = vadd.f32 %v1247_v55, %v1041_v56  ;;  %v8362_v59 = vpop.f32.mrb[29].mxu0 }
 0x1fc   : > { %v1250_v60 = vpop.f32.mrb[30].mxu1  ;;  %v1044_v61 = vpop.f32.mrb[30].mxu0 }
 0x1fd   : > { %v8419_v62 = vpop.f32.mrb[31].mxu1  ;;  %v10035_v63 = vadd.f32 %v1250_v60, %v1044_v61  ;;  %v8363_v0 = vpop.f32.mrb[31].mxu0 }
 0x202   : > { %v1255_v1 = vpop.f32.mrb[32].mxu1  ;;  %v1049_v2 = vpop.f32.mrb[32].mxu0 }
 0x203   : > { %v8422_v3 = vpop.f32.mrb[33].mxu1  ;;  %v10037_v4 = vadd.f32 %v1255_v1, %v1049_v2  ;;  %v8366_v5 = vpop.f32.mrb[33].mxu0 }
 0x204   : > { %v1258_v6 = vpop.f32.mrb[34].mxu1  ;;  %v1052_v7 = vpop.f32.mrb[34].mxu0 }
 0x205   : > { %v8423_v11 = vpop.f32.mrb[35].mxu1  ;;  %v10039_v16 = vadd.f32 %v1258_v6, %v1052_v7  ;;  %v8367_v17 = vpop.f32.mrb[35].mxu0 }
 0x20a   : > { %v1263_v18 = vpop.f32.mrb[36].mxu1  ;;  %v1057_v20 = vpop.f32.mrb[36].mxu0 }
 0x20b   : > { %v8426_v21 = vpop.f32.mrb[37].mxu1  ;;  %v10041_v22 = vadd.f32 %v1263_v18, %v1057_v20  ;;  %v8370_v23 = vpop.f32.mrb[37].mxu0 }
 0x20c   : > { %v1266_v25 = vpop.f32.mrb[38].mxu1  ;;  %v1060_v26 = vpop.f32.mrb[38].mxu0 }
 0x20d   : > { %v8427_v27 = vpop.f32.mrb[39].mxu1  ;;  %v10043_v28 = vadd.f32 %v1266_v25, %v1060_v26  ;;  %v8371_v9 = vpop.f32.mrb[39].mxu0 }
 0x212   : > { %v1271_v30 = vpop.f32.mrb[40].mxu1  ;;  %v1065_v31 = vpop.f32.mrb[40].mxu0 }
 0x213   : > { %v8430_v32 = vpop.f32.mrb[41].mxu1  ;;  %v8374_v34 = vpop.f32.mrb[41].mxu0  ;;  %v10045_v36 = vadd.f32 %v1271_v30, %v1065_v31 }
 0x214   : > { %v1274_v35 = vpop.f32.mrb[42].mxu1  ;;  %v1068_v37 = vpop.f32.mrb[42].mxu0 }
 0x215   : > { %v8431_v39 = vpop.f32.mrb[43].mxu1  ;;  %v8375_v40 = vpop.f32.mrb[43].mxu0  ;;  %v10047_v41 = vadd.f32 %v1274_v35, %v1068_v37 }
 0x21a   : > { %v1279_v42 = vpop.f32.mrb[44].mxu1  ;;  %v1073_v44 = vpop.f32.mrb[44].mxu0 }
 0x21b   : > { %v8434_v45 = vpop.f32.mrb[45].mxu1  ;;  %v8378_v46 = vpop.f32.mrb[45].mxu0  ;;  %v10049_v49 = vadd.f32 %v1279_v42, %v1073_v44 }
 0x21c   : > { %v1282_v47 = vpop.f32.mrb[46].mxu1  ;;  %v1076_v50 = vpop.f32.mrb[46].mxu0 }
 0x21d   : > { %v8435_v51 = vpop.f32.mrb[47].mxu1  ;;  %v8379_v52 = vpop.f32.mrb[47].mxu0  ;;  %v10051_v54 = vadd.f32 %v1282_v47, %v1076_v50  ;;  %v9457_v50 = vld [vmem:[%s11596_s0 + $0x40] sm:$0xff]  }
 0x222   : > { %v1287_v55 = vpop.f32.mrb[48].mxu1  ;;  %v1081_v56 = vpop.f32.mrb[48].mxu0 }
 0x223   : > { %v8438_v57 = vpop.f32.mrb[49].mxu1  ;;  %v8382_v59 = vpop.f32.mrb[49].mxu0  ;;  %v10053_v61 = vadd.f32 %v1287_v55, %v1081_v56  ;;  %v9442_v55 = vld [vmem:[%s11598_s21 + $0xa8] sm:$0xff]  }
 0x224   : > { %v1290_v60 = vpop.f32.mrb[50].mxu1  ;;  %v1084_v62 = vpop.f32.mrb[50].mxu0 }
 0x225   : > { %v8439_v0 = vpop.f32.mrb[51].mxu1  ;;  %v8383_v1 = vpop.f32.mrb[51].mxu0  ;;  %v10055_v2 = vadd.f32 %v1290_v60, %v1084_v62  ;;  %v9462_v62 = vld [vmem:[%s11596_s0 + $0x48] sm:$0xff]  }
 0x22a   : > { %v1295_v3 = vpop.f32.mrb[52].mxu1  ;;  %v1089_v5 = vpop.f32.mrb[52].mxu0 }
 0x22b   : > { %v8442_v6 = vpop.f32.mrb[53].mxu1  ;;  %v8386_v7 = vpop.f32.mrb[53].mxu0  ;;  %v10057_v17 = vadd.f32 %v1295_v3, %v1089_v5  ;;  %v9443_v3 = vld [vmem:[%s11598_s21 + $0xb0] sm:$0xff]  }
 0x22c   : > { %v1298_v11 = vpop.f32.mrb[54].mxu1  ;;  %v1092_v18 = vpop.f32.mrb[54].mxu0 }
 0x22d   : > { %v8443_v20 = vpop.f32.mrb[55].mxu1  ;;  %v8387_v21 = vpop.f32.mrb[55].mxu0 }
 0x22e   : > { %v9444_v21 = vld [vmem:[%s11598_s21 + $0xb8] sm:$0xff]  }
 0x232   : > { %v8450_v23 = vpop.f32.mrb[56].mxu0 }
 0x233   : > { %v1352_v25 = vpop.f32.mrb[57].mxu0 }
 0x234   : > { %v8451_v26 = vpop.f32.mrb[58].mxu0 }
 0x235   : > { %v1400_v27 = vpack.c.bf16 %v8451_v26, %v8450_v23  ;;  %v1355_v9 = vpop.f32.mrb[59].mxu0 }
 0x236   : > { %v1399_v30 = vpack.c.bf16 %v1355_v9, %v1352_v25  ;;  %v9445_v9 = vld [vmem:[%s11598_s21 + $0xc0] sm:$0xff]  }
 0x238   : > { %8461 = vmatpush3.bf16.msra.mxu1 %v1399_v30  ;;  %v9446_v30 = vld [vmem:[%s11598_s21 + $0xfc] sm:$0xff]  }
 0x239   : > { %8462 = vmatprep.subr.bf16.mxu1 %v9663_v10 }
 0x23a   : > { %v8454_v31 = vpop.f32.mrb[60].mxu0 }
 0x23b   : > { %v1368_v32 = vpop.f32.mrb[61].mxu0 }
 0x23c   : > { %v8455_v34 = vpop.f32.mrb[62].mxu0  ;;  %8463 = vmatpush3.bf16.msra.mxu1 %v1400_v27 }
 0x23d   : > { %v1402_v35 = vpack.c.bf16 %v8455_v34, %v8454_v31  ;;  %v1371_v37 = vpop.f32.mrb[63].mxu0  ;;  %8464 = vmatprep.subr.bf16.mxu1 %v9663_v10  ;;  %v9447_v31 = vld [vmem:[%s11598_s21 + $0xc8] sm:$0xff]   ;;  %v9449_v34 = vld [vmem:[%s11598_s21 + $0xd0] sm:$0xff]  }
 0x23e   : > { %v1401_v39 = vpack.c.bf16 %v1371_v37, %v1368_v32  ;;  %v9448_v32 = vld [vmem:[%s11598_s21 + $0x104] sm:$0xff]   ;;  %v9451_v37 = vld [vmem:[%s11598_s21 + $0xd8] sm:$0xff]  }
 0x240   : > { %8465 = vmatpush3.bf16.msra.mxu1 %v1401_v39  ;;  %v9452_v39 = vld [vmem:[%s11598_s21 + $0x114] sm:$0xff]  }
 0x241   : > { %8466 = vmatprep.subr.bf16.mxu1 %v9663_v10 }
 0x242   : > { %v8458_v40 = vpop.f32.mrb[64].mxu0 }
 0x243   : > { %v1384_v42 = vpop.f32.mrb[65].mxu0 }
 0x244   : > { %v8459_v44 = vpop.f32.mrb[66].mxu0  ;;  %8467 = vmatpush3.bf16.msra.mxu1 %v1402_v35  ;;  %v9450_v35 = vld [vmem:[%s11598_s21 + $0x10c] sm:$0xff]  }
 0x245   : > { %v1404_v45 = vpack.c.bf16 %v8459_v44, %v8458_v40  ;;  %v1387_v46 = vpop.f32.mrb[67].mxu0  ;;  %8468 = vmatprep.subr.bf16.mxu1 %v9663_v10  ;;  %v9453_v40 = vld [vmem:[%s11598_s21 + $0xe0] sm:$0xff]   ;;  %v9455_v44 = vld [vmem:[%s11598_s21 + $0xe8] sm:$0xff]  }
 0x246   : > { %v1403_v47 = vpack.c.bf16 %v1387_v46, %v1384_v42  ;;  %v9454_v42 = vld [vmem:[%s11598_s21 + $0x11c] sm:$0xff]   ;;  %v9458_v46 = vld [vmem:[%s11598_s21 + $0xf0] sm:$0xff]  }
 0x248   : > { %8469 = vmatpush3.bf16.msra.mxu1 %v1403_v47  ;;  %v9459_v47 = vld [vmem:[%s11598_s21 + $0x12c] sm:$0xff]  }
 0x249   : > { %8470 = vmatprep.subr.bf16.mxu1 %v9663_v10 }
 0x24a   : > { %v8522_v51 = vpop.f32.mrb[68].mxu0 }
 0x24b   : > { %v1705_v52 = vpop.f32.mrb[69].mxu0 }
 0x24c   : > { %8471 = vmatpush3.bf16.msra.mxu1 %v1404_v45  ;;  %v8523_v56 = vpop.f32.mrb[70].mxu0  ;;  %v9456_v45 = vld [vmem:[%s11598_s21 + $0x124] sm:$0xff]  }
 0x24d   : > { %v1753_v57 = vpack.c.bf16 %v8523_v56, %v8522_v51  ;;  %v1708_v59 = vpop.f32.mrb[71].mxu0  ;;  %8588 = vmatprep.subr.bf16.mxu1 %v9457_v50  ;;  %v9461_v51 = vld [vmem:[%s11598_s21 + $0x134] sm:$0xff]  }
 0x24e   : > { %v1752_v60 = vpack.c.bf16 %v1708_v59, %v1705_v52  ;;  %v9463_v52 = vld [vmem:[%s11598_s21 + $0x13c] sm:$0xff]  }
 0x24f   : > { %8473 = vmatmul.mubr.msk.bf16.vlgmr.msra.gmra.mrb[56].mxu1 %vm941_vm2, %v9442_v55  ;;  %v9464_v55 = vld [vmem:[%s11598_s21 + $0x144] sm:$0xff]  }
 0x250   : > { %8533 = vmatpush3.bf16.msra.mxu0 %v1752_v60  ;;  %8476 = vmatprep.mubr.msk.bf16.mxu1 %vm9664_vm1, %v9663_v10 }
 0x251   : > { %8534 = vmatprep.subr.bf16.mxu0 %v9663_v10  ;;  %8589 = vmatpush3.bf16.msra.mxu1 %v9457_v50  ;;  %v9460_v50 = vld [vmem:[%s11598_s21 + $0xf8] ss:$0 sps:$4 sm:$0xff]  }
 0x252   : > { %v8526_v0 = vpop.f32.mrb[72].mxu0  ;;  %8590 = vmatprep.subr.bf16.mxu1 %v9462_v62 }
 0x253   : > { %v1721_v1 = vpop.f32.mrb[73].mxu0 }
 0x254   : > { %v8527_v5 = vpop.f32.mrb[74].mxu0  ;;  %8535 = vmatpush3.bf16.msra.mxu0 %v1753_v57 }
 0x255   : > { %v1755_v6 = vpack.c.bf16 %v8527_v5, %v8526_v0  ;;  %v1724_v7 = vpop.f32.mrb[75].mxu0  ;;  %8536 = vmatprep.subr.bf16.mxu0 %v9663_v10  ;;  %8591 = vmatpush3.bf16.msra.mxu1 %v9462_v62 }
 0x256   : > { %v1754_v11 = vpack.c.bf16 %v1724_v7, %v1721_v1  ;;  %8604 = vmatprep.subr.bf16.mxu1 %v9663_v10 }
 0x257   : > { %8477 = vmatmul.mubr.msk.bf16.gmra.mrb[60].mxu1 %vm941_vm2, %v9443_v3 }
 0x258   : > { %8537 = vmatpush3.bf16.msra.mxu0 %v1754_v11  ;;  %8480 = vmatprep.mubr.msk.bf16.mxu1 %vm9664_vm1, %v9663_v10 }
 0x259   : > { %8538 = vmatprep.subr.bf16.mxu0 %v9663_v10 }
 0x25a   : > { %v8530_v18 = vpop.f32.mrb[76].mxu0 }
 0x25b   : > { %v1737_v20 = vpop.f32.mrb[77].mxu0 }
 0x25c   : > { %v8531_v23 = vpop.f32.mrb[78].mxu0  ;;  %8539 = vmatpush3.bf16.msra.mxu0 %v1755_v6 }
 0x25d   : > { %v1757_v25 = vpack.c.bf16 %v8531_v23, %v8530_v18  ;;  %v1740_v26 = vpop.f32.mrb[79].mxu0  ;;  %8540 = vmatprep.subr.bf16.mxu0 %v9663_v10 }
 0x25e   : > { %v1756_v27 = vpack.c.bf16 %v1740_v26, %v1737_v20 }
 0x25f   : > { %8481 = vmatmul.mubr.msk.bf16.gmra.mrb[64].mxu1 %vm941_vm2, %v9444_v21 }
 0x260   : > { %8541 = vmatpush3.bf16.msra.mxu0 %v1756_v27  ;;  %8484 = vmatprep.mubr.msk.bf16.mxu1 %vm9664_vm1, %v9663_v10 }
 0x261   : > { %8542 = vmatprep.subr.bf16.mxu0 %v9663_v10 }
 0x264   : > { %8543 = vmatpush3.bf16.msra.mxu0 %v1757_v25 }
 0x267   : > { %8485 = vmatmul.mubr.msk.bf16.gmra.mrb[68].mxu1 %vm941_vm2, %v9445_v9  ;;  %8545 = vmatmul.mubr.msk.bf16.vlgmr.msra.gmra.mrb[80].mxu0 %vm941_vm2, %v9446_v30 }
 0x268   : > { %8488 = vmatprep.mubr.msk.bf16.mxu1 %vm9664_vm1, %v9663_v10  ;;  %8548 = vmatprep.mubr.msk.bf16.mxu0 %vm9664_vm1, %v9663_v10 }
 0x26f   : > { %8489 = vmatmul.mubr.msk.bf16.gmra.mrb[72].mxu1 %vm941_vm2, %v9447_v31  ;;  %8549 = vmatmul.mubr.msk.bf16.gmra.mrb[84].mxu0 %vm941_vm2, %v9448_v32  ;;  %v9665_v32 = vmov 0  }
 0x270   : > { %8492 = vmatprep.mubr.msk.bf16.mxu1 %vm9664_vm1, %v9663_v10  ;;  %8552 = vmatprep.mubr.msk.bf16.mxu0 %vm9664_vm1, %v9663_v10 }
 0x271   : > { %9404 = vset.pattern.permute.xlu0 %v9665_v32  ;;  %9405 = vset.pattern.permute.xlu1 %v9665_v32 }
 0x272   : > { %2624 = vmatprep.subr.bf16.mxu0 %v9665_v32 }
 0x277   : > { %8493 = vmatmul.mubr.msk.bf16.gmra.mrb[76].mxu1 %vm941_vm2, %v9449_v34  ;;  %8553 = vmatmul.mubr.msk.bf16.gmra.mrb[88].mxu0 %vm941_vm2, %v9450_v35 }
 0x278   : > { %8496 = vmatprep.mubr.msk.bf16.mxu1 %vm9664_vm1, %v9663_v10  ;;  %8556 = vmatprep.mubr.msk.bf16.mxu0 %vm9664_vm1, %v9663_v10 }
 0x27f   : > { %8497 = vmatmul.mubr.msk.bf16.gmra.mrb[80].mxu1 %vm941_vm2, %v9451_v37  ;;  %8557 = vmatmul.mubr.msk.bf16.gmra.mrb[92].mxu0 %vm941_vm2, %v9452_v39 }
 0x280   : > { %8500 = vmatprep.mubr.msk.bf16.mxu1 %vm9664_vm1, %v9663_v10  ;;  %8560 = vmatprep.mubr.msk.bf16.mxu0 %vm9664_vm1, %v9663_v10 }
 0x287   : > { %8501 = vmatmul.mubr.msk.bf16.gmra.mrb[84].mxu1 %vm941_vm2, %v9453_v40  ;;  %8561 = vmatmul.mubr.msk.bf16.gmra.mrb[96].mxu0 %vm941_vm2, %v9454_v42 }
 0x288   : > { %8504 = vmatprep.mubr.msk.bf16.mxu1 %vm9664_vm1, %v9663_v10  ;;  %8564 = vmatprep.mubr.msk.bf16.mxu0 %vm9664_vm1, %v9663_v10 }
 0x28f   : > { %8505 = vmatmul.mubr.msk.bf16.gmra.mrb[88].mxu1 %vm941_vm2, %v9455_v44  ;;  %8565 = vmatmul.mubr.msk.bf16.gmra.mrb[100].mxu0 %vm941_vm2, %v9456_v45 }
 0x290   : > { %8508 = vmatprep.mubr.msk.bf16.mxu1 %vm9664_vm1, %v9663_v10  ;;  %8568 = vmatprep.mubr.msk.bf16.mxu0 %vm9664_vm1, %v9663_v10 }
 0x297   : > { %8509 = vmatmul.mubr.msk.bf16.gmra.mrb[92].mxu1 %vm941_vm2, %v9458_v46  ;;  %8569 = vmatmul.mubr.msk.bf16.gmra.mrb[104].mxu0 %vm941_vm2, %v9459_v47 }
 0x298   : > { %8512 = vmatprep.mubr.msk.bf16.mxu1 %vm9664_vm1, %v9663_v10  ;;  %8572 = vmatprep.mubr.msk.bf16.mxu0 %vm9664_vm1, %v9663_v10 }
 0x29f   : > { %8513 = vmatmul.mubr.msk.bf16.gmra.mrb[96].mxu1 %vm941_vm2, %v9460_v50  ;;  %8573 = vmatmul.mubr.msk.bf16.gmra.mrb[108].mxu0 %vm941_vm2, %v9461_v51  ;;  %v2361_v50 = vld [vmem:[%s11575_s3 + $0x8] sm:$0xff]  ;;  %v2364_v51 = vld [vmem:[%s11575_s3 + $0x20] sm:$0xff] }
 0x2a0   : > { %8576 = vmatprep.mubr.msk.bf16.mxu0 %vm9664_vm1, %v9663_v10  ;;  %8592 = vmatprep.mubr.msk.bf16.mxu1 %vm635_vm0, %v9972_v8  ;;  %v9465_v8 = vld [vmem:[%s11598_s21 + $0x14c] ss:$0 sps:$4 sm:$0xff]  }
 0x2a7   : > { %8577 = vmatmul.mubr.msk.bf16.gmra.mrb[112].mxu0 %vm941_vm2, %v9463_v52  ;;  %8593 = vmatmul.mubr.msk.bf16.vlgmr.msra.gmra.mrb[100].mxu1 %vm635_vm0, %v9980_v12  ;;  %v9654_v12 = vld [vmem:[%s9788_s29 + $0x28] sm:$0xff]  }
 0x2a8   : > { %8580 = vmatprep.mubr.msk.bf16.mxu0 %vm9664_vm1, %v9663_v10  ;;  %8596 = vmatprep.mubr.msk.bf16.mxu1 %vm635_vm0, %v9985_v13 }
 0x2af   : > { %8581 = vmatmul.mubr.msk.bf16.gmra.mrb[116].mxu0 %vm941_vm2, %v9464_v55  ;;  %8597 = vmatmul.mubr.msk.bf16.gmra.mrb[104].mxu1 %vm635_vm0, %v9992_v14 }
 0x2b0   : > { %8584 = vmatprep.mubr.msk.bf16.mxu0 %vm9664_vm1, %v9663_v10  ;;  %8600 = vmatprep.mubr.msk.bf16.mxu1 %vm635_vm0, %v9997_v15 }
 0x2b7   : > { %8585 = vmatmul.mubr.msk.bf16.gmra.mrb[120].mxu0 %vm941_vm2, %v9465_v8  ;;  %8601 = vmatmul.mubr.msk.bf16.gmra.mrb[108].mxu1 %vm635_vm0, %v9654_v12 }
 0x2b8   : > { %8616 = vmatprep.mubr.msk.bf16.mxu1 %vm9664_vm1, %v9663_v10 }
 0x322   : > { %v1547_v13 = vpop.f32.mrb[56].mxu1 }
 0x323   : > { %v8474_v14 = vpop.f32.mrb[57].mxu1  ;;  %v1633_v56 = vadd.f32 %v1547_v13, %v10017_v19 }
 0x324   : > { %v1550_v57 = vpop.f32.mrb[58].mxu1 }
 0x325   : > { %v8475_v59 = vpop.f32.mrb[59].mxu1  ;;  %v1634_v15 = vadd.f32 %v1550_v57, %v10019_v24 }
 0x32a   : > { %v1555_v60 = vpop.f32.mrb[60].mxu1 }
 0x32b   : > { %v8478_v62 = vpop.f32.mrb[61].mxu1  ;;  %v1635_v0 = vadd.f32 %v1555_v60, %v10021_v29 }
 0x32c   : > { %v1558_v1 = vpop.f32.mrb[62].mxu1  ;;  %v2366_v62 = vld [vmem:[%s11575_s3 + $0x30] sm:$0xff] }
 0x32d   : > { %v8479_v3 = vpop.f32.mrb[63].mxu1  ;;  %v1636_v5 = vadd.f32 %v1558_v1, %v10023_v33  ;;  %v2365_v1 = vld [vmem:[%s11575_s3 + $0x28] sm:$0xff] }
 0x332   : > { %v1563_v6 = vpop.f32.mrb[64].mxu1 }
 0x333   : > { %v8482_v7 = vpop.f32.mrb[65].mxu1  ;;  %v1637_v11 = vadd.f32 %v1563_v6, %v10025_v38 }
 0x334   : > { %v1566_v18 = vpop.f32.mrb[66].mxu1 }
 0x335   : > { %v8483_v20 = vpop.f32.mrb[67].mxu1  ;;  %v1638_v19 = vadd.f32 %v1566_v18, %v10027_v43  ;;  %v2360_v43 = vld [vmem:[%s11575_s3] sm:$0xff] }
 0x336   : > { %2383 = vperm.xlu0 %9404, %v2360_v43  }
 0x33a   : > { %v1571_v21 = vpop.f32.mrb[68].mxu1  ;;  %v1900_v23 = vpop.f32.mrb[80].mxu0  ;;  %2388 = vperm.xlu0 %9404, %v2361_v50  }
 0x33b   : > { %v10224_v25 = vadd.f32 %v1900_v23, %v1633_v56  ;;  %v8486_v24 = vpop.f32.mrb[69].mxu1  ;;  %v8546_v26 = vpop.f32.mrb[81].mxu0  ;;  %v1639_v29 = vadd.f32 %v1571_v21, %v10029_v48 }
 0x33c   : > { %v1574_v27 = vpop.f32.mrb[70].mxu1  ;;  %v1903_v9 = vpop.f32.mrb[82].mxu0  ;;  %v2370_v26 = vld [vmem:[%s11575_s3 + $0x50] sm:$0xff] }
 0x33d   : > { %v10227_v30 = vadd.f32 %v1903_v9, %v1634_v15  ;;  %v8487_v33 = vpop.f32.mrb[71].mxu1  ;;  %v8547_v31 = vpop.f32.mrb[83].mxu0  ;;  %v1640_v38 = vadd.f32 %v1574_v27, %v10031_v53  ;;  %v2369_v27 = vld [vmem:[%s11575_s3 + $0x48] sm:$0xff] }
 0x33e   : > { %2403 = vperm.xlu0 %9404, %v2364_v51  }
 0x342   : > { %v1579_v34 = vpop.f32.mrb[72].mxu1  ;;  %v1908_v35 = vpop.f32.mrb[84].mxu0  ;;  %2413 = vperm.xlu0 %9404, %v2366_v62  }
 0x343   : > { %v10236_v48 = vadd.f32 %v1908_v35, %v1635_v0  ;;  %v8490_v37 = vpop.f32.mrb[73].mxu1  ;;  %v8550_v39 = vpop.f32.mrb[85].mxu0  ;;  %v1641_v53 = vadd.f32 %v1579_v34, %v10033_v58  ;;  %v2362_v58 = vld [vmem:[%s11575_s3 + $0x10] sm:$0xff]  ;;  %v2363_v0 = vld [vmem:[%s11575_s3 + $0x18] sm:$0xff] }
 0x344   : > { %v1582_v40 = vpop.f32.mrb[74].mxu1  ;;  %v1911_v42 = vpop.f32.mrb[86].mxu0  ;;  %2393 = vperm.xlu1 %9405, %v2362_v58  }
 0x345   : > { %v10239_v44 = vadd.f32 %v1911_v42, %v1636_v5  ;;  %v8491_v45 = vpop.f32.mrb[75].mxu1  ;;  %v8551_v46 = vpop.f32.mrb[87].mxu0  ;;  %v1642_v47 = vadd.f32 %v1582_v40, %v10035_v63 }
 0x346   : > { %v2374_v45 = vld [vmem:[%s11575_s3 + $0x70] sm:$0xff] }
 0x348   : > { %2398 = vperm.xlu1 %9405, %v2363_v0  }
 0x34a   : > { %v1587_v52 = vpop.f32.mrb[76].mxu1  ;;  %v1916_v55 = vpop.f32.mrb[88].mxu0 }
 0x34b   : > { %v10251_v8 = vadd.f32 %v1916_v55, %v1637_v11  ;;  %v8494_v63 = vpop.f32.mrb[77].mxu1  ;;  %v8554_v12 = vpop.f32.mrb[89].mxu0  ;;  %v1643_v13 = vadd.f32 %v1587_v52, %v10037_v4  ;;  %v2368_v4 = vld [vmem:[%s11575_s3 + $0x40] sm:$0xff] }
 0x34c   : > { %v1590_v14 = vpop.f32.mrb[78].mxu1  ;;  %v1919_v56 = vpop.f32.mrb[90].mxu0  ;;  %2423 = vperm.xlu0 %9404, %v2368_v4   ;;  %2408 = vperm.xlu1 %9405, %v2365_v1  }
 0x34d   : > { %v10254_v57 = vadd.f32 %v1919_v56, %v1638_v19  ;;  %v8495_v59 = vpop.f32.mrb[79].mxu1  ;;  %v8555_v15 = vpop.f32.mrb[91].mxu0  ;;  %v1644_v60 = vadd.f32 %v1590_v14, %v10039_v16 }
 0x34e   : > { %v2378_v15 = vld [vmem:[%s11575_s3 + $0x90] sm:$0xff] }
 0x350   : > { %2433 = vperm.xlu0 %9404, %v2370_v26   ;;  %v4766_v26 = vld [vmem:[%s11580_s8] sm:$0xff] }
 0x352   : > { %v1595_v3 = vpop.f32.mrb[80].mxu1  ;;  %v1924_v16 = vpop.f32.mrb[92].mxu0 }
 0x353   : > { %v10269_v5 = vadd.f32 %v1924_v16, %v1639_v29  ;;  %v8498_v6 = vpop.f32.mrb[81].mxu1  ;;  %v8558_v7 = vpop.f32.mrb[93].mxu0  ;;  %v1645_v11 = vadd.f32 %v1595_v3, %v10041_v22  ;;  %v2367_v29 = vld [vmem:[%s11575_s3 + $0x38] sm:$0xff]  ;;  %v2372_v22 = vld [vmem:[%s11575_s3 + $0x60] sm:$0xff]  ;;  %v4767_v16 = vld [vmem:[%s11580_s8 + $0x8] sm:$0xff] }
 0x354   : > { %v1598_v18 = vpop.f32.mrb[82].mxu1  ;;  %v1927_v20 = vpop.f32.mrb[94].mxu0  ;;  %2418 = vperm.xlu1 %9405, %v2367_v29   ;;  %2443 = vperm.xlu0 %9404, %v2372_v22   ;;  %v2379_v6 = vld [vmem:[%s11575_s3 + $0x98] sm:$0xff] }
 0x355   : > { %v10272_v19 = vadd.f32 %v1927_v20, %v1640_v38  ;;  %v8499_v21 = vpop.f32.mrb[83].mxu1  ;;  %v8559_v23 = vpop.f32.mrb[95].mxu0  ;;  %v1646_v24 = vadd.f32 %v1598_v18, %v10043_v28 }
 0x358   : > { %2428 = vperm.xlu1 %9405, %v2369_v27   ;;  %2453 = vperm.xlu0 %9404, %v2374_v45  }
 0x35a   : > { %v1603_v9 = vpop.f32.mrb[84].mxu1  ;;  %v1932_v28 = vpop.f32.mrb[96].mxu0 }
 0x35b   : > { %v1647_v33 = vadd.f32 %v1603_v9, %v10045_v36  ;;  %v10288_v31 = vadd.f32 %v1932_v28, %v1641_v53  ;;  %v8502_v38 = vpop.f32.mrb[85].mxu1  ;;  %v8562_v43 = vpop.f32.mrb[97].mxu0  ;;  %v2371_v36 = vld [vmem:[%s11575_s3 + $0x58] sm:$0xff]  ;;  %v2376_v53 = vld [vmem:[%s11575_s3 + $0x80] sm:$0xff]  ;;  %v4771_v28 = vld [vmem:[%s11580_s8 + $0x28] sm:$0xff] }
 0x35c   : > { %v1606_v34 = vpop.f32.mrb[86].mxu1  ;;  %v1935_v35 = vpop.f32.mrb[98].mxu0  ;;  %2438 = vperm.xlu1 %9405, %v2371_v36   ;;  %2463 = vperm.xlu0 %9404, %v2376_v53   ;;  %v4768_v38 = vld [vmem:[%s11580_s8 + $0x10] sm:$0xff] }
 0x35d   : > { %v1648_v37 = vadd.f32 %v1606_v34, %v10047_v41  ;;  %v10291_v39 = vadd.f32 %v1935_v35, %v1642_v47  ;;  %v8503_v40 = vpop.f32.mrb[87].mxu1  ;;  %v8563_v42 = vpop.f32.mrb[99].mxu0  ;;  %v2373_v41 = vld [vmem:[%s11575_s3 + $0x68] sm:$0xff] }
 0x360   : > { %2448 = vperm.xlu1 %9405, %v2373_v41   ;;  %2473 = vperm.xlu0 %9404, %v2378_v15  }
 0x362   : > { %v1611_v46 = vpop.f32.mrb[88].mxu1  ;;  %v1940_v47 = vpop.f32.mrb[100].mxu0 }
 0x363   : > { %v1649_v50 = vadd.f32 %v1611_v46, %v10049_v49  ;;  %v10306_v51 = vadd.f32 %v1940_v47, %v1643_v13  ;;  %v8506_v58 = vpop.f32.mrb[89].mxu1  ;;  %v8566_v52 = vpop.f32.mrb[101].mxu0  ;;  %v2375_v49 = vld [vmem:[%s11575_s3 + $0x78] sm:$0xff]  ;;  %v2380_v13 = vld [vmem:[%s11575_s3 + $0xa0] sm:$0xff]  ;;  %v4775_v46 = vld [vmem:[%s11580_s8 + $0x48] sm:$0xff] }
 0x364   : > { %v1614_v55 = vpop.f32.mrb[90].mxu1  ;;  %v1943_v63 = vpop.f32.mrb[102].mxu0  ;;  %2458 = vperm.xlu1 %9405, %v2375_v49   ;;  %2483 = vperm.xlu0 %9404, %v2380_v13   ;;  %v4772_v47 = vld [vmem:[%s11580_s8 + $0x30] sm:$0xff]  ;;  %v4774_v49 = vld [vmem:[%s11580_s8 + $0x40] sm:$0xff] }
 0x365   : > { %v1650_v12 = vadd.f32 %v1614_v55, %v10051_v54  ;;  %v10309_v14 = vadd.f32 %v1943_v63, %v1644_v60  ;;  %v8507_v56 = vpop.f32.mrb[91].mxu1  ;;  %v8567_v59 = vpop.f32.mrb[103].mxu0  ;;  %v2377_v54 = vld [vmem:[%s11575_s3 + $0x88] sm:$0xff] }
 0x368   : > { %2468 = vperm.xlu1 %9405, %v2377_v54   ;;  %4793 = vperm.xlu0 %9404, %v4767_v16  }
 0x36a   : > { %v1619_v60 = vpop.f32.mrb[92].mxu1  ;;  %v1948_v62 = vpop.f32.mrb[104].mxu0 }
 0x36b   : > { %v1651_v0 = vadd.f32 %v1619_v60, %v10053_v61  ;;  %v10324_v4 = vadd.f32 %v1948_v62, %v1645_v11  ;;  %v8510_v1 = vpop.f32.mrb[93].mxu1  ;;  %v8570_v3 = vpop.f32.mrb[105].mxu0  ;;  %v4769_v11 = vld [vmem:[%s11580_s8 + $0x18] sm:$0xff] }
 0x36c   : > { %v1622_v7 = vpop.f32.mrb[94].mxu1  ;;  %v1951_v18 = vpop.f32.mrb[106].mxu0  ;;  %2478 = vperm.xlu1 %9405, %v2379_v6   ;;  %4803 = vperm.xlu0 %9404, %v4769_v11   ;;  %v4779_v1 = vld [vmem:[%s11580_s8 + $0x68] sm:$0xff]  ;;  %v4776_v3 = vld [vmem:[%s11580_s8 + $0x50] sm:$0xff]  ;;  %v4781_v11 = vld [vmem:[%s11580_s8 + $0x78] sm:$0xff] }
 0x36d   : > { %v1652_v20 = vadd.f32 %v1622_v7, %v10055_v2  ;;  %v10333_v21 = vadd.f32 %v1951_v18, %v1646_v24  ;;  %v8511_v23 = vpop.f32.mrb[95].mxu1  ;;  %v8571_v61 = vpop.f32.mrb[107].mxu0 }
 0x370   : > { %4788 = vperm.xlu1 %9405, %v4766_v26   ;;  %4813 = vperm.xlu0 %9404, %v4771_v28   ;;  %v4778_v26 = vld [vmem:[%s11580_s8 + $0x60] sm:$0xff]  ;;  %v4780_v28 = vld [vmem:[%s11580_s8 + $0x70] sm:$0xff] }
 0x372   : > { %v1627_v29 = vpop.f32.mrb[96].mxu1  ;;  %v1956_v22 = vpop.f32.mrb[108].mxu0 }
 0x373   : > { %v10342_v2 = vadd.f32 %v1627_v29, %v10057_v17  ;;  %v10344_v24 = vadd.f32 %v1956_v22, %v1647_v33  ;;  %v8574_v27 = vpop.f32.mrb[109].mxu0  ;;  %v8514_v9 = vpop.f32.mrb[97].mxu1  ;;  %v4773_v17 = vld [vmem:[%s11580_s8 + $0x38] sm:$0xff]  ;;  %v4770_v33 = vld [vmem:[%s11580_s8 + $0x20] sm:$0xff] }
 0x374   : > { %v1959_v43 = vpop.f32.mrb[110].mxu0  ;;  %v1630_v34 = vpop.f32.mrb[98].mxu1  ;;  %4798 = vperm.xlu1 %9405, %v4768_v38   ;;  %4823 = vperm.xlu0 %9404, %v4773_v17   ;;  %v4783_v9 = vld [vmem:[%s11580_s8 + $0x88] sm:$0xff] }
 0x375   : > { %v10352_v35 = vadd.f32 %v1959_v43, %v1648_v37  ;;  %v8515_v40 = vpop.f32.mrb[99].mxu1  ;;  %v8575_v42 = vpop.f32.mrb[111].mxu0 }
 0x378   : > { %4808 = vperm.xlu1 %9405, %v4770_v33   ;;  %4833 = vperm.xlu0 %9404, %v4775_v46   ;;  %v4785_v33 = vld [vmem:[%s11580_s8 + $0x98] sm:$0xff]  ;;  %v9468_v46 = vld [vmem:[%s11598_s21 + $0x160] sm:$0xff]  }
 0x37a   : > { %v1964_v45 = vpop.f32.mrb[112].mxu0  ;;  %v8594_v36 = vpop.f32.mrb[100].mxu1 }
 0x37b   : > { %v10360_v53 = vadd.f32 %v1964_v45, %v1649_v50  ;;  %v8578_v37 = vpop.f32.mrb[113].mxu0  ;;  %v2058_v41 = vpop.f32.mrb[101].mxu1  ;;  %v4777_v50 = vld [vmem:[%s11580_s8 + $0x58] sm:$0xff]  ;;  %v4782_v45 = vld [vmem:[%s11580_s8 + $0x80] sm:$0xff] }
 0x37c   : > { %v1967_v58 = vpop.f32.mrb[114].mxu0  ;;  %v8595_v52 = vpop.f32.mrb[102].mxu1  ;;  %4818 = vperm.xlu1 %9405, %v4772_v47   ;;  %4843 = vperm.xlu0 %9404, %v4777_v50   ;;  %v4784_v37 = vld [vmem:[%s11580_s8 + $0x90] sm:$0xff]  ;;  %v9469_v47 = vld [vmem:[%s11598_s21 + $0x168] sm:$0xff]   ;;  %v9476_v50 = vld [vmem:[%s11598_s21 + $0x1a0] ss:$0 sps:$4 sm:$0xff]  }
 0x37d   : > { %v10368_v55 = vadd.f32 %v1967_v58, %v1650_v12  ;;  %v2106_v63 = vpack.c.bf16 %v8595_v52, %v8594_v36  ;;  %v2061_v56 = vpop.f32.mrb[103].mxu1  ;;  %v8579_v59 = vpop.f32.mrb[115].mxu0  ;;  %v9466_v36 = vld [vmem:[%s11598_s21 + $0x150] sm:$0xff]   ;;  %v9471_v52 = vld [vmem:[%s11598_s21 + $0x178] sm:$0xff]  }
 0x37e   : > { %v2105_v15 = vpack.c.bf16 %v2061_v56, %v2058_v41  ;;  %v9467_v41 = vld [vmem:[%s11598_s21 + $0x158] sm:$0xff]   ;;  %v9470_v58 = vld [vmem:[%s11598_s21 + $0x170] sm:$0xff]   ;;  %v9473_v56 = vld [vmem:[%s11598_s21 + $0x188] sm:$0xff]  }
 0x37f   : > { %v9474_v59 = vld [vmem:[%s11598_s21 + $0x190] sm:$0xff]  }
 0x380   : > { %8605 = vmatpush3.bf16.msra.mxu1 %v2105_v15  ;;  %4828 = vperm.xlu1 %9405, %v4774_v49   ;;  %v9475_v15 = vld [vmem:[%s11598_s21 + $0x198] sm:$0xff]   ;;  %v9479_v49 = vld [vmem:[%s11576_s4 + $0x4] ss:$8 sps:$4 sm:$0xff]  }
 0x381   : > { %8606 = vmatprep.subr.bf16.mxu1 %v9663_v10  ;;  %4853 = vperm.xlu0 %9404, %v4779_v1  }
 0x382   : > { %v1972_v13 = vpop.f32.mrb[116].mxu0  ;;  %v8598_v12 = vpop.f32.mrb[104].mxu1  ;;  %7398 = vmatprep.mubr.msk.bf16.mxu0 %vm2601_vm3, %v9479_v49 }
 0x383   : > { %v10377_v54 = vadd.f32 %v1972_v13, %v1651_v0  ;;  %v8582_v60 = vpop.f32.mrb[117].mxu0  ;;  %v2074_v62 = vpop.f32.mrb[105].mxu1 }
 0x384   : > { %v1975_v16 = vpop.f32.mrb[118].mxu0  ;;  %v8599_v6 = vpop.f32.mrb[106].mxu1  ;;  %8607 = vmatpush3.bf16.msra.mxu1 %v2106_v63  ;;  %4838 = vperm.xlu1 %9405, %v4776_v3   ;;  %v9472_v63 = vld [vmem:[%s11598_s21 + $0x180] sm:$0xff]  }
 0x385   : > { %v10385_v7 = vadd.f32 %v1975_v16, %v1652_v20  ;;  %v2108_v18 = vpack.c.bf16 %v8599_v6, %v8598_v12  ;;  %v2077_v23 = vpop.f32.mrb[107].mxu1  ;;  %8608 = vmatprep.subr.bf16.mxu1 %v9663_v10  ;;  %v8583_v0 = vpop.f32.mrb[119].mxu0  ;;  %4863 = vperm.xlu0 %9404, %v4781_v11  }
 0x386   : > { %v2107_v61 = vpack.c.bf16 %v2077_v23, %v2074_v62 }
 0x388   : > { %8609 = vmatpush3.bf16.msra.mxu1 %v2107_v61  ;;  %4848 = vperm.xlu1 %9405, %v4778_v26  }
 0x389   : > { %8610 = vmatprep.subr.bf16.mxu1 %v9663_v10  ;;  %4873 = vperm.xlu0 %9404, %v4783_v9  }
 0x38a   : > { %v1980_v20 = vpop.f32.mrb[120].mxu0  ;;  %v8602_v29 = vpop.f32.mrb[108].mxu1 }
 0x38b   : > { %v10396_v22 = vadd.f32 %v1980_v20, %v10342_v2  ;;  %v2090_v27 = vpop.f32.mrb[109].mxu1  ;;  %v8586_v38 = vpop.f32.mrb[121].mxu0 }
 0x38c   : > { %v8603_v43 = vpop.f32.mrb[110].mxu1  ;;  %8611 = vmatpush3.bf16.msra.mxu1 %v2108_v18  ;;  %v1983_v34 = vpop.f32.mrb[122].mxu0  ;;  %4858 = vperm.xlu1 %9405, %v4780_v28  }
 0x38d   : > { %v2110_v40 = vpack.c.bf16 %v8603_v43, %v8602_v29  ;;  %v2093_v42 = vpop.f32.mrb[111].mxu1  ;;  %8612 = vmatprep.subr.bf16.mxu1 %v9663_v10  ;;  %v8587_v17 = vpop.f32.mrb[123].mxu0  ;;  %4883 = vperm.xlu0 %9404, %v4785_v33  }
 0x38e   : > { %v2109_v2 = vpack.c.bf16 %v2093_v42, %v2090_v27 }
 0x390   : > { %8613 = vmatpush3.bf16.msra.mxu1 %v2109_v2  ;;  %4868 = vperm.xlu1 %9405, %v4782_v45  }
 0x391   : > { %8614 = vmatprep.subr.bf16.mxu1 %v9663_v10 }
 0x394   : > { %8615 = vmatpush3.bf16.msra.mxu1 %v2110_v40  ;;  %4878 = vperm.xlu1 %9405, %v4784_v37  }
 0x397   : > { %8617 = vmatmul.mubr.msk.bf16.vlgmr.msra.gmra.mrb[112].mxu1 %vm941_vm2, %v9466_v36 }
 0x398   : > { %8620 = vmatprep.mubr.msk.bf16.mxu1 %vm9664_vm1, %v9663_v10 }
 0x39f   : > { %8621 = vmatmul.mubr.msk.bf16.gmra.mrb[116].mxu1 %vm941_vm2, %v9467_v41 }
 0x3a0   : > { %8624 = vmatprep.mubr.msk.bf16.mxu1 %vm9664_vm1, %v9663_v10 }
 0x3a7   : > { %8625 = vmatmul.mubr.msk.bf16.gmra.mrb[120].mxu1 %vm941_vm2, %v9468_v46 }
 0x3a8   : > { %8628 = vmatprep.mubr.msk.bf16.mxu1 %vm9664_vm1, %v9663_v10 }
 0x3af   : > { %8629 = vmatmul.mubr.msk.bf16.gmra.mrb[124].mxu1 %vm941_vm2, %v9469_v47 }
 0x3b0   : > { %8632 = vmatprep.mubr.msk.bf16.mxu1 %vm9664_vm1, %v9663_v10 }
 0x3b5   : > { %v2384_v13 = vpop.permute.xlu0 %2383 }
 0x3b7   : > { %8633 = vmatmul.mubr.msk.bf16.gmra.mrb[128].mxu1 %vm941_vm2, %v9470_v58 }
 0x3b8   : > { %8636 = vmatprep.mubr.msk.bf16.mxu1 %vm9664_vm1, %v9663_v10 }
 0x3b9   : > { %v2389_v18 = vpop.permute.xlu0 %2388 }
 0x3bd   : > { %v2404_v33 = vpop.permute.xlu0 %2403 }
 0x3bf   : > { %8637 = vmatmul.mubr.msk.bf16.gmra.mrb[132].mxu1 %vm941_vm2, %v9471_v52 }
 0x3c0   : > { %8640 = vmatprep.mubr.msk.bf16.mxu1 %vm9664_vm1, %v9663_v10 }
 0x3c3   : > { %v2394_v0 = vpop.permute.xlu1 %2393 }
 0x3c7   : > { %8641 = vmatmul.mubr.msk.bf16.gmra.mrb[136].mxu1 %vm941_vm2, %v9472_v63 }
 0x3c8   : > { %8644 = vmatprep.mubr.msk.bf16.mxu1 %vm9664_vm1, %v9663_v10 }
 0x3cf   : > { %8645 = vmatmul.mubr.msk.bf16.gmra.mrb[140].mxu1 %vm941_vm2, %v9473_v56 }
 0x3d0   : > { %8648 = vmatprep.mubr.msk.bf16.mxu1 %vm9664_vm1, %v9663_v10 }
 0x3d7   : > { %8649 = vmatmul.mubr.msk.bf16.gmra.mrb[144].mxu1 %vm941_vm2, %v9474_v59  ;;  %v2414_v59 = vpop.permute.xlu0 %2413 }
 0x3d8   : > { %8652 = vmatprep.mubr.msk.bf16.mxu1 %vm9664_vm1, %v9663_v10 }
 0x3df   : > { %8653 = vmatmul.mubr.msk.bf16.gmra.mrb[148].mxu1 %vm941_vm2, %v9475_v15 }
 0x3e0   : > { %8656 = vmatprep.mubr.msk.bf16.mxu1 %vm9664_vm1, %v9663_v10 }
 0x3e7   : > { %8657 = vmatmul.mubr.msk.bf16.gmra.mrb[152].mxu1 %vm941_vm2, %v9476_v50  ;;  %vm7065_vm2 = vcmask 1024  }
 0x46a   : > { %v2253_v12 = vpop.f32.mrb[112].mxu1 }
 0x46b   : > { %v2339_v60 = vadd.f32 %v2253_v12, %v10224_v25  ;;  %v8618_v62 = vpop.f32.mrb[113].mxu1 }
 0x46c   : > { %v2256_v1 = vpop.f32.mrb[114].mxu1 }
 0x46d   : > { %v2486_v3 = vadd.f32 %v2384_v13, %v2339_v60  ;;  %v2340_v16 = vadd.f32 %v2256_v1, %v10227_v30  ;;  %v8619_v6 = vpop.f32.mrb[115].mxu1  ;;  %v2399_v30 = vpop.permute.xlu1 %2398 }
 0x46e   : > { %v2424_v6 = vpop.permute.xlu0 %2423 }
 0x46f   : > { %v2487_v23 = vadd.f32 %v2389_v18, %v2340_v16  ;;  %v2507_v61 = vmax.f32 %v2486_v3, 0.0 }
 0x471   : > { %v2508_v11 = vmax.f32 %v2487_v23, 0.0  ;;  %v2409_v41 = vpop.permute.xlu1 %2408 }
 0x472   : > { %v2261_v26 = vpop.f32.mrb[116].mxu1 }
 0x473   : > { %v10485_v20 = vpack.c.bf16 %v2508_v11, %v2507_v61  ;;  %v2341_v29 = vadd.f32 %v2261_v26, %v10236_v48  ;;  %v8622_v27 = vpop.f32.mrb[117].mxu1 }
 0x474   : > { %v2264_v9 = vpop.f32.mrb[118].mxu1 }
 0x475   : > { %v2488_v28 = vadd.f32 %v2394_v0, %v2341_v29  ;;  %v2342_v25 = vadd.f32 %v2264_v9, %v10239_v44  ;;  %2625 = vmatpush1.bf16.msra.mxu0 %v10485_v20  ;;  %v8623_v38 = vpop.f32.mrb[119].mxu1  ;;  %v2419_v13 = vpop.permute.xlu1 %2418 }
 0x476   : > { %2626 = vmatprep.subr.bf16.mxu0 %v9665_v32 }
 0x477   : > { %v2489_v43 = vadd.f32 %v2399_v30, %v2342_v25  ;;  %v2509_v34 = vmax.f32 %v2488_v28, 0.0  ;;  %v2434_v25 = vpop.permute.xlu0 %2433 }
 0x479   : > { %v2510_v40 = vmax.f32 %v2489_v43, 0.0  ;;  %v2429_v61 = vpop.permute.xlu1 %2428 }
 0x47a   : > { %v2269_v42 = vpop.f32.mrb[120].mxu1 }
 0x47b   : > { %v10491_v17 = vpack.c.bf16 %v2510_v40, %v2509_v34  ;;  %v2343_v2 = vadd.f32 %v2269_v42, %v10251_v8  ;;  %v8626_v48 = vpop.f32.mrb[121].mxu1 }
 0x47c   : > { %v2272_v45 = vpop.f32.mrb[122].mxu1 }
 0x47d   : > { %v2490_v36 = vadd.f32 %v2404_v33, %v2343_v2  ;;  %v2344_v44 = vadd.f32 %v2272_v45, %v10254_v57  ;;  %2627 = vmatpush1.bf16.msra.mxu0 %v10491_v17  ;;  %v8627_v37 = vpop.f32.mrb[123].mxu1  ;;  %v2439_v34 = vpop.permute.xlu1 %2438 }
 0x47e   : > { %2628 = vmatprep.subr.bf16.mxu0 %v9665_v32 }
 0x47f   : > { %v2491_v46 = vadd.f32 %v2409_v41, %v2344_v44  ;;  %v2511_v47 = vmax.f32 %v2490_v36, 0.0  ;;  %v2444_v36 = vpop.permute.xlu0 %2443 }
 0x481   : > { %v2512_v58 = vmax.f32 %v2491_v46, 0.0  ;;  %v2449_v46 = vpop.permute.xlu1 %2448 }
 0x482   : > { %v2277_v52 = vpop.f32.mrb[124].mxu1 }
 0x483   : > { %v10497_v63 = vpack.c.bf16 %v2512_v58, %v2511_v47  ;;  %v2345_v8 = vadd.f32 %v2277_v52, %v10269_v5  ;;  %v8630_v56 = vpop.f32.mrb[125].mxu1 }
 0x484   : > { %v2280_v15 = vpop.f32.mrb[126].mxu1 }
 0x485   : > { %v2492_v50 = vadd.f32 %v2414_v59, %v2345_v8  ;;  %v2346_v57 = vadd.f32 %v2280_v15, %v10272_v19  ;;  %2629 = vmatpush1.bf16.msra.mxu0 %v10497_v63  ;;  %v8631_v49 = vpop.f32.mrb[127].mxu1  ;;  %v2454_v15 = vpop.permute.xlu0 %2453 }
 0x486   : > { %2630 = vmatprep.subr.bf16.mxu0 %v9665_v32 }
 0x487   : > { %v2493_v12 = vadd.f32 %v2419_v13, %v2346_v57  ;;  %v2513_v60 = vmax.f32 %v2492_v50, 0.0  ;;  %v2459_v13 = vpop.permute.xlu1 %2458 }
 0x489   : > { %v2514_v62 = vmax.f32 %v2493_v12, 0.0 }
 0x48a   : > { %v2285_v1 = vpop.f32.mrb[128].mxu1 }
 0x48b   : > { %v10503_v3 = vpack.c.bf16 %v2514_v62, %v2513_v60  ;;  %v2347_v5 = vadd.f32 %v2285_v1, %v10288_v31  ;;  %v8634_v16 = vpop.f32.mrb[129].mxu1 }
 0x48c   : > { %v2288_v18 = vpop.f32.mrb[130].mxu1 }
 0x48d   : > { %v2494_v23 = vadd.f32 %v2424_v6, %v2347_v5  ;;  %v2348_v19 = vadd.f32 %v2288_v18, %v10291_v39  ;;  %2631 = vmatpush1.bf16.msra.mxu0 %v10503_v3  ;;  %v8635_v0 = vpop.f32.mrb[131].mxu1  ;;  %v2464_v6 = vpop.permute.xlu0 %2463 }
 0x48e   : > { %2632 = vmatprep.subr.bf16.mxu0 %v9665_v32  ;;  %v2469_v0 = vpop.permute.xlu1 %2468 }
 0x48f   : > { %v2495_v11 = vadd.f32 %v2429_v61, %v2348_v19  ;;  %v2515_v26 = vmax.f32 %v2494_v23, 0.0 }
 0x491   : > { %v2516_v29 = vmax.f32 %v2495_v11, 0.0 }
 0x492   : > { %v2293_v27 = vpop.f32.mrb[132].mxu1 }
 0x493   : > { %v10509_v9 = vpack.c.bf16 %v2516_v29, %v2515_v26  ;;  %v2349_v31 = vadd.f32 %v2293_v27, %v10306_v51  ;;  %v8638_v28 = vpop.f32.mrb[133].mxu1 }
 0x494   : > { %v2296_v38 = vpop.f32.mrb[134].mxu1  ;;  %v2474_v28 = vpop.permute.xlu0 %2473 }
 0x495   : > { %v2496_v30 = vadd.f32 %v2434_v25, %v2349_v31  ;;  %v2350_v39 = vadd.f32 %v2296_v38, %v10309_v14  ;;  %2633 = vmatpush1.bf16.msra.mxu0 %v10509_v9  ;;  %v8639_v43 = vpop.f32.mrb[135].mxu1 }
 0x496   : > { %2634 = vmatprep.subr.bf16.mxu0 %v9665_v32 }
 0x497   : > { %v2497_v40 = vadd.f32 %v2439_v34, %v2350_v39  ;;  %v2517_v42 = vmax.f32 %v2496_v30, 0.0  ;;  %v2479_v39 = vpop.permute.xlu1 %2478 }
 0x499   : > { %v2518_v2 = vmax.f32 %v2497_v40, 0.0 }
 0x49a   : > { %v2301_v48 = vpop.f32.mrb[136].mxu1 }
 0x49b   : > { %v10515_v33 = vpack.c.bf16 %v2518_v2, %v2517_v42  ;;  %v2351_v51 = vadd.f32 %v2301_v48, %v10324_v4  ;;  %v8642_v45 = vpop.f32.mrb[137].mxu1 }
 0x49c   : > { %v2304_v44 = vpop.f32.mrb[138].mxu1 }
 0x49d   : > { %v2498_v37 = vadd.f32 %v2444_v36, %v2351_v51  ;;  %v2352_v14 = vadd.f32 %v2304_v44, %v10333_v21  ;;  %2635 = vmatpush1.bf16.msra.mxu0 %v10515_v33  ;;  %v8643_v41 = vpop.f32.mrb[139].mxu1  ;;  %v2484_v51 = vpop.permute.xlu0 %2483 }
 0x49e   : > { %2636 = vmatprep.subr.bf16.mxu0 %v9665_v32  ;;  %v9477_v41 = vld [vmem:[%s11576_s4] ss:$8 sps:$4 sm:$0xff]  }
 0x49f   : > { %v2499_v47 = vadd.f32 %v2449_v46, %v2352_v14  ;;  %v2519_v58 = vmax.f32 %v2498_v37, 0.0  ;;  %v9482_v46 = vld [vmem:[%s11576_s4 + $0x10] ss:$8 sps:$4 sm:$0xff]  }
 0x4a1   : > { %v2520_v52 = vmax.f32 %v2499_v47, 0.0  ;;  %v9483_v47 = vld [vmem:[%s11576_s4 + $0x24] ss:$8 sps:$4 sm:$0xff]  }
 0x4a2   : > { %v2309_v8 = vpop.f32.mrb[140].mxu1 }
 0x4a3   : > { %v10521_v56 = vpack.c.bf16 %v2520_v52, %v2519_v58  ;;  %v2353_v4 = vadd.f32 %v2309_v8, %v10344_v24  ;;  %v8646_v59 = vpop.f32.mrb[141].mxu1  ;;  %v9496_v8 = vld [vmem:[%s11576_s4 + $0x5c] ss:$8 sps:$4 sm:$0xff]  }
 0x4a4   : > { %v2312_v50 = vpop.f32.mrb[142].mxu1  ;;  %v9499_v59 = vld [vmem:[%s11576_s4 + $0x68] ss:$8 sps:$4 sm:$0xff]  }
 0x4a5   : > { %v2500_v57 = vadd.f32 %v2454_v15, %v2353_v4  ;;  %v2354_v21 = vadd.f32 %v2312_v50, %v10352_v35  ;;  %2637 = vmatpush1.bf16.msra.mxu0 %v10521_v56  ;;  %v8647_v49 = vpop.f32.mrb[143].mxu1  ;;  %v9497_v4 = vld [vmem:[%s11576_s4 + $0x6c] ss:$8 sps:$4 sm:$0xff]   ;;  %v9500_v15 = vld [vmem:[%s11576_s4 + $0x7c] ss:$8 sps:$4 sm:$0xff]  }
 0x4a6   : > { %2638 = vmatprep.subr.bf16.mxu0 %v9665_v32  ;;  %v9502_v50 = vld [vmem:[%s11576_s4 + $0x78] ss:$8 sps:$4 sm:$0xff]   ;;  %v9506_v49 = vld [vmem:[%s11576_s4 + $0x9c] ss:$8 sps:$4 sm:$0xff]  }
 0x4a7   : > { %v2501_v12 = vadd.f32 %v2459_v13, %v2354_v21  ;;  %v2521_v60 = vmax.f32 %v2500_v57, 0.0  ;;  %v9503_v57 = vld [vmem:[%s11576_s4 + $0x8c] ss:$8 sps:$4 sm:$0xff]   ;;  %v9505_v21 = vld [vmem:[%s11576_s4 + $0x88] ss:$8 sps:$4 sm:$0xff]  }
 0x4a8   : > { %v7414_v13 = vld [vmem:[%s11576_s4 + $0xa8] sm:$0x33] }
 0x4a9   : > { %v2522_v62 = vmax.f32 %v2501_v12, 0.0  ;;  %v9508_v12 = vld [vmem:[%s11576_s4 + $0x98] ss:$8 sps:$4 sm:$0xff]  }
 0x4aa   : > { %v2317_v1 = vpop.f32.mrb[144].mxu1 }
 0x4ab   : > { %v10527_v5 = vpack.c.bf16 %v2522_v62, %v2521_v60  ;;  %v2355_v24 = vadd.f32 %v2317_v1, %v10360_v53  ;;  %v8650_v16 = vpop.f32.mrb[145].mxu1  ;;  %v7426_v60 = vcombine.high %v7414_v13, %v7414_v13  ;;  %v7425_v62 = vcombine.low %v7414_v13, %v7414_v13  ;;  %v9511_v1 = vld [vmem:[%s11577_s5] sm:$0xff]  }
 0x4ac   : > { %v2320_v18 = vpop.f32.mrb[146].mxu1  ;;  %8660 = vmatprep.subr.bf16.mxu1 %v9511_v1  ;;  %v9513_v16 = vld [vmem:[%s11577_s5 + $0x10] sm:$0xff]  }
 0x4ad   : > { %v2502_v23 = vadd.f32 %v2464_v6, %v2355_v24  ;;  %v2356_v35 = vadd.f32 %v2320_v18, %v10368_v55  ;;  %2639 = vmatpush1.bf16.msra.mxu0 %v10527_v5  ;;  %v8651_v19 = vpop.f32.mrb[147].mxu1  ;;  %8661 = vmatpush3.bf16.msra.mxu1 %v9511_v1 }
 0x4ae   : > { %2640 = vmatprep.subr.bf16.mxu0 %v9665_v32 }
 0x4af   : > { %v2503_v61 = vadd.f32 %v2469_v0, %v2356_v35  ;;  %v2523_v11 = vmax.f32 %v2502_v23, 0.0 }
 0x4b1   : > { %v2524_v26 = vmax.f32 %v2503_v61, 0.0 }
 0x4b2   : > { %v2325_v29 = vpop.f32.mrb[148].mxu1 }
 0x4b3   : > { %v10533_v27 = vpack.c.bf16 %v2524_v26, %v2523_v11  ;;  %v2357_v53 = vadd.f32 %v2325_v29, %v10377_v54  ;;  %v8654_v31 = vpop.f32.mrb[149].mxu1 }
 0x4b4   : > { %v2328_v25 = vpop.f32.mrb[150].mxu1 }
 0x4b5   : > { %v2504_v38 = vadd.f32 %v2474_v28, %v2357_v53  ;;  %v2358_v55 = vadd.f32 %v2328_v25, %v10385_v7  ;;  %2641 = vmatpush1.bf16.msra.mxu0 %v10533_v27  ;;  %v8655_v30 = vpop.f32.mrb[151].mxu1 }
 0x4b6   : > { %2642 = vmatprep.subr.bf16.mxu0 %v9665_v32 }
 0x4b7   : > { %v2505_v43 = vadd.f32 %v2479_v39, %v2358_v55  ;;  %v2525_v34 = vmax.f32 %v2504_v38, 0.0 }
 0x4b9   : > { %v2526_v40 = vmax.f32 %v2505_v43, 0.0 }
 0x4ba   : > { %v2333_v42 = vpop.f32.mrb[152].mxu1 }
 0x4bb   : > { %v2537_v2 = vpack.c.bf16 %v2526_v40, %v2525_v34  ;;  %v2359_v48 = vadd.f32 %v2333_v42, %v10396_v22  ;;  %v8658_v54 = vpop.f32.mrb[153].mxu1  ;;  %v9480_v22 = vld [vmem:[%s11576_s4 + $0x14] ss:$8 sps:$4 sm:$0xff]  }
 0x4bc   : > { %v2336_v45 = vpop.f32.mrb[154].mxu1 }
 0x4bd   : > { %v2506_v36 = vadd.f32 %v2484_v51, %v2359_v48  ;;  %2643 = vmatpush1.bf16.msra.mxu0 %v2537_v2  ;;  %v8659_v44 = vpop.f32.mrb[155].mxu1 }
 0x4be   : > { %2644 = vmatprep.subr.bf16.mxu0 %v9665_v32 }
 0x4bf   : > { %v2527_v7 = vmax.f32 %v2506_v36, 0.0 }
 0x4c1   : > { %v2538_v37 = vpack.c.bf16 %v2527_v7, %v2527_v7 }
 0x4c3   : > { %v2622_v14 = vsel %vm2620_vm4, %v2538_v37, 0 }
 0x4c4   : > { %2645 = vmatpush1.bf16.msra.mxu0 %v2622_v14 }
 0x4c5   : > { %2785 = vmatprep.subr.bf16.mxu0 %v9665_v32 }
 0x4c7   : > { %2657 = vmatmul.mubr.bf16.vlgmr.msra.gmra.mrb[124].mxu0 %v9477_v41 }
 0x4c8   : > { %2786 = vmatpush1.bf16.msra.mxu0 %v10485_v20  ;;  %7399 = vmatprep.mubr.msk.bf16.mxu0 %vm2601_vm3, %v9480_v22  ;;  %v9485_v20 = vld [vmem:[%s11576_s4 + $0x20] ss:$8 sps:$4 sm:$0xff]  }
 0x4c9   : > { %2787 = vmatprep.subr.bf16.mxu0 %v9665_v32 }
 0x4cc   : > { %2788 = vmatpush1.bf16.msra.mxu0 %v10491_v17  ;;  %v9486_v17 = vld [vmem:[%s11576_s4 + $0x34] ss:$8 sps:$4 sm:$0xff]  }
 0x4cd   : > { %2789 = vmatprep.subr.bf16.mxu0 %v9665_v32 }
 0x4cf   : > { %2665 = vmatmul.mubr.bf16.gmra.mrb[128].mxu0 %v9482_v46 }
 0x4d0   : > { %2790 = vmatpush1.bf16.msra.mxu0 %v10497_v63  ;;  %7400 = vmatprep.mubr.msk.bf16.mxu0 %vm2601_vm3, %v9483_v47  ;;  %v9488_v63 = vld [vmem:[%s11576_s4 + $0x30] ss:$8 sps:$4 sm:$0xff]  }
 0x4d1   : > { %2791 = vmatprep.subr.bf16.mxu0 %v9665_v32 }
 0x4d4   : > { %2792 = vmatpush1.bf16.msra.mxu0 %v10503_v3  ;;  %v9489_v3 = vld [vmem:[%s11576_s4 + $0x44] ss:$8 sps:$4 sm:$0xff]  }
 0x4d5   : > { %2793 = vmatprep.subr.bf16.mxu0 %v9665_v32 }
 0x4d7   : > { %2673 = vmatmul.mubr.bf16.gmra.mrb[132].mxu0 %v9485_v20 }
 0x4d8   : > { %2794 = vmatpush1.bf16.msra.mxu0 %v10509_v9  ;;  %7401 = vmatprep.mubr.msk.bf16.mxu0 %vm2601_vm3, %v9486_v17  ;;  %v2549_v9 = vld [vmem:[%s11576_s4 + $0x50] sm:$0x33]  ;;  %v9514_v17 = vld [vmem:[%s11577_s5 + $0x18] sm:$0x3f]  }
 0x4d9   : > { %2795 = vmatprep.subr.bf16.mxu0 %v9665_v32  ;;  %v7397_v58 = vcombine.high %v2549_v9, %v2549_v9  ;;  %v7396_v52 = vcombine.low %v2549_v9, %v2549_v9 }
 0x4dc   : > { %2796 = vmatpush1.bf16.msra.mxu0 %v10515_v33  ;;  %v9491_v33 = vld [vmem:[%s11576_s4 + $0x40] ss:$8 sps:$4 sm:$0xff]  }
 0x4dd   : > { %2797 = vmatprep.subr.bf16.mxu0 %v9665_v32 }
 0x4df   : > { %2681 = vmatmul.mubr.bf16.gmra.mrb[136].mxu0 %v9488_v63 }
 0x4e0   : > { %2798 = vmatpush1.bf16.msra.mxu0 %v10521_v56  ;;  %7402 = vmatprep.mubr.msk.bf16.mxu0 %vm2601_vm3, %v9489_v3  ;;  %v9494_v56 = vld [vmem:[%s11576_s4 + $0x58] ss:$8 sps:$4 sm:$0xff]  }
 0x4e1   : > { %2799 = vmatprep.subr.bf16.mxu0 %v9665_v32 }
 0x4e4   : > { %2800 = vmatpush1.bf16.msra.mxu0 %v10527_v5  ;;  %v9512_v5 = vld [vmem:[%s11577_s5 + $0x8] sm:$0x3f]  }
 0x4e5   : > { %2801 = vmatprep.subr.bf16.mxu0 %v9665_v32  ;;  %9378 = vmatprep.subr.msk.bf16.mxu1 %vm2916_vm5, %v9512_v5  ;;  %v2918_v24 = vsel %vm2916_vm5, %v9512_v5, 0 }
 0x4e6   : > { %8663 = vmatpush3.bf16.msra.mxu1 %v2918_v24 }
 0x4e7   : > { %2689 = vmatmul.mubr.bf16.gmra.mrb[140].mxu0 %v9491_v33  ;;  %8676 = vmatprep.subr.bf16.mxu1 %v9513_v16  ;;  %v3017_v33 = vsel %vm2916_vm5, %v9514_v17, 0 }
 0x4e8   : > { %2802 = vmatpush1.bf16.msra.mxu0 %v10533_v27  ;;  %7403 = vmatprep.mubr.msk.bf16.mxu0 %vm2601_vm3, %v7397_v58 }
 0x4e9   : > { %2803 = vmatprep.subr.bf16.mxu0 %v9665_v32 }
 0x4ec   : > { %2804 = vmatpush1.bf16.msra.mxu0 %v2537_v2 }
 0x4ed   : > { %2805 = vmatprep.subr.bf16.mxu0 %v9665_v32 }
 0x4ef   : > { %2697 = vmatmul.mubr.bf16.gmra.mrb[144].mxu0 %v7396_v52 }
 0x4f0   : > { %2806 = vmatpush1.bf16.msra.mxu0 %v2622_v14  ;;  %7427 = vmatprep.mubr.msk.bf16.mxu0 %vm2601_vm3, %v9496_v8 }
 0x4f7   : > { %2818 = vmatmul.mubr.bf16.vlgmr.msra.gmra.mrb[148].mxu0 %v9494_v56 }
 0x4f8   : > { %7428 = vmatprep.mubr.msk.bf16.mxu0 %vm2601_vm3, %v9497_v4 }
 0x4ff   : > { %2826 = vmatmul.mubr.bf16.gmra.mrb[152].mxu0 %v9499_v59 }
 0x500   : > { %7429 = vmatprep.mubr.msk.bf16.mxu0 %vm2601_vm3, %v9500_v15 }
 0x507   : > { %2834 = vmatmul.mubr.bf16.gmra.mrb[156].mxu0 %v9502_v50 }
 0x508   : > { %7430 = vmatprep.mubr.msk.bf16.mxu0 %vm2601_vm3, %v9503_v57 }
 0x50f   : > { %2842 = vmatmul.mubr.bf16.gmra.mrb[160].mxu0 %v9505_v21 }
 0x510   : > { %7431 = vmatprep.mubr.msk.bf16.mxu0 %vm2601_vm3, %v9506_v49 }
 0x517   : > { %2850 = vmatmul.mubr.bf16.gmra.mrb[164].mxu0 %v9508_v12 }
 0x518   : > { %7432 = vmatprep.mubr.msk.bf16.mxu0 %vm2601_vm3, %v7426_v60 }
 0x51f   : > { %2858 = vmatmul.mubr.bf16.gmra.mrb[168].mxu0 %v7425_v62 }
 0x59a   : > { %v2658_v6 = vpop.f32.mrb[124].mxu0 }
 0x59b   : > { %v2660_v18 = vpop.f32.mrb[125].mxu0 }
 0x59c   : > { %v2661_v23 = vpop.f32.mrb[126].mxu0 }
 0x59d   : > { %v2663_v35 = vpop.f32.mrb[127].mxu0 }
 0x5a2   : > { %v2666_v19 = vpop.f32.mrb[128].mxu0 }
 0x5a3   : > { %v2668_v0 = vpop.f32.mrb[129].mxu0 }
 0x5a4   : > { %v2669_v61 = vpop.f32.mrb[130].mxu0  ;;  %v9515_v0 = vld [vmem:[%s11579_s7] sm:$0x7f]  }
 0x5a5   : > { %v2671_v11 = vpop.f32.mrb[131].mxu0  ;;  %9380 = vmatprep.subr.msk.bf16.mxu0 %vm3142_vm7, %v9515_v0 }
 0x5a6   : > { %v3144_v11 = vsel %vm3142_vm7, %v9515_v0, 0 }
 0x5a7   : > { %8693 = vmatpush3.bf16.msra.mxu0 %v3144_v11 }
 0x5aa   : > { %v2674_v26 = vpop.f32.mrb[132].mxu0 }
 0x5ab   : > { %v2676_v29 = vpop.f32.mrb[133].mxu0 }
 0x5ac   : > { %v2677_v27 = vpop.f32.mrb[134].mxu0  ;;  %v9517_v29 = vld [vmem:[%s11579_s7 + $0x10] sm:$0x7f]  }
 0x5ad   : > { %v2679_v53 = vpop.f32.mrb[135].mxu0 }
 0x5b2   : > { %v2682_v31 = vpop.f32.mrb[136].mxu0 }
 0x5b3   : > { %v2684_v28 = vpop.f32.mrb[137].mxu0 }
 0x5b4   : > { %v2685_v25 = vpop.f32.mrb[138].mxu0 }
 0x5b5   : > { %v2687_v38 = vpop.f32.mrb[139].mxu0 }
 0x5ba   : > { %v2690_v55 = vpop.f32.mrb[140].mxu0 }
 0x5bb   : > { %v2692_v30 = vpop.f32.mrb[141].mxu0 }
 0x5bc   : > { %v2693_v39 = vpop.f32.mrb[142].mxu0 }
 0x5bd   : > { %v2695_v43 = vpop.f32.mrb[143].mxu0 }
 0x5c2   : > { %v2698_v34 = vpop.f32.mrb[144].mxu0 }
 0x5c3   : > { %v2700_v40 = vpop.f32.mrb[145].mxu0 }
 0x5c4   : > { %v2701_v42 = vpop.f32.mrb[146].mxu0 }
 0x5c5   : > { %v2702_v2 = vpop.f32.mrb[147].mxu0 }
 0x5ca   : > { %v2819_v48 = vpop.f32.mrb[148].mxu0 }
 0x5cb   : > { %v2865_v54 = vmax.f32 %v2658_v6, %v2819_v48  ;;  %v2821_v51 = vpop.f32.mrb[149].mxu0 }
 0x5cc   : > { %v2822_v45 = vpop.f32.mrb[150].mxu0 }
 0x5cd   : > { %v2866_v36 = vmax.f32 %v2661_v23, %v2822_v45  ;;  %v2824_v44 = vpop.f32.mrb[151].mxu0 }
 0x5cf   : > { %v2876_v7 = vpack.c.bf16 %v2866_v36, %v2865_v54 }
 0x5d1   : > { %8664 = vmatprep.mubr.msk.bf16.mxu1 %vm2897_vm6, %v2876_v7 }
 0x5d2   : > { %v2827_v37 = vpop.f32.mrb[152].mxu0 }
 0x5d3   : > { %v2867_v14 = vmax.f32 %v2666_v19, %v2827_v37  ;;  %v2829_v41 = vpop.f32.mrb[153].mxu0 }
 0x5d4   : > { %v2830_v22 = vpop.f32.mrb[154].mxu0  ;;  %v9518_v41 = vld [vmem:[%s11579_s7 + $0x18] sm:$0x7f]  }
 0x5d5   : > { %v2868_v46 = vmax.f32 %v2669_v61, %v2830_v22  ;;  %v2832_v47 = vpop.f32.mrb[155].mxu0  ;;  %v9516_v61 = vld [vmem:[%s11579_s7 + $0x8] sm:$0x7f]  }
 0x5d7   : > { %v2877_v20 = vpack.c.bf16 %v2868_v46, %v2867_v14  ;;  %v3773_v14 = vsel %vm3142_vm7, %v9517_v29, 0 }
 0x5d9   : > { %8665 = vmatmul.mubr.msk.bf16.vlgmr.msra.gmra.mrb[156].mxu1 %vm2897_vm6, %v2877_v20 }
 0x5da   : > { %v2835_v63 = vpop.f32.mrb[156].mxu0  ;;  %8677 = vmatpush3.bf16.msra.mxu1 %v9513_v16 }
 0x5db   : > { %v2869_v3 = vmax.f32 %v2674_v26, %v2835_v63  ;;  %v2837_v9 = vpop.f32.mrb[157].mxu0  ;;  %9379 = vmatprep.subr.msk.bf16.mxu1 %vm2916_vm5, %v9514_v17  ;;  %v3261_v26 = vsel %vm3142_vm7, %v9516_v61, 0 }
 0x5dc   : > { %v2838_v58 = vpop.f32.mrb[158].mxu0 }
 0x5dd   : > { %v2870_v52 = vmax.f32 %v2677_v27, %v2838_v58  ;;  %v2840_v8 = vpop.f32.mrb[159].mxu0 }
 0x5de   : > { %8679 = vmatpush3.bf16.msra.mxu1 %v3017_v33 }
 0x5df   : > { %v2878_v56 = vpack.c.bf16 %v2870_v52, %v2869_v3  ;;  %9381 = vmatprep.subr.msk.bf16.mxu1 %vm3142_vm7, %v9516_v61 }
 0x5e1   : > { %8668 = vmatprep.mubr.msk.bf16.mxu1 %vm2897_vm6, %v2878_v56 }
 0x5e2   : > { %v2843_v4 = vpop.f32.mrb[160].mxu0 }
 0x5e3   : > { %v2871_v59 = vmax.f32 %v2682_v31, %v2843_v4  ;;  %v2845_v15 = vpop.f32.mrb[161].mxu0 }
 0x5e4   : > { %v2846_v50 = vpop.f32.mrb[162].mxu0 }
 0x5e5   : > { %v2872_v57 = vmax.f32 %v2685_v25, %v2846_v50  ;;  %v2848_v21 = vpop.f32.mrb[163].mxu0 }
 0x5e7   : > { %v2879_v49 = vpack.c.bf16 %v2872_v57, %v2871_v59 }
 0x5e9   : > { %8669 = vmatmul.mubr.msk.bf16.gmra.mrb[160].mxu1 %vm2897_vm6, %v2879_v49 }
 0x5ea   : > { %v2851_v13 = vpop.f32.mrb[164].mxu0 }
 0x5eb   : > { %v2873_v12 = vmax.f32 %v2690_v55, %v2851_v13  ;;  %v2853_v60 = vpop.f32.mrb[165].mxu0  ;;  %v9519_v13 = vld [vmem:[%s11579_s7 + $0x20] sm:$0x7f]  }
 0x5ec   : > { %v2854_v62 = vpop.f32.mrb[166].mxu0  ;;  %v9520_v60 = vld [vmem:[%s11578_s6 + $0x50] sm:$0xff]  }
 0x5ed   : > { %v2874_v1 = vmax.f32 %v2693_v39, %v2854_v62  ;;  %v2856_v5 = vpop.f32.mrb[167].mxu0 }
 0x5ef   : > { %v2880_v24 = vpack.c.bf16 %v2874_v1, %v2873_v12  ;;  %v4441_v12 = vsel %vm3142_vm7, %v9519_v13, 0 }
 0x5f1   : > { %8672 = vmatprep.mubr.msk.bf16.mxu1 %vm2897_vm6, %v2880_v24 }
 0x5f2   : > { %v2859_v16 = vpop.f32.mrb[168].mxu0 }
 0x5f3   : > { %v2875_v6 = vmax.f32 %v2698_v34, %v2859_v16  ;;  %v2861_v18 = vpop.f32.mrb[169].mxu0 }
 0x5f4   : > { %v2862_v23 = vpop.f32.mrb[170].mxu0 }
 0x5f5   : > { %v2881_v35 = vpack.c.bf16 %v2875_v6, %v2875_v6  ;;  %v2863_v19 = vpop.f32.mrb[171].mxu0 }
 0x5f7   : > { %8673 = vmatmul.mubr.msk.bf16.gmra.mrb[164].mxu1 %vm2897_vm6, %v2881_v35 }
 0x5f8   : > { %8680 = vmatprep.mubr.msk.bf16.mxu1 %vm2897_vm6, %v2876_v7 }
 0x5ff   : > { %8681 = vmatmul.mubr.msk.bf16.vlgmr.msra.gmra.mrb[168].mxu1 %vm2897_vm6, %v2877_v20 }
 0x600   : > { %8684 = vmatprep.mubr.msk.bf16.mxu1 %vm2897_vm6, %v2878_v56  ;;  %8707 = vmatpush3.bf16.msra.mxu1 %v3261_v26 }
 0x601   : > { %9384 = vmatprep.subr.msk.bf16.mxu1 %vm3142_vm7, %v9517_v29 }
 0x607   : > { %8685 = vmatmul.mubr.msk.bf16.gmra.mrb[172].mxu1 %vm2897_vm6, %v2879_v49  ;;  %v4107_v49 = vsel %vm3142_vm7, %v9518_v41, 0 }
 0x608   : > { %8688 = vmatprep.mubr.msk.bf16.mxu1 %vm2897_vm6, %v2880_v24 }
 0x60f   : > { %8689 = vmatmul.mubr.msk.bf16.gmra.mrb[176].mxu1 %vm2897_vm6, %v2881_v35 }
 0x6ac   : > { %v8666_v27 = vpop.f32.mrb[156].mxu1 }
 0x6ad   : > { %v2954_v53 = vpop.f32.mrb[157].mxu1 }
 0x6ae   : > { %v8667_v31 = vpop.f32.mrb[158].mxu1 }
 0x6af   : > { %v2957_v28 = vpop.f32.mrb[159].mxu1 }
 0x6bc   : > { %v8670_v25 = vpop.f32.mrb[160].mxu1 }
 0x6bd   : > { %v2970_v38 = vpop.f32.mrb[161].mxu1 }
 0x6be   : > { %v8671_v55 = vpop.f32.mrb[162].mxu1 }
 0x6bf   : > { %v2973_v30 = vpop.f32.mrb[163].mxu1 }
 0x6ca   : > { %v8674_v39 = vpop.f32.mrb[164].mxu1 }
 0x6cb   : > { %v2986_v43 = vpop.f32.mrb[165].mxu1 }
 0x6cc   : > { %v8675_v34 = vpop.f32.mrb[166].mxu1 }
 0x6cd   : > { %v2989_v40 = vpop.f32.mrb[167].mxu1 }
 0x6d2   : > { %v8682_v42 = vpop.f32.mrb[168].mxu1 }
 0x6d3   : > { %v3101_v2 = vmax.f32 %v8666_v27, %v8682_v42  ;;  %v3053_v48 = vpop.f32.mrb[169].mxu1 }
 0x6d4   : > { %v3099_v54 = vmax.f32 %v2954_v53, %v3053_v48  ;;  %v8683_v51 = vpop.f32.mrb[170].mxu1 }
 0x6d5   : > { %v3102_v45 = vmax.f32 %v8667_v31, %v8683_v51  ;;  %v3056_v36 = vpop.f32.mrb[171].mxu1 }
 0x6d6   : > { %v3100_v44 = vmax.f32 %v2957_v28, %v3056_v36 }
 0x6d7   : > { %v3111_v7 = vpack.c.bf16 %v3102_v45, %v3101_v2 }
 0x6d8   : > { %v3110_v37 = vpack.c.bf16 %v3100_v44, %v3099_v54 }
 0x6da   : > { %v8686_v22 = vpop.f32.mrb[172].mxu1  ;;  %8694 = vmatprep.mubr.msk.bf16.mxu0 %vm3123_vm8, %v3110_v37  ;;  %8708 = vmatprep.mubr.msk.bf16.mxu1 %vm3123_vm8, %v3110_v37 }
 0x6db   : > { %v3105_v46 = vmax.f32 %v8670_v25, %v8686_v22  ;;  %v3069_v47 = vpop.f32.mrb[173].mxu1  ;;  %8695 = vmatmul.mubr.msk.bf16.vlgmr.msra.gmra.mrb[172].mxu0 %vm3123_vm8, %v3111_v7  ;;  %8709 = vmatmul.mubr.msk.bf16.vlgmr.msra.gmra.mrb[180].mxu1 %vm3123_vm8, %v3111_v7  ;;  %v9521_v22 = vld [vmem:[%s11578_s6 + $0x58] sm:$0xff]  }
 0x6dc   : > { %v3103_v20 = vmax.f32 %v2970_v38, %v3069_v47  ;;  %v8687_v17 = vpop.f32.mrb[174].mxu1  ;;  %8785 = vmatpush3.bf16.msra.mxu1 %v3773_v14 }
 0x6dd   : > { %v3106_v63 = vmax.f32 %v8671_v55, %v8687_v17  ;;  %v3072_v3 = vpop.f32.mrb[175].mxu1  ;;  %9386 = vmatprep.subr.msk.bf16.mxu1 %vm3142_vm7, %v9518_v41 }
 0x6de   : > { %v3104_v9 = vmax.f32 %v2973_v30, %v3072_v3 }
 0x6df   : > { %v3113_v33 = vpack.c.bf16 %v3106_v63, %v3105_v46 }
 0x6e0   : > { %v3112_v58 = vpack.c.bf16 %v3104_v9, %v3103_v20  ;;  %v9522_v20 = vld [vmem:[%s11578_s6 + $0x60] sm:$0xff]  }
 0x6e2   : > { %v8690_v52 = vpop.f32.mrb[176].mxu1  ;;  %8698 = vmatprep.mubr.msk.bf16.mxu0 %vm3123_vm8, %v3112_v58  ;;  %8712 = vmatprep.mubr.msk.bf16.mxu1 %vm3123_vm8, %v3112_v58 }
 0x6e3   : > { %v3109_v8 = vmax.f32 %v8674_v39, %v8690_v52  ;;  %v3085_v56 = vpop.f32.mrb[177].mxu1  ;;  %8699 = vmatmul.mubr.msk.bf16.gmra.mrb[176].mxu0 %vm3123_vm8, %v3113_v33  ;;  %8713 = vmatmul.mubr.msk.bf16.gmra.mrb[184].mxu1 %vm3123_vm8, %v3113_v33 }
 0x6e4   : > { %v3107_v4 = vmax.f32 %v2986_v43, %v3085_v56  ;;  %v8691_v59 = vpop.f32.mrb[178].mxu1 }
 0x6e5   : > { %v3088_v15 = vpop.f32.mrb[179].mxu1  ;;  %v3115_v21 = vpack.c.bf16 %v3109_v8, %v3109_v8  ;;  %v9524_v8 = vld [vmem:[%s11578_s6 + $0x70] sm:$0xff]  }
 0x6e6   : > { %v3108_v50 = vmax.f32 %v2989_v40, %v3088_v15 }
 0x6e8   : > { %v3114_v57 = vpack.c.bf16 %v3108_v50, %v3107_v4  ;;  %v9525_v50 = vld [vmem:[%s11578_s6 + $0x78] sm:$0xff]  }
 0x6ea   : > { %8702 = vmatprep.mubr.msk.bf16.mxu0 %vm3123_vm8, %v3114_v57  ;;  %8716 = vmatprep.mubr.msk.bf16.mxu1 %vm3123_vm8, %v3114_v57 }
 0x6eb   : > { %8703 = vmatmul.mubr.msk.bf16.gmra.mrb[180].mxu0 %vm3123_vm8, %v3115_v21  ;;  %8717 = vmatmul.mubr.msk.bf16.gmra.mrb[188].mxu1 %vm3123_vm8, %v3115_v21 }
 0x6ec   : > { %8786 = vmatprep.mubr.msk.bf16.mxu1 %vm3123_vm8, %v3110_v37  ;;  %8732 = vmatprep.mubr.msk.bf16.mxu0 %vm3420_vm9, %v9520_v60 }
 0x6f3   : > { %8787 = vmatmul.mubr.msk.bf16.vlgmr.msra.gmra.mrb[192].mxu1 %vm3123_vm8, %v3111_v7 }
 0x6f4   : > { %8790 = vmatprep.mubr.msk.bf16.mxu1 %vm3123_vm8, %v3112_v58  ;;  %8831 = vmatpush3.bf16.msra.mxu1 %v4107_v49 }
 0x6f5   : > { %9388 = vmatprep.subr.msk.bf16.mxu1 %vm3142_vm7, %v9519_v13 }
 0x6fb   : > { %8791 = vmatmul.mubr.msk.bf16.gmra.mrb[196].mxu1 %vm3123_vm8, %v3113_v33 }
 0x6fc   : > { %8794 = vmatprep.mubr.msk.bf16.mxu1 %vm3123_vm8, %v3114_v57 }
 0x703   : > { %8795 = vmatmul.mubr.msk.bf16.gmra.mrb[200].mxu1 %vm3123_vm8, %v3115_v21 }
 0x704   : > { %8832 = vmatprep.mubr.msk.bf16.mxu1 %vm3123_vm8, %v3110_v37 }
 0x70b   : > { %8833 = vmatmul.mubr.msk.bf16.vlgmr.msra.gmra.mrb[204].mxu1 %vm3123_vm8, %v3111_v7 }
 0x70c   : > { %8836 = vmatprep.mubr.msk.bf16.mxu1 %vm3123_vm8, %v3112_v58  ;;  %8877 = vmatpush3.bf16.msra.mxu1 %v4441_v12 }
 0x70d   : > { %5006 = vmatprep.subr.bf16.mxu1 %v9665_v32 }
 0x713   : > { %8837 = vmatmul.mubr.msk.bf16.gmra.mrb[208].mxu1 %vm3123_vm8, %v3113_v33 }
 0x714   : > { %8840 = vmatprep.mubr.msk.bf16.mxu1 %vm3123_vm8, %v3114_v57 }
 0x71b   : > { %8841 = vmatmul.mubr.msk.bf16.gmra.mrb[212].mxu1 %vm3123_vm8, %v3115_v21 }
 0x71c   : > { %8878 = vmatprep.mubr.msk.bf16.mxu1 %vm3123_vm8, %v3110_v37 }
 0x723   : > { %8879 = vmatmul.mubr.msk.bf16.vlgmr.msra.gmra.mrb[216].mxu1 %vm3123_vm8, %v3111_v7 }
 0x724   : > { %8882 = vmatprep.mubr.msk.bf16.mxu1 %vm3123_vm8, %v3112_v58 }
 0x72b   : > { %8883 = vmatmul.mubr.msk.bf16.gmra.mrb[220].mxu1 %vm3123_vm8, %v3113_v33  ;;  %v9523_v33 = vld [vmem:[%s11578_s6 + $0x68] sm:$0xff]  }
 0x72c   : > { %8886 = vmatprep.mubr.msk.bf16.mxu1 %vm3123_vm8, %v3114_v57 }
 0x733   : > { %8887 = vmatmul.mubr.msk.bf16.gmra.mrb[224].mxu1 %vm3123_vm8, %v3115_v21  ;;  %v9526_v21 = vld [vmem:[%s11578_s6 + $0x80] sm:$0xff]  }
 0x7ae   : > { %v8696_v62 = vpop.f32.mrb[172].mxu0  ;;  %v8710_v1 = vpop.f32.mrb[180].mxu1 }
 0x7af   : > { %v3180_v5 = vpop.f32.mrb[173].mxu0  ;;  %v3297_v24 = vpop.f32.mrb[181].mxu1 }
 0x7b0   : > { %v8697_v16 = vpop.f32.mrb[174].mxu0  ;;  %v8711_v6 = vpop.f32.mrb[182].mxu1 }
 0x7b1   : > { %v3227_v18 = vpack.c.bf16 %v8697_v16, %v8696_v62  ;;  %v3344_v23 = vpack.c.bf16 %v8711_v6, %v8710_v1  ;;  %v3183_v35 = vpop.f32.mrb[175].mxu0  ;;  %v3300_v19 = vpop.f32.mrb[183].mxu1  ;;  %v9528_v6 = vld [vmem:[%s11578_s6 + $0x90] sm:$0xff]  }
 0x7b2   : > { %v3226_v0 = vpack.c.bf16 %v3183_v35, %v3180_v5  ;;  %v3343_v61 = vpack.c.bf16 %v3300_v19, %v3297_v24  ;;  %v9527_v5 = vld [vmem:[%s11578_s6 + $0x88] sm:$0xff]  }
 0x7b4   : > { %8720 = vmatprep.subr.bf16.mxu0 %v3343_v61 }
 0x7b5   : > { %8721 = vmatpush3.bf16.msra.mxu0 %v3343_v61 }
 0x7b6   : > { %v8700_v11 = vpop.f32.mrb[176].mxu0  ;;  %v8714_v26 = vpop.f32.mrb[184].mxu1  ;;  %8722 = vmatprep.subr.bf16.mxu0 %v3344_v23 }
 0x7b7   : > { %v3196_v29 = vpop.f32.mrb[177].mxu0  ;;  %v3313_v27 = vpop.f32.mrb[185].mxu1 }
 0x7b8   : > { %v8701_v53 = vpop.f32.mrb[178].mxu0  ;;  %v8715_v31 = vpop.f32.mrb[186].mxu1 }
 0x7b9   : > { %v3229_v28 = vpack.c.bf16 %v8701_v53, %v8700_v11  ;;  %v3346_v25 = vpack.c.bf16 %v8715_v31, %v8714_v26  ;;  %v3199_v38 = vpop.f32.mrb[179].mxu0  ;;  %v3316_v55 = vpop.f32.mrb[187].mxu1  ;;  %8723 = vmatpush3.bf16.msra.mxu0 %v3344_v23  ;;  %v9530_v26 = vld [vmem:[%s11578_s6] sm:$0xff]  }
 0x7ba   : > { %v3228_v30 = vpack.c.bf16 %v3199_v38, %v3196_v29  ;;  %v3345_v39 = vpack.c.bf16 %v3316_v55, %v3313_v27  ;;  %v9532_v38 = vld [vmem:[%s11578_s6 + $0x10] sm:$0xff]  }
 0x7bc   : > { %8724 = vmatprep.subr.bf16.mxu0 %v3345_v39 }
 0x7bd   : > { %8725 = vmatpush3.bf16.msra.mxu0 %v3345_v39 }
 0x7be   : > { %v8704_v43 = vpop.f32.mrb[180].mxu0  ;;  %v8718_v34 = vpop.f32.mrb[188].mxu1  ;;  %8726 = vmatprep.subr.bf16.mxu0 %v3346_v25 }
 0x7bf   : > { %v3212_v40 = vpop.f32.mrb[181].mxu0  ;;  %v3329_v42 = vpop.f32.mrb[189].mxu1  ;;  %v3348_v44 = vpack.c.bf16 %v8718_v34, %v8718_v34  ;;  %v3231_v13 = vpack.c.bf16 %v8704_v43, %v8704_v43  ;;  %v9533_v34 = vld [vmem:[%s11578_s6 + $0x18] sm:$0xff]  }
 0x7c0   : > { %v8705_v2 = vpop.f32.mrb[182].mxu0  ;;  %v8719_v48 = vpop.f32.mrb[190].mxu1 }
 0x7c1   : > { %v3215_v54 = vpop.f32.mrb[183].mxu0  ;;  %v3332_v51 = vpop.f32.mrb[191].mxu1  ;;  %8727 = vmatpush3.bf16.msra.mxu0 %v3346_v25  ;;  %v3453_v14 = vsel %vm3451_vm10, %v3348_v44, 0  ;;  %v3649_v62 = vsel %vm3451_vm10, %v3231_v13, 0  ;;  %v9534_v2 = vld [vmem:[%s11578_s6 + $0x20] sm:$0xff]  }
 0x7c2   : > { %v3230_v45 = vpack.c.bf16 %v3215_v54, %v3212_v40  ;;  %v3347_v36 = vpack.c.bf16 %v3332_v51, %v3329_v42 }
 0x7c4   : > { %8728 = vmatprep.subr.bf16.mxu0 %v3347_v36 }
 0x7c5   : > { %8729 = vmatpush3.bf16.msra.mxu0 %v3347_v36  ;;  %v9535_v36 = vld [vmem:[%s11578_s6 + $0x28] sm:$0xff]  }
 0x7c6   : > { %9382 = vmatprep.subr.msk.bf16.mxu0 %vm3451_vm10, %v3348_v44  ;;  %v8788_v7 = vpop.f32.mrb[192].mxu1 }
 0x7c7   : > { %v3809_v37 = vpop.f32.mrb[193].mxu1 }
 0x7c8   : > { %v8789_v41 = vpop.f32.mrb[194].mxu1 }
 0x7c9   : > { %v10729_v46 = vpack.c.bf16 %v8789_v41, %v8788_v7  ;;  %8731 = vmatpush3.bf16.msra.mxu0 %v3453_v14  ;;  %v3812_v47 = vpop.f32.mrb[195].mxu1 }
 0x7ca   : > { %v10734_v17 = vpack.c.bf16 %v3812_v47, %v3809_v37  ;;  %8752 = vmatprep.subr.bf16.mxu0 %v3226_v0  ;;  %v9536_v37 = vld [vmem:[%s11578_s6 + $0x30] sm:$0xff]  }
 0x7cc   : > { %8733 = vmatmul.mubr.msk.bf16.vlgmr.msra.gmra.mrb[184].mxu0 %vm3420_vm9, %v9521_v22 }
 0x7cd   : > { %8753 = vmatpush3.bf16.msra.mxu0 %v3226_v0  ;;  %8736 = vmatprep.mubr.msk.bf16.mxu0 %vm3420_vm9, %v9522_v20  ;;  %v9529_v0 = vld [vmem:[%s11578_s6 + $0x98] sm:$0xff]  }
 0x7ce   : > { %8754 = vmatprep.subr.bf16.mxu0 %v3227_v18  ;;  %v8792_v63 = vpop.f32.mrb[196].mxu1 }
 0x7cf   : > { %v3825_v3 = vpop.f32.mrb[197].mxu1 }
 0x7d0   : > { %v8793_v9 = vpop.f32.mrb[198].mxu1 }
 0x7d1   : > { %v10741_v58 = vpack.c.bf16 %v8793_v9, %v8792_v63  ;;  %8755 = vmatpush3.bf16.msra.mxu0 %v3227_v18  ;;  %v3828_v52 = vpop.f32.mrb[199].mxu1 }
 0x7d2   : > { %v10746_v56 = vpack.c.bf16 %v3828_v52, %v3825_v3  ;;  %8756 = vmatprep.subr.bf16.mxu0 %v3228_v30  ;;  %v9538_v3 = vld [vmem:[%s11578_s6 + $0x40] sm:$0xff]   ;;  %v9541_v52 = vld [vmem:[%s11578_s6 + $0xa8] sm:$0xff]  }
 0x7d4   : > { %8737 = vmatmul.mubr.msk.bf16.gmra.mrb[188].mxu0 %vm3420_vm9, %v9523_v33  ;;  %v9539_v33 = vld [vmem:[%s11578_s6 + $0x48] sm:$0xff]  }
 0x7d5   : > { %8757 = vmatpush3.bf16.msra.mxu0 %v3228_v30  ;;  %8740 = vmatprep.mubr.msk.bf16.mxu0 %vm3420_vm9, %v9524_v8  ;;  %v9542_v8 = vld [vmem:[%s11578_s6 + $0xb0] sm:$0xff]  }
 0x7d6   : > { %8758 = vmatprep.subr.bf16.mxu0 %v3229_v28  ;;  %v10750_v4 = vpop.f32.mrb[200].mxu1 }
 0x7d7   : > { %v3841_v59 = vpop.f32.mrb[201].mxu1  ;;  %v3860_v41 = vpack.c.bf16 %v10750_v4, %v10750_v4  ;;  %v9544_v4 = vld [vmem:[%s11578_s6 + $0xc0] sm:$0xff]  }
 0x7d8   : > { %v8797_v15 = vpop.f32.mrb[202].mxu1 }
 0x7d9   : > { %8759 = vmatpush3.bf16.msra.mxu0 %v3229_v28  ;;  %v3844_v57 = vpop.f32.mrb[203].mxu1  ;;  %v9531_v28 = vld [vmem:[%s11578_s6 + $0x8] sm:$0xff]   ;;  %v3963_v47 = vsel %vm3451_vm10, %v3860_v41, 0  ;;  %v9546_v15 = vld [vmem:[%s11578_s6 + $0xd0] sm:$0xff]  }
 0x7da   : > { %v10758_v49 = vpack.c.bf16 %v3844_v57, %v3841_v59  ;;  %8760 = vmatprep.subr.bf16.mxu0 %v3230_v45  ;;  %v9545_v59 = vld [vmem:[%s11578_s6 + $0xc8] sm:$0xff]  }
 0x7dc   : > { %8741 = vmatmul.mubr.msk.bf16.gmra.mrb[192].mxu0 %vm3420_vm9, %v9525_v50 }
 0x7dd   : > { %8761 = vmatpush3.bf16.msra.mxu0 %v3230_v45  ;;  %8744 = vmatprep.mubr.msk.bf16.mxu0 %vm3420_vm9, %v9526_v21  ;;  %v9547_v21 = vld [vmem:[%s11578_s6 + $0xd8] sm:$0xff]  }
 0x7de   : > { %9383 = vmatprep.subr.msk.bf16.mxu0 %vm3451_vm10, %v3231_v13  ;;  %v8834_v12 = vpop.f32.mrb[204].mxu1  ;;  %v9549_v13 = vld [vmem:[%s11578_s6 + $0xe8] sm:$0xff]  }
 0x7df   : > { %v4143_v60 = vpop.f32.mrb[205].mxu1 }
 0x7e0   : > { %v8835_v1 = vpop.f32.mrb[206].mxu1 }
 0x7e1   : > { %v10767_v24 = vpack.c.bf16 %v8835_v1, %v8834_v12  ;;  %8763 = vmatpush3.bf16.msra.mxu0 %v3649_v62  ;;  %v4146_v16 = vpop.f32.mrb[207].mxu1  ;;  %v9550_v12 = vld [vmem:[%s11578_s6 + $0xf0] sm:$0xff]   ;;  %v9552_v62 = vld [vmem:[%s11578_s6 + $0x100] sm:$0xff]   ;;  %v9553_v1 = vld [vmem:[%s11578_s6 + $0x108] sm:$0xff]  }
 0x7e2   : > { %v10772_v18 = vpack.c.bf16 %v4146_v16, %v4143_v60  ;;  %8798 = vmatprep.subr.bf16.mxu0 %v10734_v17  ;;  %v9551_v60 = vld [vmem:[%s11578_s6 + $0xf8] sm:$0xff]   ;;  %v9556_v16 = vld [vmem:[%s11578_s6 + $0x120] sm:$0xff]  }
 0x7e4   : > { %8745 = vmatmul.mubr.msk.bf16.gmra.mrb[196].mxu0 %vm3420_vm9, %v9527_v5  ;;  %v9554_v5 = vld [vmem:[%s11578_s6 + $0x110] sm:$0xff]  }
 0x7e5   : > { %8748 = vmatprep.mubr.msk.bf16.mxu0 %vm3420_vm9, %v9528_v6 }
 0x7e6   : > { %v8838_v23 = vpop.f32.mrb[208].mxu1 }
 0x7e7   : > { %v4159_v35 = vpop.f32.mrb[209].mxu1 }
 0x7e8   : > { %v8839_v19 = vpop.f32.mrb[210].mxu1 }
 0x7e9   : > { %v10780_v61 = vpack.c.bf16 %v8839_v19, %v8838_v23  ;;  %v4162_v11 = vpop.f32.mrb[211].mxu1  ;;  %v9557_v23 = vld [vmem:[%s11578_s6 + $0x128] sm:$0xff]   ;;  %v9559_v19 = vld [vmem:[%s11578_s6 + $0x138] sm:$0xff]  }
 0x7ea   : > { %v10785_v29 = vpack.c.bf16 %v4162_v11, %v4159_v35  ;;  %v9558_v35 = vld [vmem:[%s11578_s6 + $0x130] sm:$0xff]  }
 0x7eb   : > { %v9562_v11 = vld [vmem:[%s11578_s6 + $0x150] sm:$0xff]  }
 0x7ec   : > { %8749 = vmatmul.mubr.msk.bf16.gmra.mrb[200].mxu0 %vm3420_vm9, %v9529_v0  ;;  %v9560_v0 = vld [vmem:[%s11578_s6 + $0x140] sm:$0xff]  }
 0x7ed   : > { %8764 = vmatprep.mubr.msk.bf16.mxu0 %vm3420_vm9, %v9530_v26  ;;  %v9563_v26 = vld [vmem:[%s11578_s6 + $0x158] sm:$0xff]  }
 0x7ee   : > { %v10789_v27 = vpop.f32.mrb[212].mxu1 }
 0x7ef   : > { %v4175_v53 = vpop.f32.mrb[213].mxu1  ;;  %v4194_v50 = vpack.c.bf16 %v10789_v27, %v10789_v27  ;;  %v9565_v27 = vld [vmem:[%s11578_s6 + $0x168] sm:$0xff]  }
 0x7f0   : > { %v8843_v31 = vpop.f32.mrb[214].mxu1 }
 0x7f1   : > { %v4178_v25 = vpop.f32.mrb[215].mxu1  ;;  %v4297_v57 = vsel %vm3451_vm10, %v4194_v50, 0  ;;  %v9567_v31 = vld [vmem:[%s11578_s6 + $0x178] sm:$0xff]  }
 0x7f2   : > { %v10797_v55 = vpack.c.bf16 %v4178_v25, %v4175_v53  ;;  %v9566_v53 = vld [vmem:[%s11578_s6 + $0x170] sm:$0xff]   ;;  %v9569_v25 = vld [vmem:[%s11578_s6 + $0x188] sm:$0xff]  }
 0x7f4   : > { %8765 = vmatmul.mubr.msk.bf16.vlgmr.msra.gmra.mrb[184].mxu0 %vm3420_vm9, %v9531_v28  ;;  %v9568_v28 = vld [vmem:[%s11578_s6 + $0x180] sm:$0xff]  }
 0x7f5   : > { %8799 = vmatpush3.bf16.msra.mxu0 %v10734_v17  ;;  %8768 = vmatprep.mubr.msk.bf16.mxu0 %vm3420_vm9, %v9532_v38  ;;  %v9537_v17 = vld [vmem:[%s11578_s6 + $0x38] sm:$0xff]   ;;  %v9572_v38 = vld [vmem:[%s11581_s9 + $0x4] ss:$8 sps:$4 sm:$0xff]  }
 0x7f6   : > { %8800 = vmatprep.subr.bf16.mxu0 %v10729_v46  ;;  %v8880_v30 = vpop.f32.mrb[216].mxu1  ;;  %7686 = vmatprep.mubr.msk.bf16.mxu1 %vm635_vm0, %v9572_v38 }
 0x7f7   : > { %v4477_v39 = vpop.f32.mrb[217].mxu1 }
 0x7f8   : > { %v8881_v43 = vpop.f32.mrb[218].mxu1 }
 0x7f9   : > { %8801 = vmatpush3.bf16.msra.mxu0 %v10729_v46  ;;  %v10807_v40 = vpack.c.bf16 %v8881_v43, %v8880_v30  ;;  %v4480_v42 = vpop.f32.mrb[219].mxu1  ;;  %v4794_v30 = vpop.permute.xlu0 %4793 }
 0x7fa   : > { %8802 = vmatprep.subr.bf16.mxu0 %v10746_v56  ;;  %v10813_v48 = vpack.c.bf16 %v4480_v42, %v4477_v39 }
 0x7fc   : > { %8769 = vmatmul.mubr.msk.bf16.gmra.mrb[188].mxu0 %vm3420_vm9, %v9533_v34 }
 0x7fd   : > { %8803 = vmatpush3.bf16.msra.mxu0 %v10746_v56  ;;  %8772 = vmatprep.mubr.msk.bf16.mxu0 %vm3420_vm9, %v9534_v2  ;;  %v9543_v56 = vld [vmem:[%s11578_s6 + $0xb8] sm:$0xff]   ;;  %v4804_v43 = vpop.permute.xlu0 %4803 }
 0x7fe   : > { %8804 = vmatprep.subr.bf16.mxu0 %v10741_v58  ;;  %v8884_v54 = vpop.f32.mrb[220].mxu1 }
 0x7ff   : > { %v4493_v51 = vpop.f32.mrb[221].mxu1 }
 0x800   : > { %v8885_v45 = vpop.f32.mrb[222].mxu1 }
 0x801   : > { %8805 = vmatpush3.bf16.msra.mxu0 %v10741_v58  ;;  %v10823_v44 = vpack.c.bf16 %v8885_v45, %v8884_v54  ;;  %v4496_v7 = vpop.f32.mrb[223].mxu1  ;;  %v9540_v58 = vld [vmem:[%s11578_s6 + $0xa0] sm:$0xff]  }
 0x802   : > { %8806 = vmatprep.subr.bf16.mxu0 %v10758_v49  ;;  %v10829_v14 = vpack.c.bf16 %v4496_v7, %v4493_v51 }
 0x804   : > { %8773 = vmatmul.mubr.msk.bf16.gmra.mrb[192].mxu0 %vm3420_vm9, %v9535_v36 }
 0x805   : > { %8807 = vmatpush3.bf16.msra.mxu0 %v10758_v49  ;;  %8776 = vmatprep.mubr.msk.bf16.mxu0 %vm3420_vm9, %v9536_v37  ;;  %v9548_v49 = vld [vmem:[%s11578_s6 + $0xe0] sm:$0xff]  }
 0x806   : > { %9385 = vmatprep.subr.msk.bf16.mxu0 %vm3451_vm10, %v3860_v41  ;;  %v10837_v22 = vpop.f32.mrb[224].mxu1 }
 0x807   : > { %v4509_v46 = vpop.f32.mrb[225].mxu1  ;;  %v4528_v6 = vpack.c.bf16 %v10837_v22, %v10837_v22 }
 0x808   : > { %v8889_v20 = vpop.f32.mrb[226].mxu1 }
 0x809   : > { %8809 = vmatpush3.bf16.msra.mxu0 %v3963_v47  ;;  %v4512_v63 = vpop.f32.mrb[227].mxu1 }
 0x80a   : > { %8844 = vmatprep.subr.bf16.mxu0 %v10772_v18  ;;  %v4527_v9 = vpack.c.bf16 %v4512_v63, %v4509_v46 }
 0x80c   : > { %8777 = vmatmul.mubr.msk.bf16.gmra.mrb[196].mxu0 %vm3420_vm9, %v9537_v17 }
 0x80d   : > { %8780 = vmatprep.mubr.msk.bf16.mxu0 %vm3420_vm9, %v9538_v3 }
 0x814   : > { %8781 = vmatmul.mubr.msk.bf16.gmra.mrb[200].mxu0 %vm3420_vm9, %v9539_v33 }
 0x815   : > { %8810 = vmatprep.mubr.msk.bf16.mxu0 %vm3420_vm9, %v9540_v58 }
 0x81c   : > { %8811 = vmatmul.mubr.msk.bf16.vlgmr.msra.gmra.mrb[184].mxu0 %vm3420_vm9, %v9541_v52 }
 0x81d   : > { %8845 = vmatpush3.bf16.msra.mxu0 %v10772_v18  ;;  %8814 = vmatprep.mubr.msk.bf16.mxu0 %vm3420_vm9, %v9542_v8  ;;  %v4631_v18 = vsel %vm3451_vm10, %v4528_v6, 0 }
 0x81e   : > { %8846 = vmatprep.subr.bf16.mxu0 %v10767_v24 }
 0x821   : > { %8847 = vmatpush3.bf16.msra.mxu0 %v10767_v24  ;;  %v9555_v24 = vld [vmem:[%s11578_s6 + $0x118] sm:$0xff]  }
 0x822   : > { %8848 = vmatprep.subr.bf16.mxu0 %v10785_v29 }
 0x824   : > { %8815 = vmatmul.mubr.msk.bf16.gmra.mrb[188].mxu0 %vm3420_vm9, %v9543_v56 }
 0x825   : > { %8849 = vmatpush3.bf16.msra.mxu0 %v10785_v29  ;;  %8818 = vmatprep.mubr.msk.bf16.mxu0 %vm3420_vm9, %v9544_v4  ;;  %v9564_v29 = vld [vmem:[%s11578_s6 + $0x160] sm:$0xff]  }
 0x826   : > { %8850 = vmatprep.subr.bf16.mxu0 %v10780_v61 }
 0x829   : > { %8851 = vmatpush3.bf16.msra.mxu0 %v10780_v61  ;;  %v9561_v61 = vld [vmem:[%s11578_s6 + $0x148] sm:$0xff]  }
 0x82a   : > { %8852 = vmatprep.subr.bf16.mxu0 %v10797_v55 }
 0x82c   : > { %8819 = vmatmul.mubr.msk.bf16.gmra.mrb[192].mxu0 %vm3420_vm9, %v9545_v59 }
 0x82d   : > { %8853 = vmatpush3.bf16.msra.mxu0 %v10797_v55  ;;  %8822 = vmatprep.mubr.msk.bf16.mxu0 %vm3420_vm9, %v9546_v15  ;;  %v4789_v55 = vpop.permute.xlu1 %4788 }
 0x82e   : > { %9387 = vmatprep.subr.msk.bf16.mxu0 %vm3451_vm10, %v4194_v50 }
 0x831   : > { %8855 = vmatpush3.bf16.msra.mxu0 %v4297_v57  ;;  %v4799_v39 = vpop.permute.xlu1 %4798 }
 0x832   : > { %8890 = vmatprep.subr.bf16.mxu0 %v10813_v48 }
 0x834   : > { %8823 = vmatmul.mubr.msk.bf16.gmra.mrb[196].mxu0 %vm3420_vm9, %v9547_v21 }
 0x835   : > { %8826 = vmatprep.mubr.msk.bf16.mxu0 %vm3420_vm9, %v9548_v49  ;;  %v4809_v34 = vpop.permute.xlu1 %4808 }
 0x839   : > { %v4819_v42 = vpop.permute.xlu1 %4818 }
 0x83c   : > { %8827 = vmatmul.mubr.msk.bf16.gmra.mrb[200].mxu0 %vm3420_vm9, %v9549_v13 }
 0x83d   : > { %8856 = vmatprep.mubr.msk.bf16.mxu0 %vm3420_vm9, %v9550_v12  ;;  %v4829_v45 = vpop.permute.xlu1 %4828 }
 0x841   : > { %v4839_v63 = vpop.permute.xlu1 %4838 }
 0x844   : > { %8857 = vmatmul.mubr.msk.bf16.vlgmr.msra.gmra.mrb[184].mxu0 %vm3420_vm9, %v9551_v60 }
 0x845   : > { %8891 = vmatpush3.bf16.msra.mxu0 %v10813_v48  ;;  %8860 = vmatprep.mubr.msk.bf16.mxu0 %vm3420_vm9, %v9552_v62  ;;  %v4849_v21 = vpop.permute.xlu1 %4848 }
 0x846   : > { %8892 = vmatprep.subr.bf16.mxu0 %v10807_v40 }
 0x849   : > { %8893 = vmatpush3.bf16.msra.mxu0 %v10807_v40  ;;  %v4814_v40 = vpop.permute.xlu0 %4813 }
 0x84a   : > { %8894 = vmatprep.subr.bf16.mxu0 %v10829_v14 }
 0x84c   : > { %8861 = vmatmul.mubr.msk.bf16.gmra.mrb[188].mxu0 %vm3420_vm9, %v9553_v1 }
 0x84d   : > { %8895 = vmatpush3.bf16.msra.mxu0 %v10829_v14  ;;  %8864 = vmatprep.mubr.msk.bf16.mxu0 %vm3420_vm9, %v9554_v5  ;;  %v4824_v2 = vpop.permute.xlu0 %4823 }
 0x84e   : > { %8896 = vmatprep.subr.bf16.mxu0 %v10823_v44 }
 0x851   : > { %8897 = vmatpush3.bf16.msra.mxu0 %v10823_v44  ;;  %v4834_v14 = vpop.permute.xlu0 %4833 }
 0x852   : > { %8898 = vmatprep.subr.bf16.mxu0 %v4527_v9 }
 0x854   : > { %8865 = vmatmul.mubr.msk.bf16.gmra.mrb[192].mxu0 %vm3420_vm9, %v9555_v24 }
 0x855   : > { %8899 = vmatpush3.bf16.msra.mxu0 %v4527_v9  ;;  %8868 = vmatprep.mubr.msk.bf16.mxu0 %vm3420_vm9, %v9556_v16  ;;  %v4844_v52 = vpop.permute.xlu0 %4843 }
 0x856   : > { %9389 = vmatprep.subr.msk.bf16.mxu0 %vm3451_vm10, %v4528_v6 }
 0x859   : > { %8901 = vmatpush3.bf16.msra.mxu0 %v4631_v18  ;;  %v4854_v60 = vpop.permute.xlu0 %4853 }
 0x85a   : > { %8944 = vmatprep.subr.bf16.mxu0 %v9663_v10 }
 0x85c   : > { %8869 = vmatmul.mubr.msk.bf16.gmra.mrb[196].mxu0 %vm3420_vm9, %v9557_v23 }
 0x85d   : > { %8872 = vmatprep.mubr.msk.bf16.mxu0 %vm3420_vm9, %v9558_v35  ;;  %v4859_v35 = vpop.permute.xlu1 %4858 }
 0x861   : > { %v4869_v38 = vpop.permute.xlu1 %4868 }
 0x864   : > { %8873 = vmatmul.mubr.msk.bf16.gmra.mrb[200].mxu0 %vm3420_vm9, %v9559_v19 }
 0x865   : > { %8902 = vmatprep.mubr.msk.bf16.mxu0 %vm3420_vm9, %v9560_v0 }
 0x86c   : > { %8903 = vmatmul.mubr.msk.bf16.vlgmr.msra.gmra.mrb[184].mxu0 %vm3420_vm9, %v9561_v61 }
 0x86d   : > { %8906 = vmatprep.mubr.msk.bf16.mxu0 %vm3420_vm9, %v9562_v11  ;;  %v4864_v11 = vpop.permute.xlu0 %4863 }
 0x874   : > { %8907 = vmatmul.mubr.msk.bf16.gmra.mrb[188].mxu0 %vm3420_vm9, %v9563_v26 }
 0x875   : > { %8910 = vmatprep.mubr.msk.bf16.mxu0 %vm3420_vm9, %v9564_v29 }
 0x87c   : > { %8911 = vmatmul.mubr.msk.bf16.gmra.mrb[192].mxu0 %vm3420_vm9, %v9565_v27 }
 0x87d   : > { %8914 = vmatprep.mubr.msk.bf16.mxu0 %vm3420_vm9, %v9566_v53 }
 0x884   : > { %8915 = vmatmul.mubr.msk.bf16.gmra.mrb[196].mxu0 %vm3420_vm9, %v9567_v31 }
 0x885   : > { %8918 = vmatprep.mubr.msk.bf16.mxu0 %vm3420_vm9, %v9568_v28 }
 0x88c   : > { %8919 = vmatmul.mubr.msk.bf16.gmra.mrb[200].mxu0 %vm3420_vm9, %v9569_v25 }
 0x88d   : > { %8946 = vmatprep.mubr.msk.bf16.mxu0 %vm9664_vm1, %v9663_v10 }
 0x93f   : > { %v8904_v48 = vpop.f32.mrb[184].mxu0 }
 0x940   : > { %v4888_v54 = vadd.f32 %v8904_v48, %v4799_v39  ;;  %v4667_v51 = vpop.f32.mrb[185].mxu0 }
 0x941   : > { %v4886_v36 = vadd.f32 %v4789_v55, %v4667_v51  ;;  %v8905_v44 = vpop.f32.mrb[186].mxu0 }
 0x942   : > { %v4889_v7 = vadd.f32 %v8905_v44, %v4804_v43  ;;  %v4670_v37 = vpop.f32.mrb[187].mxu0  ;;  %v4908_v22 = vmax.f32 %v4888_v54, 0.0 }
 0x943   : > { %v4887_v41 = vadd.f32 %v4794_v30, %v4670_v37  ;;  %v4906_v47 = vmax.f32 %v4886_v36, 0.0 }
 0x944   : > { %v4909_v46 = vmax.f32 %v4889_v7, 0.0 }
 0x945   : > { %v4907_v20 = vmax.f32 %v4887_v41, 0.0 }
 0x946   : > { %v11005_v17 = vpack.c.bf16 %v4909_v46, %v4908_v22 }
 0x947   : > { %v11007_v3 = vpack.c.bf16 %v4907_v20, %v4906_v47  ;;  %v8908_v9 = vpop.f32.mrb[188].mxu0 }
 0x948   : > { %v4892_v33 = vadd.f32 %v8908_v9, %v4819_v42  ;;  %v4683_v58 = vpop.f32.mrb[189].mxu0 }
 0x949   : > { %v4890_v8 = vadd.f32 %v4809_v34, %v4683_v58  ;;  %v8909_v56 = vpop.f32.mrb[190].mxu0  ;;  %5007 = vmatpush1.bf16.msra.mxu1 %v11007_v3  ;;  %v4874_v34 = vpop.permute.xlu0 %4873 }
 0x94a   : > { %v4893_v4 = vadd.f32 %v8909_v56, %v4824_v2  ;;  %v4686_v59 = vpop.f32.mrb[191].mxu0  ;;  %5008 = vmatprep.subr.bf16.mxu1 %v9665_v32  ;;  %v4912_v50 = vmax.f32 %v4892_v33, 0.0  ;;  %v9570_v56 = vld [vmem:[%s11581_s9] ss:$8 sps:$4 sm:$0xff]  }
 0x94b   : > { %v4891_v15 = vadd.f32 %v4814_v40, %v4686_v59  ;;  %v4910_v49 = vmax.f32 %v4890_v8, 0.0  ;;  %v9575_v59 = vld [vmem:[%s11581_s9 + $0x10] ss:$8 sps:$4 sm:$0xff]  }
 0x94c   : > { %v4913_v57 = vmax.f32 %v4893_v4, 0.0  ;;  %v9573_v4 = vld [vmem:[%s11581_s9 + $0x14] ss:$8 sps:$4 sm:$0xff]  }
 0x94d   : > { %v4911_v13 = vmax.f32 %v4891_v15, 0.0  ;;  %5009 = vmatpush1.bf16.msra.mxu1 %v11005_v17  ;;  %v9576_v15 = vld [vmem:[%s11581_s9 + $0x24] ss:$8 sps:$4 sm:$0xff]  }
 0x94e   : > { %v11012_v12 = vpack.c.bf16 %v4913_v57, %v4912_v50  ;;  %5010 = vmatprep.subr.bf16.mxu1 %v9665_v32  ;;  %v9581_v50 = vld [vmem:[%s11581_s9 + $0x30] ss:$8 sps:$4 sm:$0xff]   ;;  %v9582_v57 = vld [vmem:[%s11581_s9 + $0x44] ss:$8 sps:$4 sm:$0xff]  }
 0x94f   : > { %v11015_v62 = vpack.c.bf16 %v4911_v13, %v4910_v49  ;;  %v8912_v1 = vpop.f32.mrb[192].mxu0  ;;  %v9587_v49 = vld [vmem:[%s11581_s9 + $0x54] ss:$8 sps:$4 sm:$0xff]   ;;  %v9585_v13 = vld [vmem:[%s11581_s9 + $0x50] ss:$8 sps:$4 sm:$0xff]  }
 0x950   : > { %v4896_v5 = vadd.f32 %v8912_v1, %v4839_v63  ;;  %v4699_v24 = vpop.f32.mrb[193].mxu0  ;;  %v9596_v1 = vld [vmem:[%s11581_s9 + $0x84] ss:$8 sps:$4 sm:$0xff]  }
 0x951   : > { %v4894_v16 = vadd.f32 %v4829_v45, %v4699_v24  ;;  %v8913_v6 = vpop.f32.mrb[194].mxu0  ;;  %5011 = vmatpush1.bf16.msra.mxu1 %v11015_v62  ;;  %v4879_v45 = vpop.permute.xlu1 %4878  ;;  %v9599_v24 = vld [vmem:[%s11581_s9 + $0x94] ss:$8 sps:$4 sm:$0xff]  }
 0x952   : > { %v4897_v18 = vadd.f32 %v8913_v6, %v4844_v52  ;;  %v4702_v23 = vpop.f32.mrb[195].mxu0  ;;  %5012 = vmatprep.subr.bf16.mxu1 %v9665_v32  ;;  %v4916_v0 = vmax.f32 %v4896_v5, 0.0  ;;  %v9594_v5 = vld [vmem:[%s11581_s9 + $0x80] ss:$8 sps:$4 sm:$0xff]  }
 0x953   : > { %v4895_v19 = vadd.f32 %v4834_v14, %v4702_v23  ;;  %v4914_v26 = vmax.f32 %v4894_v16, 0.0  ;;  %v4884_v14 = vpop.permute.xlu0 %4883  ;;  %v9597_v16 = vld [vmem:[%s11581_s9 + $0x90] ss:$8 sps:$4 sm:$0xff]   ;;  %v9600_v6 = vld [vmem:[%s11582_s10] sm:$0x1f]  }
 0x954   : > { %v4917_v61 = vmax.f32 %v4897_v18, 0.0  ;;  %v9601_v18 = vld [vmem:[%s11582_s10 + $0x8] sm:$0x1f]   ;;  %v5263_v23 = vsel %vm5261_vm11, %v9600_v6, 0  ;;  %v5437_v6 = vld [vmem:[%s11584_s12] sm:$0x7] }
 0x955   : > { %v4915_v29 = vmax.f32 %v4895_v19, 0.0  ;;  %5013 = vmatpush1.bf16.msra.mxu1 %v11012_v12 }
 0x956   : > { %v11020_v27 = vpack.c.bf16 %v4917_v61, %v4916_v0  ;;  %5014 = vmatprep.subr.bf16.mxu1 %v9665_v32 }
 0x957   : > { %v11023_v53 = vpack.c.bf16 %v4915_v29, %v4914_v26  ;;  %v8916_v31 = vpop.f32.mrb[196].mxu0 }
 0x958   : > { %v4900_v28 = vadd.f32 %v8916_v31, %v4859_v35  ;;  %v4715_v25 = vpop.f32.mrb[197].mxu0  ;;  %v5347_v35 = vsel %vm5261_vm11, %v9601_v18, 0 }
 0x959   : > { %v4898_v55 = vadd.f32 %v4849_v21, %v4715_v25  ;;  %v8917_v30 = vpop.f32.mrb[198].mxu0  ;;  %5015 = vmatpush1.bf16.msra.mxu1 %v11023_v53  ;;  %v9584_v21 = vld [vmem:[%s11581_s9 + $0x40] ss:$8 sps:$4 sm:$0xff]   ;;  %8945 = vmatpush3.bf16.msra.mxu0 %v5347_v35 }
 0x95a   : > { %v4901_v39 = vadd.f32 %v8917_v30, %v4864_v11  ;;  %v4718_v43 = vpop.f32.mrb[199].mxu0  ;;  %5016 = vmatprep.subr.bf16.mxu1 %v9665_v32  ;;  %v4920_v42 = vmax.f32 %v4900_v28, 0.0  ;;  %8988 = vmatprep.subr.bf16.mxu0 %v9663_v10 }
 0x95b   : > { %v4899_v40 = vadd.f32 %v4854_v60, %v4718_v43  ;;  %v4918_v48 = vmax.f32 %v4898_v55, 0.0  ;;  %v9590_v60 = vld [vmem:[%s11581_s9 + $0x60] ss:$8 sps:$4 sm:$0xff]  }
 0x95c   : > { %v4921_v2 = vmax.f32 %v4901_v39, 0.0 }
 0x95d   : > { %v4919_v54 = vmax.f32 %v4899_v40, 0.0  ;;  %5017 = vmatpush1.bf16.msra.mxu1 %v11020_v27 }
 0x95e   : > { %v4933_v51 = vpack.c.bf16 %v4921_v2, %v4920_v42  ;;  %5018 = vmatprep.subr.bf16.mxu1 %v9665_v32 }
 0x95f   : > { %v4932_v36 = vpack.c.bf16 %v4919_v54, %v4918_v48  ;;  %v8920_v44 = vpop.f32.mrb[200].mxu0 }
 0x960   : > { %v4904_v7 = vadd.f32 %v8920_v44, %v4879_v45  ;;  %v4731_v37 = vpop.f32.mrb[201].mxu0 }
 0x961   : > { %v4902_v41 = vadd.f32 %v4869_v38, %v4731_v37  ;;  %v8921_v22 = vpop.f32.mrb[202].mxu0  ;;  %5019 = vmatpush1.bf16.msra.mxu1 %v4932_v36 }
 0x962   : > { %v4905_v46 = vadd.f32 %v8921_v22, %v4884_v14  ;;  %v4734_v47 = vpop.f32.mrb[203].mxu0  ;;  %5020 = vmatprep.subr.bf16.mxu1 %v9665_v32  ;;  %v4924_v63 = vmax.f32 %v4904_v7, 0.0 }
 0x963   : > { %v4903_v20 = vadd.f32 %v4874_v34, %v4734_v47  ;;  %v4922_v33 = vmax.f32 %v4902_v41, 0.0 }
 0x964   : > { %v4925_v9 = vmax.f32 %v4905_v46, 0.0 }
 0x965   : > { %v4923_v58 = vmax.f32 %v4903_v20, 0.0  ;;  %5021 = vmatpush1.bf16.msra.mxu1 %v4933_v51 }
 0x966   : > { %v4935_v52 = vpack.c.bf16 %v4925_v9, %v4924_v63  ;;  %5022 = vmatprep.subr.bf16.mxu1 %v9665_v32 }
 0x967   : > { %v4934_v8 = vpack.c.bf16 %v4923_v58, %v4922_v33 }
 0x969   : > { %5023 = vmatpush1.bf16.msra.mxu1 %v4934_v8 }
 0x96a   : > { %5024 = vmatprep.subr.bf16.mxu1 %v9665_v32 }
 0x96d   : > { %5025 = vmatpush1.bf16.msra.mxu1 %v4935_v52 }
 0x96e   : > { %5150 = vmatprep.subr.bf16.mxu1 %v9665_v32 }
 0x970   : > { %5039 = vmatmul.mubr.bf16.vlgmr.msra.gmra.mrb[228].mxu1 %v9570_v56 }
 0x971   : > { %5151 = vmatpush1.bf16.msra.mxu1 %v11007_v3  ;;  %7687 = vmatprep.mubr.msk.bf16.mxu1 %vm635_vm0, %v9573_v4  ;;  %v9578_v3 = vld [vmem:[%s11581_s9 + $0x20] ss:$8 sps:$4 sm:$0xff]  }
 0x972   : > { %5152 = vmatprep.subr.bf16.mxu1 %v9665_v32 }
 0x975   : > { %5153 = vmatpush1.bf16.msra.mxu1 %v11005_v17  ;;  %v9579_v17 = vld [vmem:[%s11581_s9 + $0x34] ss:$8 sps:$4 sm:$0xff]  }
 0x976   : > { %5154 = vmatprep.subr.bf16.mxu1 %v9665_v32 }
 0x978   : > { %5047 = vmatmul.mubr.bf16.gmra.mrb[232].mxu1 %v9575_v59 }
 0x979   : > { %5155 = vmatpush1.bf16.msra.mxu1 %v11015_v62  ;;  %7688 = vmatprep.mubr.msk.bf16.mxu1 %vm635_vm0, %v9576_v15  ;;  %v9591_v62 = vld [vmem:[%s11581_s9 + $0x70] ss:$8 sps:$4 sm:$0xff]  }
 0x97a   : > { %5156 = vmatprep.subr.bf16.mxu1 %v9665_v32 }
 0x97d   : > { %5157 = vmatpush1.bf16.msra.mxu1 %v11012_v12  ;;  %v9588_v12 = vld [vmem:[%s11581_s9 + $0x64] ss:$8 sps:$4 sm:$0xff]  }
 0x97e   : > { %5158 = vmatprep.subr.bf16.mxu1 %v9665_v32 }
 0x980   : > { %5055 = vmatmul.mubr.bf16.gmra.mrb[236].mxu1 %v9578_v3 }
 0x981   : > { %5159 = vmatpush1.bf16.msra.mxu1 %v11023_v53  ;;  %7689 = vmatprep.mubr.msk.bf16.mxu1 %vm635_vm0, %v9579_v17 }
 0x982   : > { %5160 = vmatprep.subr.bf16.mxu1 %v9665_v32 }
 0x985   : > { %5161 = vmatpush1.bf16.msra.mxu1 %v11020_v27 }
 0x986   : > { %5162 = vmatprep.subr.bf16.mxu1 %v9665_v32 }
 0x988   : > { %5063 = vmatmul.mubr.bf16.gmra.mrb[240].mxu1 %v9581_v50 }
 0x989   : > { %5163 = vmatpush1.bf16.msra.mxu1 %v4932_v36  ;;  %7690 = vmatprep.mubr.msk.bf16.mxu1 %vm635_vm0, %v9582_v57 }
 0x98a   : > { %5164 = vmatprep.subr.bf16.mxu1 %v9665_v32 }
 0x98d   : > { %5165 = vmatpush1.bf16.msra.mxu1 %v4933_v51 }
 0x98e   : > { %5166 = vmatprep.subr.bf16.mxu1 %v9665_v32 }
 0x990   : > { %5071 = vmatmul.mubr.bf16.gmra.mrb[244].mxu1 %v9584_v21 }
 0x991   : > { %5167 = vmatpush1.bf16.msra.mxu1 %v4934_v8  ;;  %7711 = vmatprep.mubr.msk.bf16.mxu1 %vm635_vm0, %v9587_v49 }
 0x992   : > { %5168 = vmatprep.subr.bf16.mxu1 %v9665_v32  ;;  %v9593_v32 = vld [vmem:[%s11581_s9 + $0x74] ss:$8 sps:$4 sm:$0xff]  }
 0x995   : > { %5169 = vmatpush1.bf16.msra.mxu1 %v4935_v52 }
 0x996   : > { %8922 = vmatprep.subr.bf16.mxu1 %v9663_v10 }
 0x998   : > { %5183 = vmatmul.mubr.bf16.vlgmr.msra.gmra.mrb[248].mxu1 %v9585_v13 }
 0x999   : > { %7712 = vmatprep.mubr.msk.bf16.mxu1 %vm635_vm0, %v9588_v12  ;;  %8923 = vmatpush3.bf16.msra.mxu1 %v5263_v23 }
 0x99a   : > { %8966 = vmatprep.subr.bf16.mxu1 %v9663_v10 }
 0x9a0   : > { %5191 = vmatmul.mubr.bf16.gmra.mrb[252].mxu1 %v9590_v60 }
 0x9a1   : > { %7713 = vmatprep.mubr.msk.bf16.mxu1 %vm635_vm0, %v9593_v32 }
 0x9a8   : > { %5199 = vmatmul.mubr.bf16.gmra.mrb[0].mxu1 %v9591_v62 }
 0x9a9   : > { %7714 = vmatprep.mubr.msk.bf16.mxu1 %vm635_vm0, %v9596_v1  ;;  %v9666_v1 = vmov 65535  }
 0x9b0   : > { %5207 = vmatmul.mubr.bf16.gmra.mrb[4].mxu1 %v9594_v5  ;;  %v5455_v5 = vsel %vm3451_vm10, 4294967295, %v9666_v1 }
 0x9b1   : > { %7715 = vmatprep.mubr.msk.bf16.mxu1 %vm635_vm0, %v9599_v24  ;;  %v11156_v24 = vsel %vm5454_vm13, %v5455_v5, 0  ;;  %v7825_v5 = vld [vmem:[%s11584_s12 + $0xc] sm:$0x7]  ;;  %vm6888_vm0 = vcmask 982016  }
 0x9b2   : > { %v5458_v23 = vand.u32 %v11156_v24, %v5437_v6  ;;  %v7862_v6 = vld [vmem:[%s11584_s12 + $0x10] sm:$0x7] }
 0x9b8   : > { %5215 = vmatmul.mubr.bf16.gmra.mrb[8].mxu1 %v9597_v16  ;;  %v7735_v16 = vld [vmem:[%s11584_s12 + $0x4] sm:$0x7] }
 0x9b9   : > { %8924 = vmatprep.mubr.msk.bf16.mxu1 %vm9664_vm1, %v9663_v10  ;;  %v5556_v18 = vand.u32 %v7735_v16, %v11156_v24  ;;  %v6244_v16 = vand.u32 %v7825_v5, %v11156_v24  ;;  %v9606_v5 = vld [vmem:[%s11583_s11 + $0x5c] sm:$0xff]  }
 0xa43   : > { %v5040_v19 = vpop.f32.mrb[228].mxu1 }
 0xa44   : > { %v5042_v0 = vpop.f32.mrb[229].mxu1 }
 0xa45   : > { %v5043_v61 = vpop.f32.mrb[230].mxu1 }
 0xa46   : > { %v5045_v11 = vpop.f32.mrb[231].mxu1 }
 0xa4b   : > { %v5048_v26 = vpop.f32.mrb[232].mxu1 }
 0xa4c   : > { %v5050_v29 = vpop.f32.mrb[233].mxu1 }
 0xa4d   : > { %v5051_v27 = vpop.f32.mrb[234].mxu1 }
 0xa4e   : > { %v5053_v53 = vpop.f32.mrb[235].mxu1 }
 0xa53   : > { %v5056_v31 = vpop.f32.mrb[236].mxu1 }
 0xa54   : > { %v5058_v28 = vpop.f32.mrb[237].mxu1 }
 0xa55   : > { %v5059_v25 = vpop.f32.mrb[238].mxu1 }
 0xa56   : > { %v5061_v38 = vpop.f32.mrb[239].mxu1 }
 0xa5b   : > { %v5064_v55 = vpop.f32.mrb[240].mxu1 }
 0xa5c   : > { %v5066_v30 = vpop.f32.mrb[241].mxu1 }
 0xa5d   : > { %v5067_v39 = vpop.f32.mrb[242].mxu1 }
 0xa5e   : > { %v5069_v43 = vpop.f32.mrb[243].mxu1 }
 0xa63   : > { %v5072_v34 = vpop.f32.mrb[244].mxu1 }
 0xa64   : > { %v5074_v40 = vpop.f32.mrb[245].mxu1 }
 0xa65   : > { %v5075_v42 = vpop.f32.mrb[246].mxu1 }
 0xa66   : > { %v5077_v2 = vpop.f32.mrb[247].mxu1 }
 0xa6b   : > { %v5184_v48 = vpop.f32.mrb[248].mxu1 }
 0xa6c   : > { %v5223_v54 = vmax.f32 %v5040_v19, %v5184_v48  ;;  %v5186_v51 = vpop.f32.mrb[249].mxu1 }
 0xa6d   : > { %v5187_v45 = vpop.f32.mrb[250].mxu1 }
 0xa6e   : > { %v5224_v36 = vmax.f32 %v5043_v61, %v5187_v45  ;;  %v5189_v44 = vpop.f32.mrb[251].mxu1 }
 0xa70   : > { %v5233_v7 = vpack.c.bf16 %v5224_v36, %v5223_v54 }
 0xa72   : > { %8925 = vmatmul.mubr.msk.bf16.vlgmr.msra.gmra.mrb[12].mxu1 %vm5245_vm12, %v5233_v7  ;;  %8947 = vmatmul.mubr.msk.bf16.vlgmr.msra.gmra.mrb[204].mxu0 %vm5245_vm12, %v5233_v7 }
 0xa73   : > { %v5192_v37 = vpop.f32.mrb[252].mxu1  ;;  %8928 = vmatprep.mubr.msk.bf16.mxu1 %vm9664_vm1, %v9663_v10  ;;  %8950 = vmatprep.mubr.msk.bf16.mxu0 %vm9664_vm1, %v9663_v10 }
 0xa74   : > { %v5225_v14 = vmax.f32 %v5048_v26, %v5192_v37  ;;  %v5194_v41 = vpop.f32.mrb[253].mxu1  ;;  %8989 = vmatpush3.bf16.msra.mxu0 %v5556_v18  ;;  %8967 = vmatpush3.bf16.msra.mxu1 %v5458_v23  ;;  %v6516_v18 = vand.u32 %v7862_v6, %v11156_v24 }
 0xa75   : > { %v5195_v22 = vpop.f32.mrb[254].mxu1  ;;  %9062 = vmatprep.subr.bf16.mxu0 %v9663_v10 }
 0xa76   : > { %v5226_v46 = vmax.f32 %v5051_v27, %v5195_v22  ;;  %v5197_v47 = vpop.f32.mrb[255].mxu1  ;;  %v7788_v27 = vld [vmem:[%s11584_s12 + $0x8] sm:$0x7] }
 0xa77   : > { %v5972_v38 = vand.u32 %v7788_v27, %v11156_v24  ;;  %v9602_v24 = vld [vmem:[%s11583_s11 + $0x3c] sm:$0xff]  }
 0xa78   : > { %v5234_v20 = vpack.c.bf16 %v5226_v46, %v5225_v14 }
 0xa7a   : > { %8929 = vmatmul.mubr.msk.bf16.gmra.mrb[16].mxu1 %vm5245_vm12, %v5234_v20  ;;  %8951 = vmatmul.mubr.msk.bf16.gmra.mrb[208].mxu0 %vm5245_vm12, %v5234_v20 }
 0xa7b   : > { %v5200_v63 = vpop.f32.mrb[0].mxu1  ;;  %8932 = vmatprep.mubr.msk.bf16.mxu1 %vm9664_vm1, %v9663_v10  ;;  %8954 = vmatprep.mubr.msk.bf16.mxu0 %vm9664_vm1, %v9663_v10 }
 0xa7c   : > { %v5227_v9 = vmax.f32 %v5056_v31, %v5200_v63  ;;  %v5202_v33 = vpop.f32.mrb[1].mxu1 }
 0xa7d   : > { %v5203_v58 = vpop.f32.mrb[2].mxu1 }
 0xa7e   : > { %v5228_v52 = vmax.f32 %v5059_v25, %v5203_v58  ;;  %v5205_v8 = vpop.f32.mrb[3].mxu1 }
 0xa80   : > { %v5235_v56 = vpack.c.bf16 %v5228_v52, %v5227_v9 }
 0xa82   : > { %8933 = vmatmul.mubr.msk.bf16.gmra.mrb[20].mxu1 %vm5245_vm12, %v5235_v56  ;;  %8955 = vmatmul.mubr.msk.bf16.gmra.mrb[212].mxu0 %vm5245_vm12, %v5235_v56 }
 0xa83   : > { %v5208_v4 = vpop.f32.mrb[4].mxu1  ;;  %8936 = vmatprep.mubr.msk.bf16.mxu1 %vm9664_vm1, %v9663_v10  ;;  %8958 = vmatprep.mubr.msk.bf16.mxu0 %vm9664_vm1, %v9663_v10 }
 0xa84   : > { %v5229_v59 = vmax.f32 %v5064_v55, %v5208_v4  ;;  %v5210_v15 = vpop.f32.mrb[5].mxu1 }
 0xa85   : > { %v5211_v3 = vpop.f32.mrb[6].mxu1 }
 0xa86   : > { %v5230_v17 = vmax.f32 %v5067_v39, %v5211_v3  ;;  %v5213_v50 = vpop.f32.mrb[7].mxu1 }
 0xa88   : > { %v5236_v57 = vpack.c.bf16 %v5230_v17, %v5229_v59 }
 0xa8a   : > { %8937 = vmatmul.mubr.msk.bf16.gmra.mrb[24].mxu1 %vm5245_vm12, %v5236_v57  ;;  %8959 = vmatmul.mubr.msk.bf16.gmra.mrb[216].mxu0 %vm5245_vm12, %v5236_v57 }
 0xa8b   : > { %v5216_v21 = vpop.f32.mrb[8].mxu1  ;;  %8940 = vmatprep.mubr.msk.bf16.mxu1 %vm9664_vm1, %v9663_v10  ;;  %8962 = vmatprep.mubr.msk.bf16.mxu0 %vm9664_vm1, %v9663_v10 }
 0xa8c   : > { %v5231_v49 = vmax.f32 %v5072_v34, %v5216_v21  ;;  %v5218_v13 = vpop.f32.mrb[9].mxu1 }
 0xa8d   : > { %v5219_v12 = vpop.f32.mrb[10].mxu1 }
 0xa8e   : > { %v5232_v60 = vmax.f32 %v5075_v42, %v5219_v12  ;;  %v5221_v32 = vpop.f32.mrb[11].mxu1 }
 0xa90   : > { %v5237_v62 = vpack.c.bf16 %v5232_v60, %v5231_v49 }
 0xa92   : > { %8941 = vmatmul.mubr.msk.bf16.gmra.mrb[28].mxu1 %vm5245_vm12, %v5237_v62  ;;  %8963 = vmatmul.mubr.msk.bf16.gmra.mrb[220].mxu0 %vm5245_vm12, %v5237_v62 }
 0xa93   : > { %8990 = vmatprep.mubr.msk.bf16.mxu0 %vm9664_vm1, %v9663_v10  ;;  %8968 = vmatprep.mubr.msk.bf16.mxu1 %vm9664_vm1, %v9663_v10 }
 0xb45   : > { %v5299_v35 = vpop.f32.mrb[12].mxu1  ;;  %v5383_v19 = vpop.f32.mrb[204].mxu0 }
 0xb46   : > { %v5422_v0 = vmax.f32 %v5299_v35, %v5383_v19  ;;  %v8926_v61 = vpop.f32.mrb[13].mxu1  ;;  %v8948_v11 = vpop.f32.mrb[205].mxu0 }
 0xb47   : > { %v5302_v26 = vpop.f32.mrb[14].mxu1  ;;  %v5386_v29 = vpop.f32.mrb[206].mxu0 }
 0xb48   : > { %v5423_v53 = vmax.f32 %v5302_v26, %v5386_v29  ;;  %v8927_v31 = vpop.f32.mrb[15].mxu1  ;;  %v8949_v28 = vpop.f32.mrb[207].mxu0 }
 0xb4a   : > { %v11170_v25 = vpack.c.bf16 %v5423_v53, %v5422_v0 }
 0xb4c   : > { %8991 = vmatmul.mubr.msk.bf16.vlgmr.msra.gmra.mrb[224].mxu0 %vm5438_vm14, %v11170_v25  ;;  %8969 = vmatmul.mubr.msk.bf16.vlgmr.msra.gmra.mrb[32].mxu1 %vm5438_vm14, %v11170_v25 }
 0xb4d   : > { %v5307_v55 = vpop.f32.mrb[16].mxu1  ;;  %v5391_v30 = vpop.f32.mrb[208].mxu0  ;;  %8994 = vmatprep.mubr.msk.bf16.mxu0 %vm9664_vm1, %v9663_v10  ;;  %8972 = vmatprep.mubr.msk.bf16.mxu1 %vm9664_vm1, %v9663_v10 }
 0xb4e   : > { %v5424_v39 = vmax.f32 %v5307_v55, %v5391_v30  ;;  %v8930_v43 = vpop.f32.mrb[17].mxu1  ;;  %v8952_v34 = vpop.f32.mrb[209].mxu0  ;;  %9063 = vmatpush3.bf16.msra.mxu0 %v5972_v38 }
 0xb4f   : > { %v5310_v40 = vpop.f32.mrb[18].mxu1  ;;  %v5394_v42 = vpop.f32.mrb[210].mxu0  ;;  %9110 = vmatprep.subr.bf16.mxu0 %v9663_v10 }
 0xb50   : > { %v5425_v2 = vmax.f32 %v5310_v40, %v5394_v42  ;;  %v8931_v48 = vpop.f32.mrb[19].mxu1  ;;  %v8953_v54 = vpop.f32.mrb[211].mxu0 }
 0xb52   : > { %v11182_v51 = vpack.c.bf16 %v5425_v2, %v5424_v39 }
 0xb54   : > { %8995 = vmatmul.mubr.msk.bf16.gmra.mrb[228].mxu0 %vm5438_vm14, %v11182_v51  ;;  %8973 = vmatmul.mubr.msk.bf16.gmra.mrb[36].mxu1 %vm5438_vm14, %v11182_v51 }
 0xb55   : > { %v5315_v45 = vpop.f32.mrb[20].mxu1  ;;  %v5399_v36 = vpop.f32.mrb[212].mxu0  ;;  %8998 = vmatprep.mubr.msk.bf16.mxu0 %vm9664_vm1, %v9663_v10  ;;  %8976 = vmatprep.mubr.msk.bf16.mxu1 %vm9664_vm1, %v9663_v10 }
 0xb56   : > { %v5426_v44 = vmax.f32 %v5315_v45, %v5399_v36  ;;  %v8934_v7 = vpop.f32.mrb[21].mxu1  ;;  %v8956_v37 = vpop.f32.mrb[213].mxu0 }
 0xb57   : > { %v5318_v14 = vpop.f32.mrb[22].mxu1  ;;  %v5402_v41 = vpop.f32.mrb[214].mxu0 }
 0xb58   : > { %v5427_v22 = vmax.f32 %v5318_v14, %v5402_v41  ;;  %v8935_v46 = vpop.f32.mrb[23].mxu1  ;;  %v8957_v47 = vpop.f32.mrb[215].mxu0 }
 0xb5a   : > { %v11192_v20 = vpack.c.bf16 %v5427_v22, %v5426_v44 }
 0xb5c   : > { %8999 = vmatmul.mubr.msk.bf16.gmra.mrb[232].mxu0 %vm5438_vm14, %v11192_v20  ;;  %8977 = vmatmul.mubr.msk.bf16.gmra.mrb[40].mxu1 %vm5438_vm14, %v11192_v20 }
 0xb5d   : > { %v5323_v63 = vpop.f32.mrb[24].mxu1  ;;  %v5407_v9 = vpop.f32.mrb[216].mxu0  ;;  %9002 = vmatprep.mubr.msk.bf16.mxu0 %vm9664_vm1, %v9663_v10  ;;  %8980 = vmatprep.mubr.msk.bf16.mxu1 %vm9664_vm1, %v9663_v10 }
 0xb5e   : > { %v5428_v33 = vmax.f32 %v5323_v63, %v5407_v9  ;;  %v8938_v58 = vpop.f32.mrb[25].mxu1  ;;  %v8960_v52 = vpop.f32.mrb[217].mxu0 }
 0xb5f   : > { %v5326_v8 = vpop.f32.mrb[26].mxu1  ;;  %v5410_v56 = vpop.f32.mrb[218].mxu0 }
 0xb60   : > { %v5429_v4 = vmax.f32 %v5326_v8, %v5410_v56  ;;  %v8939_v59 = vpop.f32.mrb[27].mxu1  ;;  %v8961_v15 = vpop.f32.mrb[219].mxu0 }
 0xb62   : > { %v5435_v3 = vpack.c.bf16 %v5429_v4, %v5428_v33 }
 0xb64   : > { %9003 = vmatmul.mubr.msk.bf16.gmra.mrb[236].mxu0 %vm5438_vm14, %v5435_v3  ;;  %8981 = vmatmul.mubr.msk.bf16.gmra.mrb[44].mxu1 %vm5438_vm14, %v5435_v3 }
 0xb65   : > { %v5331_v17 = vpop.f32.mrb[28].mxu1  ;;  %v5415_v50 = vpop.f32.mrb[220].mxu0  ;;  %9006 = vmatprep.mubr.msk.bf16.mxu0 %vm9664_vm1, %v9663_v10  ;;  %8984 = vmatprep.mubr.msk.bf16.mxu1 %vm9664_vm1, %v9663_v10 }
 0xb66   : > { %v5430_v57 = vmax.f32 %v5331_v17, %v5415_v50  ;;  %v8942_v21 = vpop.f32.mrb[29].mxu1  ;;  %v8964_v49 = vpop.f32.mrb[221].mxu0 }
 0xb67   : > { %v5334_v13 = vpop.f32.mrb[30].mxu1  ;;  %v5418_v12 = vpop.f32.mrb[222].mxu0  ;;  %v9603_v21 = vld [vmem:[%s11583_s11 + $0x44] sm:$0xff]   ;;  %v9604_v49 = vld [vmem:[%s11583_s11 + $0x4c] sm:$0xff]  }
 0xb68   : > { %v5431_v60 = vmax.f32 %v5334_v13, %v5418_v12  ;;  %v8943_v32 = vpop.f32.mrb[31].mxu1  ;;  %v8965_v62 = vpop.f32.mrb[223].mxu0 }
 0xb6a   : > { %v5436_v1 = vpack.c.bf16 %v5431_v60, %v5430_v57 }
 0xb6c   : > { %9007 = vmatmul.mubr.msk.bf16.gmra.mrb[240].mxu0 %vm5438_vm14, %v5436_v1  ;;  %8985 = vmatmul.mubr.msk.bf16.gmra.mrb[48].mxu1 %vm5438_vm14, %v5436_v1 }
 0xb6d   : > { %9064 = vmatprep.mubr.msk.bf16.mxu0 %vm9664_vm1, %v9663_v10  ;;  %9020 = vmatprep.mubr.msk.bf16.mxu1 %vm5690_vm15, %v9602_v24 }
 0xb74   : > { %9065 = vmatmul.mubr.msk.bf16.vlgmr.msra.gmra.mrb[244].mxu0 %vm5438_vm14, %v11170_v25 }
 0xb75   : > { %9068 = vmatprep.mubr.msk.bf16.mxu0 %vm9664_vm1, %v9663_v10  ;;  %9111 = vmatpush3.bf16.msra.mxu0 %v6244_v16 }
 0xb76   : > { %9158 = vmatprep.subr.bf16.mxu0 %v9663_v10 }
 0xb7c   : > { %9069 = vmatmul.mubr.msk.bf16.gmra.mrb[248].mxu0 %vm5438_vm14, %v11182_v51 }
 0xb7d   : > { %9072 = vmatprep.mubr.msk.bf16.mxu0 %vm9664_vm1, %v9663_v10 }
 0xb84   : > { %9073 = vmatmul.mubr.msk.bf16.gmra.mrb[252].mxu0 %vm5438_vm14, %v11192_v20 }
 0xb85   : > { %9076 = vmatprep.mubr.msk.bf16.mxu0 %vm9664_vm1, %v9663_v10 }
 0xb8c   : > { %9077 = vmatmul.mubr.msk.bf16.gmra.mrb[0].mxu0 %vm5438_vm14, %v5435_v3 }
 0xb8d   : > { %9080 = vmatprep.mubr.msk.bf16.mxu0 %vm9664_vm1, %v9663_v10 }
 0xb94   : > { %9081 = vmatmul.mubr.msk.bf16.gmra.mrb[4].mxu0 %vm5438_vm14, %v5436_v1 }
 0xb95   : > { %9112 = vmatprep.mubr.msk.bf16.mxu0 %vm9664_vm1, %v9663_v10 }
 0xb9c   : > { %9113 = vmatmul.mubr.msk.bf16.vlgmr.msra.gmra.mrb[8].mxu0 %vm5438_vm14, %v11170_v25 }
 0xb9d   : > { %9116 = vmatprep.mubr.msk.bf16.mxu0 %vm9664_vm1, %v9663_v10  ;;  %9159 = vmatpush3.bf16.msra.mxu0 %v6516_v18 }
 0xba4   : > { %9117 = vmatmul.mubr.msk.bf16.gmra.mrb[12].mxu0 %vm5438_vm14, %v11182_v51 }
 0xba5   : > { %9120 = vmatprep.mubr.msk.bf16.mxu0 %vm9664_vm1, %v9663_v10 }
 0xbac   : > { %9121 = vmatmul.mubr.msk.bf16.gmra.mrb[16].mxu0 %vm5438_vm14, %v11192_v20 }
 0xbad   : > { %9124 = vmatprep.mubr.msk.bf16.mxu0 %vm9664_vm1, %v9663_v10 }
 0xbb4   : > { %9125 = vmatmul.mubr.msk.bf16.gmra.mrb[20].mxu0 %vm5438_vm14, %v5435_v3 }
 0xbb5   : > { %9128 = vmatprep.mubr.msk.bf16.mxu0 %vm9664_vm1, %v9663_v10 }
 0xbbc   : > { %9129 = vmatmul.mubr.msk.bf16.gmra.mrb[24].mxu0 %vm5438_vm14, %v5436_v1 }
 0xbbd   : > { %9160 = vmatprep.mubr.msk.bf16.mxu0 %vm9664_vm1, %v9663_v10 }
 0xbc4   : > { %9161 = vmatmul.mubr.msk.bf16.vlgmr.msra.gmra.mrb[28].mxu0 %vm5438_vm14, %v11170_v25 }
 0xbc5   : > { %9164 = vmatprep.mubr.msk.bf16.mxu0 %vm9664_vm1, %v9663_v10 }
 0xbcc   : > { %9165 = vmatmul.mubr.msk.bf16.gmra.mrb[32].mxu0 %vm5438_vm14, %v11182_v51 }
 0xbcd   : > { %9168 = vmatprep.mubr.msk.bf16.mxu0 %vm9664_vm1, %v9663_v10 }
 0xbd4   : > { %9169 = vmatmul.mubr.msk.bf16.gmra.mrb[36].mxu0 %vm5438_vm14, %v11192_v20 }
 0xbd5   : > { %9172 = vmatprep.mubr.msk.bf16.mxu0 %vm9664_vm1, %v9663_v10 }
 0xbdc   : > { %9173 = vmatmul.mubr.msk.bf16.gmra.mrb[40].mxu0 %vm5438_vm14, %v5435_v3 }
 0xbdd   : > { %9176 = vmatprep.mubr.msk.bf16.mxu0 %vm9664_vm1, %v9663_v10 }
 0xbe4   : > { %9177 = vmatmul.mubr.msk.bf16.gmra.mrb[44].mxu0 %vm5438_vm14, %v5436_v1  ;;  %v9605_v1 = vld [vmem:[%s11583_s11 + $0x54] sm:$0xff]  }
 0xc1f   : > { %v5494_v23 = vpop.f32.mrb[32].mxu1  ;;  %v5592_v35 = vpop.f32.mrb[224].mxu0 }
 0xc20   : > { %v8970_v19 = vpop.f32.mrb[33].mxu1  ;;  %v8992_v0 = vpop.f32.mrb[225].mxu0 }
 0xc21   : > { %v5497_v61 = vpop.f32.mrb[34].mxu1  ;;  %v5595_v11 = vpop.f32.mrb[226].mxu0  ;;  %v9608_v19 = vld [vmem:[%s11583_s11 + $0x6c] sm:$0xff]  }
 0xc22   : > { %v5533_v26 = vpack.c.bf16 %v5497_v61, %v5494_v23  ;;  %v5631_v29 = vpack.c.bf16 %v5595_v11, %v5592_v35  ;;  %v8971_v27 = vpop.f32.mrb[35].mxu1  ;;  %v8993_v53 = vpop.f32.mrb[227].mxu0  ;;  %v9607_v35 = vld [vmem:[%s11583_s11 + $0x64] sm:$0xff]  }
 0xc23   : > { %v9609_v27 = vld [vmem:[%s11583_s11 + $0x74] ss:$0 sps:$4 sm:$0xff]   ;;  %v9610_v53 = vld [vmem:[%s11583_s11] sm:$0xff]  }
 0xc24   : > { %9010 = vmatprep.subr.bf16.mxu1 %v5631_v29 }
 0xc25   : > { %9011 = vmatpush3.bf16.msra.mxu1 %v5631_v29 }
 0xc27   : > { %v5502_v31 = vpop.f32.mrb[36].mxu1  ;;  %v5600_v28 = vpop.f32.mrb[228].mxu0 }
 0xc28   : > { %v8974_v25 = vpop.f32.mrb[37].mxu1  ;;  %v8996_v38 = vpop.f32.mrb[229].mxu0 }
 0xc29   : > { %v5505_v55 = vpop.f32.mrb[38].mxu1  ;;  %v5603_v30 = vpop.f32.mrb[230].mxu0 }
 0xc2a   : > { %v5534_v39 = vpack.c.bf16 %v5505_v55, %v5502_v31  ;;  %v5632_v43 = vpack.c.bf16 %v5603_v30, %v5600_v28  ;;  %v8975_v34 = vpop.f32.mrb[39].mxu1  ;;  %v8997_v40 = vpop.f32.mrb[231].mxu0  ;;  %v9611_v30 = vld [vmem:[%s11583_s11 + $0x8] sm:$0xff]  }
 0xc2c   : > { %9012 = vmatprep.subr.bf16.mxu1 %v5632_v43 }
 0xc2d   : > { %9013 = vmatpush3.bf16.msra.mxu1 %v5632_v43 }
 0xc2f   : > { %v5608_v42 = vpop.f32.mrb[232].mxu0  ;;  %v5510_v2 = vpop.f32.mrb[40].mxu1 }
 0xc30   : > { %v9000_v48 = vpop.f32.mrb[233].mxu0  ;;  %v8978_v54 = vpop.f32.mrb[41].mxu1 }
 0xc31   : > { %v5611_v51 = vpop.f32.mrb[234].mxu0  ;;  %v5513_v45 = vpop.f32.mrb[42].mxu1  ;;  %v9613_v48 = vld [vmem:[%s11583_s11 + $0x18] sm:$0xff]   ;;  %v9614_v54 = vld [vmem:[%s11583_s11 + $0x20] sm:$0xff]  }
 0xc32   : > { %v5633_v36 = vpack.c.bf16 %v5611_v51, %v5608_v42  ;;  %v9001_v44 = vpop.f32.mrb[235].mxu0  ;;  %v5535_v7 = vpack.c.bf16 %v5513_v45, %v5510_v2  ;;  %v8979_v37 = vpop.f32.mrb[43].mxu1 }
 0xc33   : > { %v9615_v37 = vld [vmem:[%s11583_s11 + $0x28] sm:$0xff]  }
 0xc34   : > { %9014 = vmatprep.subr.bf16.mxu1 %v5633_v36 }
 0xc35   : > { %9015 = vmatpush3.bf16.msra.mxu1 %v5633_v36 }
 0xc37   : > { %v5616_v14 = vpop.f32.mrb[236].mxu0  ;;  %v5518_v41 = vpop.f32.mrb[44].mxu1 }
 0xc38   : > { %v9004_v22 = vpop.f32.mrb[237].mxu0  ;;  %v8982_v46 = vpop.f32.mrb[45].mxu1 }
 0xc39   : > { %v5619_v47 = vpop.f32.mrb[238].mxu0  ;;  %v5521_v20 = vpop.f32.mrb[46].mxu1 }
 0xc3a   : > { %v5634_v63 = vpack.c.bf16 %v5619_v47, %v5616_v14  ;;  %v9005_v9 = vpop.f32.mrb[239].mxu0  ;;  %v5536_v33 = vpack.c.bf16 %v5521_v20, %v5518_v41  ;;  %v8983_v58 = vpop.f32.mrb[47].mxu1  ;;  %v9616_v14 = vld [vmem:[%s11583_s11 + $0x30] sm:$0xff]  }
 0xc3b   : > { %v9618_v9 = vld [vmem:[%s11583_s11 + $0x78] sm:$0xff]  }
 0xc3c   : > { %9016 = vmatprep.subr.bf16.mxu1 %v5634_v63 }
 0xc3d   : > { %9017 = vmatpush3.bf16.msra.mxu1 %v5634_v63  ;;  %v9617_v63 = vld [vmem:[%s11583_s11 + $0x38] ss:$0 sps:$4 sm:$0xff]  }
 0xc3f   : > { %v5624_v52 = vpop.f32.mrb[240].mxu0  ;;  %v5526_v8 = vpop.f32.mrb[48].mxu1 }
 0xc40   : > { %v9008_v56 = vpop.f32.mrb[241].mxu0  ;;  %v8986_v4 = vpop.f32.mrb[49].mxu1 }
 0xc41   : > { %v5627_v59 = vpop.f32.mrb[242].mxu0  ;;  %v5529_v15 = vpop.f32.mrb[50].mxu1  ;;  %v9619_v4 = vld [vmem:[%s11583_s11 + $0x80] sm:$0xff]  }
 0xc42   : > { %v5635_v3 = vpack.c.bf16 %v5627_v59, %v5624_v52  ;;  %v9009_v17 = vpop.f32.mrb[243].mxu0  ;;  %v5537_v50 = vpack.c.bf16 %v5529_v15, %v5526_v8  ;;  %v8987_v57 = vpop.f32.mrb[51].mxu1  ;;  %v9620_v59 = vld [vmem:[%s11583_s11 + $0x88] sm:$0xff]  }
 0xc44   : > { %9018 = vmatprep.subr.bf16.mxu1 %v5635_v3 }
 0xc45   : > { %9019 = vmatpush3.bf16.msra.mxu1 %v5635_v3 }
 0xc46   : > { %9036 = vmatprep.subr.bf16.mxu1 %v5533_v26 }
 0xc47   : > { %v6008_v13 = vpop.f32.mrb[244].mxu0 }
 0xc48   : > { %9021 = vmatmul.mubr.msk.bf16.vlgmr.msra.gmra.mrb[52].mxu1 %vm5690_vm15, %v9603_v21  ;;  %v9066_v12 = vpop.f32.mrb[245].mxu0  ;;  %v9621_v21 = vld [vmem:[%s11583_s11 + $0x90] sm:$0xff]  }
 0xc49   : > { %9037 = vmatpush3.bf16.msra.mxu1 %v5533_v26  ;;  %v6011_v60 = vpop.f32.mrb[246].mxu0  ;;  %9024 = vmatprep.mubr.msk.bf16.mxu1 %vm5690_vm15, %v9604_v49  ;;  %v9622_v49 = vld [vmem:[%s11583_s11 + $0x98] sm:$0xff]  }
 0xc4a   : > { %v6047_v32 = vpack.c.bf16 %v6011_v60, %v6008_v13  ;;  %9038 = vmatprep.subr.bf16.mxu1 %v5534_v39  ;;  %v9067_v62 = vpop.f32.mrb[247].mxu0 }
 0xc4d   : > { %9039 = vmatpush3.bf16.msra.mxu1 %v5534_v39  ;;  %v9612_v39 = vld [vmem:[%s11583_s11 + $0x10] sm:$0xff]  }
 0xc4e   : > { %9040 = vmatprep.subr.bf16.mxu1 %v5535_v7 }
 0xc4f   : > { %v6016_v16 = vpop.f32.mrb[248].mxu0 }
 0xc50   : > { %9025 = vmatmul.mubr.msk.bf16.gmra.mrb[56].mxu1 %vm5690_vm15, %v9605_v1  ;;  %v9070_v6 = vpop.f32.mrb[249].mxu0  ;;  %v9623_v1 = vld [vmem:[%s11583_s11 + $0xa0] sm:$0xff]  }
 0xc51   : > { %9041 = vmatpush3.bf16.msra.mxu1 %v5535_v7  ;;  %v6019_v18 = vpop.f32.mrb[250].mxu0  ;;  %9028 = vmatprep.mubr.msk.bf16.mxu1 %vm5690_vm15, %v9606_v5  ;;  %v9624_v5 = vld [vmem:[%s11583_s11 + $0xa8] sm:$0xff]  }
 0xc52   : > { %v6048_v24 = vpack.c.bf16 %v6019_v18, %v6016_v16  ;;  %9042 = vmatprep.subr.bf16.mxu1 %v5536_v33  ;;  %v9071_v23 = vpop.f32.mrb[251].mxu0 }
 0xc55   : > { %9043 = vmatpush3.bf16.msra.mxu1 %v5536_v33 }
 0xc56   : > { %9044 = vmatprep.subr.bf16.mxu1 %v5537_v50 }
 0xc57   : > { %v6024_v0 = vpop.f32.mrb[252].mxu0 }
 0xc58   : > { %9029 = vmatmul.mubr.msk.bf16.gmra.mrb[60].mxu1 %vm5690_vm15, %v9607_v35  ;;  %v9074_v61 = vpop.f32.mrb[253].mxu0  ;;  %v9625_v35 = vld [vmem:[%s11583_s11 + $0xb0] ss:$0 sps:$4 sm:$0xff]  }
 0xc59   : > { %9045 = vmatpush3.bf16.msra.mxu1 %v5537_v50  ;;  %v6027_v11 = vpop.f32.mrb[254].mxu0  ;;  %9032 = vmatprep.mubr.msk.bf16.mxu1 %vm5690_vm15, %v9608_v19  ;;  %v9626_v19 = vld [vmem:[%s11583_s11 + $0xb4] sm:$0xff]  }
 0xc5a   : > { %v6049_v26 = vpack.c.bf16 %v6027_v11, %v6024_v0  ;;  %v9075_v29 = vpop.f32.mrb[255].mxu0  ;;  %9084 = vmatprep.subr.bf16.mxu1 %v6047_v32 }
 0xc5f   : > { %v6032_v31 = vpop.f32.mrb[0].mxu0 }
 0xc60   : > { %9033 = vmatmul.mubr.msk.bf16.gmra.mrb[64].mxu1 %vm5690_vm15, %v9609_v27  ;;  %v9078_v28 = vpop.f32.mrb[1].mxu0  ;;  %v9627_v27 = vld [vmem:[%s11583_s11 + $0xbc] sm:$0xff]  }
 0xc61   : > { %v6035_v25 = vpop.f32.mrb[2].mxu0  ;;  %9046 = vmatprep.mubr.msk.bf16.mxu1 %vm5690_vm15, %v9610_v53  ;;  %v9628_v53 = vld [vmem:[%s11583_s11 + $0xc4] sm:$0xff]  }
 0xc62   : > { %v6050_v38 = vpack.c.bf16 %v6035_v25, %v6032_v31  ;;  %v9079_v55 = vpop.f32.mrb[3].mxu0 }
 0xc67   : > { %v6040_v43 = vpop.f32.mrb[4].mxu0 }
 0xc68   : > { %9047 = vmatmul.mubr.msk.bf16.vlgmr.msra.gmra.mrb[52].mxu1 %vm5690_vm15, %v9611_v30  ;;  %v9082_v34 = vpop.f32.mrb[5].mxu0  ;;  %v9629_v30 = vld [vmem:[%s11583_s11 + $0xcc] sm:$0xff]  }
 0xc69   : > { %9085 = vmatpush3.bf16.msra.mxu1 %v6047_v32  ;;  %v6043_v40 = vpop.f32.mrb[6].mxu0  ;;  %9050 = vmatprep.mubr.msk.bf16.mxu1 %vm5690_vm15, %v9612_v39  ;;  %v9630_v39 = vld [vmem:[%s11583_s11 + $0xd4] sm:$0xff]  }
 0xc6a   : > { %v6051_v42 = vpack.c.bf16 %v6043_v40, %v6040_v43  ;;  %9086 = vmatprep.subr.bf16.mxu1 %v6048_v24  ;;  %v9083_v2 = vpop.f32.mrb[7].mxu0 }
 0xc6d   : > { %9087 = vmatpush3.bf16.msra.mxu1 %v6048_v24 }
 0xc6e   : > { %9088 = vmatprep.subr.bf16.mxu1 %v6049_v26 }
 0xc6f   : > { %v6280_v51 = vpop.f32.mrb[8].mxu0 }
 0xc70   : > { %9051 = vmatmul.mubr.msk.bf16.gmra.mrb[56].mxu1 %vm5690_vm15, %v9613_v48  ;;  %v9114_v45 = vpop.f32.mrb[9].mxu0  ;;  %v9631_v48 = vld [vmem:[%s11583_s11 + $0xdc] sm:$0xff]  }
 0xc71   : > { %9089 = vmatpush3.bf16.msra.mxu1 %v6049_v26  ;;  %v6283_v36 = vpop.f32.mrb[10].mxu0  ;;  %9054 = vmatprep.mubr.msk.bf16.mxu1 %vm5690_vm15, %v9614_v54  ;;  %v9632_v54 = vld [vmem:[%s11583_s11 + $0xe4] sm:$0xff]  }
 0xc72   : > { %9090 = vmatprep.subr.bf16.mxu1 %v6050_v38  ;;  %v6319_v44 = vpack.c.bf16 %v6283_v36, %v6280_v51  ;;  %v9115_v7 = vpop.f32.mrb[11].mxu0 }
 0xc75   : > { %9091 = vmatpush3.bf16.msra.mxu1 %v6050_v38 }
 0xc76   : > { %9092 = vmatprep.subr.bf16.mxu1 %v6051_v42 }
 0xc77   : > { %v6288_v41 = vpop.f32.mrb[12].mxu0 }
 0xc78   : > { %9055 = vmatmul.mubr.msk.bf16.gmra.mrb[60].mxu1 %vm5690_vm15, %v9615_v37  ;;  %v9118_v22 = vpop.f32.mrb[13].mxu0  ;;  %v9633_v37 = vld [vmem:[%s11583_s11 + $0xec] ss:$0 sps:$4 sm:$0xff]  }
 0xc79   : > { %9093 = vmatpush3.bf16.msra.mxu1 %v6051_v42  ;;  %v6291_v46 = vpop.f32.mrb[14].mxu0  ;;  %9058 = vmatprep.mubr.msk.bf16.mxu1 %vm5690_vm15, %v9616_v14  ;;  %v9634_v14 = vld [vmem:[%s11583_s11 + $0xf0] sm:$0xff]   ;;  %v9636_v22 = vld [vmem:[%s11583_s11 + $0x100] sm:$0xff]  }
 0xc7a   : > { %v6320_v47 = vpack.c.bf16 %v6291_v46, %v6288_v41  ;;  %9132 = vmatprep.subr.bf16.mxu1 %v6319_v44  ;;  %v9119_v20 = vpop.f32.mrb[15].mxu0  ;;  %v9635_v41 = vld [vmem:[%s11583_s11 + $0xf8] sm:$0xff]   ;;  %v9637_v46 = vld [vmem:[%s11583_s11 + $0x108] sm:$0xff]  }
 0xc7b   : > { %v9639_v20 = vld [vmem:[%s11583_s11 + $0x118] sm:$0xff]  }
 0xc7f   : > { %v6296_v33 = vpop.f32.mrb[16].mxu0 }
 0xc80   : > { %9059 = vmatmul.mubr.msk.bf16.gmra.mrb[68].mxu1 %vm5690_vm15, %v9617_v63  ;;  %v9122_v58 = vpop.f32.mrb[17].mxu0  ;;  %v9640_v63 = vld [vmem:[%s11583_s11 + $0x120] sm:$0xff]  }
 0xc81   : > { %v6299_v52 = vpop.f32.mrb[18].mxu0  ;;  %9094 = vmatprep.mubr.msk.bf16.mxu1 %vm5690_vm15, %v9618_v9  ;;  %v9641_v9 = vld [vmem:[%s11583_s11 + $0x128] ss:$0 sps:$4 sm:$0xff]  }
 0xc82   : > { %v6321_v8 = vpack.c.bf16 %v6299_v52, %v6296_v33  ;;  %v9123_v56 = vpop.f32.mrb[19].mxu0 }
 0xc83   : > { %v9642_v56 = vld [vmem:[%s11586_s14] sm:$0xff]  }
 0xc84   : > { %9222 = vmatprep.mubr.msk.bf16.mxu0 %vm6888_vm0, %v9642_v56 }
 0xc87   : > { %v6304_v15 = vpop.f32.mrb[20].mxu0 }
 0xc88   : > { %9095 = vmatmul.mubr.msk.bf16.vlgmr.msra.gmra.mrb[52].mxu1 %vm5690_vm15, %v9619_v4  ;;  %v9126_v3 = vpop.f32.mrb[21].mxu0 }
 0xc89   : > { %9133 = vmatpush3.bf16.msra.mxu1 %v6319_v44  ;;  %v6307_v17 = vpop.f32.mrb[22].mxu0  ;;  %9098 = vmatprep.mubr.msk.bf16.mxu1 %vm5690_vm15, %v9620_v59 }
 0xc8a   : > { %v6322_v50 = vpack.c.bf16 %v6307_v17, %v6304_v15  ;;  %9134 = vmatprep.subr.bf16.mxu1 %v6320_v47  ;;  %v9127_v57 = vpop.f32.mrb[23].mxu0 }
 0xc8d   : > { %9135 = vmatpush3.bf16.msra.mxu1 %v6320_v47  ;;  %v9638_v47 = vld [vmem:[%s11583_s11 + $0x110] sm:$0xff]  }
 0xc8e   : > { %9136 = vmatprep.subr.bf16.mxu1 %v6321_v8 }
 0xc8f   : > { %v6312_v13 = vpop.f32.mrb[24].mxu0 }
 0xc90   : > { %9099 = vmatmul.mubr.msk.bf16.gmra.mrb[56].mxu1 %vm5690_vm15, %v9621_v21  ;;  %v9130_v12 = vpop.f32.mrb[25].mxu0 }
 0xc91   : > { %9137 = vmatpush3.bf16.msra.mxu1 %v6321_v8  ;;  %v6315_v60 = vpop.f32.mrb[26].mxu0  ;;  %9102 = vmatprep.mubr.msk.bf16.mxu1 %vm5690_vm15, %v9622_v49 }
 0xc92   : > { %v6323_v32 = vpack.c.bf16 %v6315_v60, %v6312_v13  ;;  %9138 = vmatprep.subr.bf16.mxu1 %v6322_v50  ;;  %v9131_v62 = vpop.f32.mrb[27].mxu0 }
 0xc95   : > { %9139 = vmatpush3.bf16.msra.mxu1 %v6322_v50 }
 0xc96   : > { %9140 = vmatprep.subr.bf16.mxu1 %v6323_v32 }
 0xc97   : > { %v6552_v16 = vpop.f32.mrb[28].mxu0 }
 0xc98   : > { %9103 = vmatmul.mubr.msk.bf16.gmra.mrb[60].mxu1 %vm5690_vm15, %v9623_v1  ;;  %v9162_v6 = vpop.f32.mrb[29].mxu0 }
 0xc99   : > { %9141 = vmatpush3.bf16.msra.mxu1 %v6323_v32  ;;  %v6555_v18 = vpop.f32.mrb[30].mxu0  ;;  %9106 = vmatprep.mubr.msk.bf16.mxu1 %vm5690_vm15, %v9624_v5 }
 0xc9a   : > { %v6591_v24 = vpack.c.bf16 %v6555_v18, %v6552_v16  ;;  %v9163_v23 = vpop.f32.mrb[31].mxu0 }
 0xc9c   : > { %9180 = vmatprep.subr.bf16.mxu1 %v6591_v24 }
 0xc9f   : > { %v6560_v0 = vpop.f32.mrb[32].mxu0 }
 0xca0   : > { %9107 = vmatmul.mubr.msk.bf16.gmra.mrb[72].mxu1 %vm5690_vm15, %v9625_v35  ;;  %v9166_v61 = vpop.f32.mrb[33].mxu0  ;;  %v6787_v35 = vld [vmem:[%s11585_s13 + $0x10] sm:$0xff] }
 0xca1   : > { %v6563_v11 = vpop.f32.mrb[34].mxu0  ;;  %9142 = vmatprep.mubr.msk.bf16.mxu1 %vm5690_vm15, %v9626_v19  ;;  %v6785_v19 = vld [vmem:[%s11585_s13] sm:$0xff]  ;;  %v6788_v61 = vld [vmem:[%s11585_s13 + $0x18] sm:$0xff] }
 0xca2   : > { %v6592_v26 = vpack.c.bf16 %v6563_v11, %v6560_v0  ;;  %v9167_v29 = vpop.f32.mrb[35].mxu0 }
 0xca3   : > { %v6786_v29 = vld [vmem:[%s11585_s13 + $0x8] sm:$0xff] }
 0xca7   : > { %v6568_v31 = vpop.f32.mrb[36].mxu0 }
 0xca8   : > { %9143 = vmatmul.mubr.msk.bf16.vlgmr.msra.gmra.mrb[52].mxu1 %vm5690_vm15, %v9627_v27  ;;  %v9170_v28 = vpop.f32.mrb[37].mxu0 }
 0xca9   : > { %9181 = vmatpush3.bf16.msra.mxu1 %v6591_v24  ;;  %v6571_v25 = vpop.f32.mrb[38].mxu0  ;;  %9146 = vmatprep.mubr.msk.bf16.mxu1 %vm5690_vm15, %v9628_v53 }
 0xcaa   : > { %v6593_v38 = vpack.c.bf16 %v6571_v25, %v6568_v31  ;;  %9182 = vmatprep.subr.bf16.mxu1 %v6592_v26  ;;  %v9171_v55 = vpop.f32.mrb[39].mxu0 }
 0xcad   : > { %9183 = vmatpush3.bf16.msra.mxu1 %v6592_v26 }
 0xcae   : > { %9184 = vmatprep.subr.bf16.mxu1 %v6593_v38 }
 0xcaf   : > { %v6576_v43 = vpop.f32.mrb[40].mxu0 }
 0xcb0   : > { %9147 = vmatmul.mubr.msk.bf16.gmra.mrb[56].mxu1 %vm5690_vm15, %v9629_v30  ;;  %v9174_v34 = vpop.f32.mrb[41].mxu0 }
 0xcb1   : > { %9185 = vmatpush3.bf16.msra.mxu1 %v6593_v38  ;;  %v6579_v40 = vpop.f32.mrb[42].mxu0  ;;  %9150 = vmatprep.mubr.msk.bf16.mxu1 %vm5690_vm15, %v9630_v39 }
 0xcb2   : > { %v6594_v42 = vpack.c.bf16 %v6579_v40, %v6576_v43  ;;  %v9175_v2 = vpop.f32.mrb[43].mxu0  ;;  %v6791_v43 = vld [vmem:[%s11585_s13 + $0x30] sm:$0xff]  ;;  %v6789_v40 = vld [vmem:[%s11585_s13 + $0x20] sm:$0xff] }
 0xcb4   : > { %9186 = vmatprep.subr.bf16.mxu1 %v6594_v42 }
 0xcb5   : > { %9187 = vmatpush3.bf16.msra.mxu1 %v6594_v42 }
 0xcb7   : > { %v6584_v51 = vpop.f32.mrb[44].mxu0 }
 0xcb8   : > { %9151 = vmatmul.mubr.msk.bf16.gmra.mrb[60].mxu1 %vm5690_vm15, %v9631_v48  ;;  %v9178_v45 = vpop.f32.mrb[45].mxu0  ;;  %v6792_v48 = vld [vmem:[%s11585_s13 + $0x38] sm:$0xff] }
 0xcb9   : > { %v6587_v36 = vpop.f32.mrb[46].mxu0  ;;  %9154 = vmatprep.mubr.msk.bf16.mxu1 %vm5690_vm15, %v9632_v54  ;;  %v6790_v45 = vld [vmem:[%s11585_s13 + $0x28] sm:$0xff] }
 0xcba   : > { %v6595_v44 = vpack.c.bf16 %v6587_v36, %v6584_v51  ;;  %v9179_v7 = vpop.f32.mrb[47].mxu0 }
 0xcbc   : > { %9188 = vmatprep.subr.bf16.mxu1 %v6595_v44 }
 0xcbd   : > { %9189 = vmatpush3.bf16.msra.mxu1 %v6595_v44 }
 0xcc0   : > { %9155 = vmatmul.mubr.msk.bf16.gmra.mrb[76].mxu1 %vm5690_vm15, %v9633_v37 }
 0xcc1   : > { %9190 = vmatprep.mubr.msk.bf16.mxu1 %vm5690_vm15, %v9634_v14 }
 0xcc8   : > { %9191 = vmatmul.mubr.msk.bf16.vlgmr.msra.gmra.mrb[52].mxu1 %vm5690_vm15, %v9635_v41 }
 0xcc9   : > { %9194 = vmatprep.mubr.msk.bf16.mxu1 %vm5690_vm15, %v9636_v22 }
 0xcd0   : > { %9195 = vmatmul.mubr.msk.bf16.gmra.mrb[56].mxu1 %vm5690_vm15, %v9637_v46 }
 0xcd1   : > { %9198 = vmatprep.mubr.msk.bf16.mxu1 %vm5690_vm15, %v9638_v47 }
 0xcd8   : > { %9199 = vmatmul.mubr.msk.bf16.gmra.mrb[60].mxu1 %vm5690_vm15, %v9639_v20  ;;  %v6795_v20 = vld [vmem:[%s11585_s13 + $0x50] sm:$0xff] }
 0xcd9   : > { %9202 = vmatprep.mubr.msk.bf16.mxu1 %vm5690_vm15, %v9640_v63 }
 0xce0   : > { %9203 = vmatmul.mubr.msk.bf16.gmra.mrb[80].mxu1 %vm5690_vm15, %v9641_v9  ;;  %v6793_v9 = vld [vmem:[%s11585_s13 + $0x40] sm:$0xff] }
 0xd33   : > { %v9034_v33 = vpop.f32.mrb[64].mxu1 }
 0xd34   : > { %v5797_v58 = vpop.f32.mrb[65].mxu1 }
 0xd35   : > { %v9035_v52 = vpop.f32.mrb[66].mxu1 }
 0xd36   : > { %v5800_v8 = vpop.f32.mrb[67].mxu1  ;;  %v6796_v52 = vld [vmem:[%s11585_s13 + $0x58] sm:$0xff] }
 0xd53   : > { %v9060_v4 = vpop.f32.mrb[68].mxu1 }
 0xd54   : > { %v5964_v59 = vadd.f32 %v9060_v4, %v9034_v33  ;;  %v5955_v15 = vpop.f32.mrb[69].mxu1  ;;  %v6794_v4 = vld [vmem:[%s11585_s13 + $0x48] sm:$0xff] }
 0xd55   : > { %v5956_v3 = vadd.f32 %v5955_v15, %v5797_v58  ;;  %v9061_v17 = vpop.f32.mrb[70].mxu1 }
 0xd56   : > { %v5958_v50 = vpop.f32.mrb[71].mxu1 }
 0xd57   : > { %v5959_v57 = vadd.f32 %v5958_v50, %v5800_v8 }
 0xd73   : > { %v9108_v21 = vpop.f32.mrb[72].mxu1 }
 0xd74   : > { %v6240_v49 = vadd.f32 %v9108_v21, %v5964_v59  ;;  %v6212_v13 = vpop.f32.mrb[73].mxu1 }
 0xd75   : > { %v6238_v12 = vadd.f32 %v6212_v13, %v5956_v3  ;;  %v9109_v60 = vpop.f32.mrb[74].mxu1 }
 0xd76   : > { %v6215_v32 = vpop.f32.mrb[75].mxu1 }
 0xd77   : > { %v6239_v62 = vadd.f32 %v6215_v32, %v5959_v57 }
 0xd93   : > { %v9156_v1 = vpop.f32.mrb[76].mxu1 }
 0xd94   : > { %v11437_v5 = vadd.f32 %v9156_v1, %v6240_v49  ;;  %v6484_v16 = vpop.f32.mrb[77].mxu1  ;;  %v6799_v1 = vld [vmem:[%s11585_s13 + $0x70] sm:$0xff] }
 0xd95   : > { %v11439_v6 = vadd.f32 %v6484_v16, %v6238_v12  ;;  %v9157_v18 = vpop.f32.mrb[78].mxu1 }
 0xd96   : > { %v6487_v24 = vpop.f32.mrb[79].mxu1  ;;  %v6797_v18 = vld [vmem:[%s11585_s13 + $0x60] sm:$0xff] }
 0xd97   : > { %v11441_v23 = vadd.f32 %v6487_v24, %v6239_v62 }
 0xd9b   : > { %v9192_v0 = vpop.f32.mrb[52].mxu1 }
 0xd9c   : > { %v6802_v11 = vadd.f32 %v9192_v0, %v6787_v35  ;;  %v6708_v26 = vpop.f32.mrb[53].mxu1  ;;  %v6798_v0 = vld [vmem:[%s11585_s13 + $0x68] sm:$0xff] }
 0xd9d   : > { %v6800_v27 = vadd.f32 %v6785_v19, %v6708_v26  ;;  %v9193_v53 = vpop.f32.mrb[54].mxu1 }
 0xd9e   : > { %v6803_v31 = vadd.f32 %v9193_v53, %v6788_v61  ;;  %v6711_v28 = vpop.f32.mrb[55].mxu1  ;;  %v6817_v38 = vmax.f32 %v6802_v11, 0.0 }
 0xd9f   : > { %v6801_v25 = vadd.f32 %v6786_v29, %v6711_v28  ;;  %v6815_v30 = vmax.f32 %v6800_v27, 0.0 }
 0xda0   : > { %v6818_v55 = vmax.f32 %v6803_v31, 0.0 }
 0xda1   : > { %v6816_v39 = vmax.f32 %v6801_v25, 0.0  ;;  %v9643_v25 = vld [vmem:[%s11586_s14 + $0x8] sm:$0xff]  }
 0xda2   : > { %v6831_v34 = vpack.c.bf16 %v6818_v55, %v6817_v38  ;;  %v9645_v38 = vld [vmem:[%s11586_s14 + $0x18] sm:$0xff]   ;;  %v9646_v55 = vld [vmem:[%s11586_s14 + $0x20] sm:$0xff]  }
 0xda3   : > { %v6830_v42 = vpack.c.bf16 %v6816_v39, %v6815_v30  ;;  %v9196_v2 = vpop.f32.mrb[56].mxu1  ;;  %v9647_v30 = vld [vmem:[%s11586_s14 + $0x28] ss:$0 sps:$4 sm:$0x33]   ;;  %v6851_v39 = vld [vmem:[%s11587_s15 + $0x10] sm:$0xff] }
 0xda4   : > { %v6806_v54 = vadd.f32 %v9196_v2, %v6791_v43  ;;  %v6724_v51 = vpop.f32.mrb[57].mxu1  ;;  %v6849_v43 = vld [vmem:[%s11587_s15] sm:$0xff] }
 0xda5   : > { %v6804_v36 = vadd.f32 %v6789_v40, %v6724_v51  ;;  %v9197_v44 = vpop.f32.mrb[58].mxu1  ;;  %9206 = vmatprep.subr.bf16.mxu0 %v6830_v42  ;;  %v6852_v40 = vld [vmem:[%s11587_s15 + $0x18] sm:$0xff] }
 0xda6   : > { %v6807_v7 = vadd.f32 %v9197_v44, %v6792_v48  ;;  %v6727_v37 = vpop.f32.mrb[59].mxu1  ;;  %9207 = vmatpush3.bf16.msra.mxu0 %v6830_v42  ;;  %v6821_v41 = vmax.f32 %v6806_v54, 0.0  ;;  %v6850_v48 = vld [vmem:[%s11587_s15 + $0x8] sm:$0xff] }
 0xda7   : > { %v6805_v14 = vadd.f32 %v6790_v45, %v6727_v37  ;;  %9208 = vmatprep.subr.bf16.mxu0 %v6831_v34  ;;  %v6819_v46 = vmax.f32 %v6804_v36, 0.0 }
 0xda8   : > { %v6822_v22 = vmax.f32 %v6807_v7, 0.0 }
 0xda9   : > { %v6820_v47 = vmax.f32 %v6805_v14, 0.0 }
 0xdaa   : > { %v6833_v63 = vpack.c.bf16 %v6822_v22, %v6821_v41  ;;  %9209 = vmatpush3.bf16.msra.mxu0 %v6831_v34  ;;  %v6855_v22 = vld [vmem:[%s11587_s15 + $0x30] sm:$0xff] }
 0xdab   : > { %v6832_v33 = vpack.c.bf16 %v6820_v47, %v6819_v46  ;;  %v9200_v58 = vpop.f32.mrb[60].mxu1  ;;  %v6853_v47 = vld [vmem:[%s11587_s15 + $0x20] sm:$0xff] }
 0xdac   : > { %v6810_v8 = vadd.f32 %v9200_v58, %v6795_v20  ;;  %v6740_v56 = vpop.f32.mrb[61].mxu1 }
 0xdad   : > { %v6808_v59 = vadd.f32 %v6793_v9, %v6740_v56  ;;  %v9201_v15 = vpop.f32.mrb[62].mxu1  ;;  %9210 = vmatprep.subr.bf16.mxu0 %v6832_v33  ;;  %v6856_v9 = vld [vmem:[%s11587_s15 + $0x38] sm:$0xff] }
 0xdae   : > { %v6811_v3 = vadd.f32 %v9201_v15, %v6796_v52  ;;  %v6743_v17 = vpop.f32.mrb[63].mxu1  ;;  %9211 = vmatpush3.bf16.msra.mxu0 %v6832_v33  ;;  %v6825_v57 = vmax.f32 %v6810_v8, 0.0  ;;  %v6854_v52 = vld [vmem:[%s11587_s15 + $0x28] sm:$0xff] }
 0xdaf   : > { %v6809_v50 = vadd.f32 %v6794_v4, %v6743_v17  ;;  %9212 = vmatprep.subr.bf16.mxu0 %v6833_v63  ;;  %v6823_v49 = vmax.f32 %v6808_v59, 0.0 }
 0xdb0   : > { %v6826_v21 = vmax.f32 %v6811_v3, 0.0 }
 0xdb1   : > { %v6824_v13 = vmax.f32 %v6809_v50, 0.0 }
 0xdb2   : > { %v6835_v12 = vpack.c.bf16 %v6826_v21, %v6825_v57  ;;  %9213 = vmatpush3.bf16.msra.mxu0 %v6833_v63  ;;  %v6859_v21 = vld [vmem:[%s11587_s15 + $0x50] sm:$0xf] }
 0xdb3   : > { %v6834_v60 = vpack.c.bf16 %v6824_v13, %v6823_v49  ;;  %v9204_v32 = vpop.f32.mrb[80].mxu1  ;;  %v6857_v13 = vld [vmem:[%s11587_s15 + $0x40] sm:$0xff] }
 0xdb4   : > { %v6784_v62 = vadd.f32 %v9204_v32, %v11437_v5  ;;  %v6756_v16 = vpop.f32.mrb[81].mxu1 }
 0xdb5   : > { %v6782_v24 = vadd.f32 %v6756_v16, %v11439_v6  ;;  %v9205_v35 = vpop.f32.mrb[82].mxu1  ;;  %9214 = vmatprep.subr.bf16.mxu0 %v6834_v60 }
 0xdb6   : > { %v6759_v19 = vpop.f32.mrb[83].mxu1  ;;  %9215 = vmatpush3.bf16.msra.mxu0 %v6834_v60  ;;  %v6814_v5 = vadd.f32 %v6799_v1, %v6784_v62  ;;  %v6858_v1 = vld [vmem:[%s11587_s15 + $0x48] sm:$0xff] }
 0xdb7   : > { %v6812_v61 = vadd.f32 %v6797_v18, %v6782_v24  ;;  %v6783_v11 = vadd.f32 %v6759_v19, %v11441_v23  ;;  %9216 = vmatprep.subr.bf16.mxu0 %v6835_v12  ;;  %v9644_v23 = vld [vmem:[%s11586_s14 + $0x10] sm:$0xff]  }
 0xdb8   : > { %v6829_v29 = vmax.f32 %v6814_v5, 0.0 }
 0xdb9   : > { %v6813_v26 = vadd.f32 %v6798_v0, %v6783_v11  ;;  %v6827_v27 = vmax.f32 %v6812_v61, 0.0 }
 0xdba   : > { %9217 = vmatpush3.bf16.msra.mxu0 %v6835_v12  ;;  %v6837_v6 = vpack.c.bf16 %v6829_v29, %v6829_v29  ;;  %v9648_v29 = vld [vmem:[%s11588_s16] sm:$0x1f]  }
 0xdbb   : > { %v6828_v53 = vmax.f32 %v6813_v26, 0.0 }
 0xdbc   : > { %v6908_v28 = vsel %vm2620_vm4, %v6837_v6, 0 }
 0xdbd   : > { %v6836_v31 = vpack.c.bf16 %v6828_v53, %v6827_v27  ;;  %v7009_v27 = vld [vmem:[%s11589_s17] sm:$0xff] }
 0xdbf   : > { %9218 = vmatprep.subr.bf16.mxu0 %v6836_v31 }
 0xdc0   : > { %9219 = vmatpush3.bf16.msra.mxu0 %v6836_v31 }
 0xdc1   : > { %9390 = vmatprep.subr.msk.bf16.mxu0 %vm2620_vm4, %v6837_v6 }
 0xdc4   : > { %9221 = vmatpush3.bf16.msra.mxu0 %v6908_v28 }
 0xdc5   : > { %9234 = vmatprep.subr.bf16.mxu0 %v9663_v10 }
 0xdc7   : > { %9223 = vmatmul.mubr.msk.bf16.vlgmr.msra.gmra.mrb[48].mxu0 %vm6888_vm0, %v9643_v25 }
 0xdc8   : > { %9226 = vmatprep.mubr.msk.bf16.mxu0 %vm6888_vm0, %v9644_v23 }
 0xdcf   : > { %9227 = vmatmul.mubr.msk.bf16.gmra.mrb[52].mxu0 %vm6888_vm0, %v9645_v38 }
 0xdd0   : > { %9230 = vmatprep.mubr.msk.bf16.mxu0 %vm6888_vm0, %v9646_v55 }
 0xdd7   : > { %9231 = vmatmul.mubr.msk.bf16.gmra.mrb[56].mxu0 %vm6888_vm0, %v9647_v30 }
 0xdd8   : > { %9246 = vmatprep.mubr.msk.bf16.mxu0 %vm9664_vm1, %v9663_v10  ;;  %vm7063_vm1 = vcmask 7168  }
 0xe9a   : > { %v9224_v34 = vpop.f32.mrb[48].mxu0 }
 0xe9b   : > { %v6953_v42 = vadd.f32 %v9224_v34, %v6851_v39  ;;  %v6944_v2 = vpop.f32.mrb[49].mxu0 }
 0xe9c   : > { %v6945_v54 = vadd.f32 %v6944_v2, %v6849_v43  ;;  %v9225_v51 = vpop.f32.mrb[50].mxu0 }
 0xe9d   : > { %v6956_v45 = vadd.f32 %v9225_v51, %v6852_v40  ;;  %v6947_v36 = vpop.f32.mrb[51].mxu0  ;;  %v6992_v7 = vmax.f32 %v6953_v42, 0.0 }
 0xe9e   : > { %v6948_v44 = vadd.f32 %v6947_v36, %v6850_v48  ;;  %v6990_v14 = vmax.f32 %v6945_v54, 0.0 }
 0xe9f   : > { %v6993_v37 = vmax.f32 %v6956_v45, 0.0 }
 0xea0   : > { %v6991_v41 = vmax.f32 %v6948_v44, 0.0 }
 0xea1   : > { %v7002_v46 = vpack.c.bf16 %v6993_v37, %v6992_v7 }
 0xea2   : > { %v7001_v20 = vpack.c.bf16 %v6991_v41, %v6990_v14  ;;  %v9228_v63 = vpop.f32.mrb[52].mxu0 }
 0xea3   : > { %v6969_v33 = vadd.f32 %v9228_v63, %v6855_v22  ;;  %v6960_v58 = vpop.f32.mrb[53].mxu0 }
 0xea4   : > { %v6961_v8 = vadd.f32 %v6960_v58, %v6853_v47  ;;  %v9229_v56 = vpop.f32.mrb[54].mxu0  ;;  %9235 = vmatpush3.bf16.msra.mxu0 %v7001_v20 }
 0xea5   : > { %v6972_v4 = vadd.f32 %v9229_v56, %v6856_v9  ;;  %v6963_v59 = vpop.f32.mrb[55].mxu0  ;;  %9236 = vmatprep.subr.bf16.mxu0 %v9663_v10  ;;  %v6996_v3 = vmax.f32 %v6969_v33, 0.0 }
 0xea6   : > { %v6964_v15 = vadd.f32 %v6963_v59, %v6854_v52  ;;  %v6994_v50 = vmax.f32 %v6961_v8, 0.0 }
 0xea7   : > { %v6997_v17 = vmax.f32 %v6972_v4, 0.0 }
 0xea8   : > { %v6995_v57 = vmax.f32 %v6964_v15, 0.0  ;;  %9237 = vmatpush3.bf16.msra.mxu0 %v7002_v46 }
 0xea9   : > { %v7004_v49 = vpack.c.bf16 %v6997_v17, %v6996_v3  ;;  %9238 = vmatprep.subr.bf16.mxu0 %v9663_v10 }
 0xeaa   : > { %v7003_v12 = vpack.c.bf16 %v6995_v57, %v6994_v50  ;;  %v9232_v60 = vpop.f32.mrb[56].mxu0 }
 0xeab   : > { %v6985_v32 = vadd.f32 %v9232_v60, %v6859_v21  ;;  %v6976_v62 = vpop.f32.mrb[57].mxu0 }
 0xeac   : > { %v6977_v16 = vadd.f32 %v6976_v62, %v6857_v13  ;;  %9239 = vmatpush3.bf16.msra.mxu0 %v7003_v12  ;;  %v9233_v18 = vpop.f32.mrb[58].mxu0 }
 0xead   : > { %v6979_v24 = vpop.f32.mrb[59].mxu0  ;;  %9240 = vmatprep.subr.bf16.mxu0 %v9663_v10  ;;  %v7000_v19 = vmax.f32 %v6985_v32, 0.0 }
 0xeae   : > { %v6980_v35 = vadd.f32 %v6979_v24, %v6858_v1  ;;  %v6998_v0 = vmax.f32 %v6977_v16, 0.0 }
 0xeaf   : > { %v7006_v11 = vpack.c.bf16 %v7000_v19, %v7000_v19 }
 0xeb0   : > { %v6999_v5 = vmax.f32 %v6980_v35, 0.0  ;;  %9241 = vmatpush3.bf16.msra.mxu0 %v7004_v49 }
 0xeb1   : > { %9242 = vmatprep.subr.bf16.mxu0 %v9663_v10  ;;  %v7020_v26 = vsel %vm3451_vm10, %v7006_v11, 0 }
 0xeb2   : > { %v7005_v61 = vpack.c.bf16 %v6999_v5, %v6998_v0 }
 0xeb4   : > { %9243 = vmatpush3.bf16.msra.mxu0 %v7005_v61 }
 0xeb5   : > { %9244 = vmatprep.subr.bf16.mxu0 %v9663_v10  ;;  %v7010_v10 = vld [vmem:[%s11589_s17 + $0x8] sm:$0x3] }
 0xeb8   : > { %9245 = vmatpush3.bf16.msra.mxu0 %v7020_v26 }
 0xebb   : > { %9247 = vmatmul.mubr.msk.bf16.vlgmr.msra.gmra.mrb[60].mxu0 %vm3420_vm9, %v9648_v29 }
 0xf8e   : > { %v7056_v53 = vpop.f32.mrb[60].mxu0 }
 0xf8f   : > { %v7057_v31 = vadd.f32 %v7056_v53, %v7009_v27  ;;  %v9248_v6 = vpop.f32.mrb[61].mxu0 }
 0xf90   : > { %v7059_v28 = vpop.f32.mrb[62].mxu0 }
 0xf91   : > { %7064 = vst.msk [vmem:[%s575_s25] sm:$0xff] %vm7063_vm1, %v7057_v31  ;;  %v7060_v25 = vadd.f32 %v7059_v28, %v7010_v10  ;;  %v9249_v23 = vpop.f32.mrb[63].mxu0 }
 0xf93   : > { %7066 = vst.msk [vmem:[%s575_s25 + $0x8] sm:$0x3] %vm7065_vm2, %v7060_v25 }
 0xf94 PF: > { %s28_s27 = sadd.s32 1, %s9661_s27  }
 0xf95   : > { %p25_p4 = scmp.ge.s32.totalorder %s28_s27, 4  }
 0xf97   :  { %27 = sbr.rel (!%p25_p4) target bundleno = 4 (0x4), region = 150 }

</bundles_post_ra>
